<compile_context>
chip_gen: v6e
topology: v6e:2x2x1
jax: 0.10.0
libtpu: 0.0.40
codegen_flags: <defaults>
</compile_context>

<pallas_src>
import jax
import jax.numpy as jnp
from jax import lax
from jax.experimental import pallas as pl
from jax.experimental.pallas import tpu as pltpu
import numpy as np


def multi_ar_lstm_kernel(
    x_ref, mask_ref, tgt_ref, len_ref,
    we_ref, be_ref,          # embed:               (W, E), (1, E)
    wea_ref, bea_ref,        # fused [W_attn1|W_ih]: (E, E+4H), (1, E+4H) (b_ih+b_hh folded)
    wa2_ref, ba2_ref,        # attn out:            (E, A), (1, A)
    whh_ref,                 # LSTM recurrent:      (H, 4H), torch gate order i,f,g,o
    wda_ref, bda_ref,        # fused [W_dec1|W_ar]: (H, E+R), (1, E+R)
    wd2_ref, bd2_ref,        # decoder out row:     (1, E), (1, 1)
    out_ref,                 # (S, Bt)
    gx_ref, hseq_ref, ctx_ref,
):
    S, Bt, W = x_ref.shape
    E = we_ref.shape[1]
    H = whh_ref.shape[0]
    G = 4 * H
    A = wa2_ref.shape[1]
    R = wda_ref.shape[1] - E

    # ---- embed: Dropout(identity) -> Linear -> ReLU                 (S*Bt, E)
    x2 = x_ref[...].reshape(S * Bt, W)
    embed = jnp.maximum(
        jnp.dot(x2, we_ref[...], preferred_element_type=jnp.float32) + be_ref[...],
        0.0)

    # ---- one MXU pass over `embed`: attention hidden + LSTM x-gates
    ea = jnp.dot(embed, wea_ref[...], preferred_element_type=jnp.float32) + bea_ref[...]
    a1 = jnp.maximum(ea[:, :E], 0.0)                        # (S*Bt, E)
    gx_ref[...] = ea[:, E:].reshape(S, Bt, G)               # time-major, no transpose

    # ---- attention weights: Linear -> Softmax over attn_len (per row)
    logits = jnp.dot(a1, wa2_ref[...], preferred_element_type=jnp.float32) + ba2_ref[...]
    ex = jnp.exp(logits - jnp.max(logits, axis=-1, keepdims=True))
    attn = ex * pl.reciprocal(jnp.sum(ex, axis=-1, keepdims=True), approx=True)
    attn3 = attn.reshape(S, Bt, A)                          # (S, Bt, A)

    # ---- LSTM recurrence (torch gate order i, f, g, o), fully unrolled
    lane = lax.broadcasted_iota(jnp.int32, (Bt, G), 1)      # hoisted out of the loop
    g_gate = (lane >= 2 * H) & (lane < 3 * H)               # tanh lanes
    len_col = len_ref[...]                                  # (Bt, 1) int32

    def lstm_step(t, carry):
        h, c = carry
        gates = gx_ref[t] + jnp.dot(h, whh_ref[...],
                                    preferred_element_type=jnp.float32)
        # Single full-width EUP pass: sigmoid everywhere; the g-lanes (tanh) are
        # recovered via tanh(x) = 2*sigmoid(2x) - 1 using cheap VPU selects.
        pre = jnp.where(g_gate, gates * 2.0, gates)
        s = jax.nn.sigmoid(pre)
        act = jnp.where(g_gate, 2.0 * s - 1.0, s)
        i_g = act[:, 0 * H:1 * H]
        f_g = act[:, 1 * H:2 * H]
        g_g = act[:, 2 * H:3 * H]
        o_g = act[:, 3 * H:4 * H]
        c_new = f_g * c + i_g * g_g
        h_new = o_g * jnp.tanh(c_new)
        # pack_padded/pad_packed semantics: emitted hidden is zero past length
        hseq_ref[t] = h_new * (t < len_col).astype(jnp.float32)
        return h_new, c_new

    zeros_bh = jnp.zeros((Bt, H), jnp.float32)
    lax.fori_loop(0, S, lstm_step, (zeros_bh, zeros_bh), unroll=True)

    # ---- convolve(h, attn): ctx[t] = sum_i attn[t,:,i] * h[t-i]
    #      slab accumulation along the leading time axis (no concat temporaries)
    ctx_ref[...] = attn3[:, :, 0:1] * hseq_ref[...]
    for i in range(1, A):
        if i >= S:
            break
        ctx_ref[i:, :, :] = (ctx_ref[i:, :, :]
                             + attn3[i:, :, i:i + 1] * hseq_ref[:S - i, :, :])

    ctx2 = ctx_ref[...].reshape(S * Bt, H)

    # ---- one MXU pass over context: decoder hidden + AR weights
    da = jnp.dot(ctx2, wda_ref[...], preferred_element_type=jnp.float32) + bda_ref[...]
    d1 = jnp.maximum(da[:, :E], 0.0)                        # (S*Bt, E)
    ar_w3 = da[:, E:].reshape(S, Bt, R)                     # (S, Bt, R)

    # ---- decoder output column (E x 1) as VPU multiply + lane reduce
    in_part = (jnp.sum(d1.reshape(S, Bt, E) * wd2_ref[...], axis=-1)
               + bd2_ref[...])                              # (S, Bt)

    # ---- autoregressive part (teacher forcing): sum_i ar_w[t,:,i] * target[t-i]
    tgt = tgt_ref[...]                                      # (S, Bt)
    ar_part = ar_w3[:, :, 0] * tgt
    for i in range(1, R):
        if i >= S:
            break
        shifted = jnp.concatenate(
            [jnp.zeros((i, Bt), jnp.float32), tgt[:S - i, :]], axis=0)
        ar_part = ar_part + ar_w3[:, :, i] * shifted

    # single, unmasked-friendly lane-dense store
    out_ref[...] = (in_part + ar_part) * mask_ref[...]


def multi_ar_lstm_forward(inputs, mask, lengths, target, params, *, batch_tile=None):
    B, S, W = inputs.shape
    E = params["W_embed"].shape[1]
    H = params["W_hh"].shape[0]

    Bt = B if batch_tile is None else batch_tile
    assert B % Bt == 0, "batch_tile must divide batch"
    # NOTE: if Bt < B, pick Bt as a multiple of 128 (it is the lane dim of the
    # (S, B) operands). The small demo uses one full-batch block (grid size 1).

    # time-major, squeezed activations (lane-dense inside the kernel)
    x_tm = jnp.transpose(inputs.astype(jnp.float32), (1, 0, 2))        # (S, B, W)
    mask_tm = jnp.transpose(mask.reshape(B, S).astype(jnp.float32))    # (S, B)
    tgt_tm = jnp.transpose(target.reshape(B, S).astype(jnp.float32))   # (S, B)
    len_col = lengths.reshape(B, 1).astype(jnp.int32)                  # (B, 1)

    # fused weight stacks: one MXU pass per shared LHS
    w_ea = jnp.concatenate([params["W_attn1"], params["W_ih"]], axis=1)            # (E, E+4H)
    b_ea = jnp.concatenate([params["b_attn1"], params["b_ih"] + params["b_hh"]], axis=1)
    w_da = jnp.concatenate([params["W_dec1"], params["W_ar"]], axis=1)             # (H, E+R)
    b_da = jnp.concatenate([params["b_dec1"], params["b_ar"]], axis=1)
    w_d2 = params["W_dec2"].reshape(1, E)                                          # row vector
    b_d2 = params["b_dec2"].reshape(1, 1)

    args = (x_tm, mask_tm, tgt_tm, len_col,
            params["W_embed"], params["b_embed"],
            w_ea, b_ea,
            params["W_attn2"], params["b_attn2"],
            params["W_hh"],
            w_da, b_da,
            w_d2, b_d2)

    def full(shape):
        nd = len(shape)
        return pl.BlockSpec(shape, lambda b, _nd=nd: (0,) * _nd)

    in_specs = [
        pl.BlockSpec((S, Bt, W), lambda b: (0, b, 0)),   # x (time-major)
        pl.BlockSpec((S, Bt), lambda b: (0, b)),         # output mask
        pl.BlockSpec((S, Bt), lambda b: (0, b)),         # target
        pl.BlockSpec((Bt, 1), lambda b: (b, 0)),         # lengths
    ] + [full(a.shape) for a in args[4:]]

    out_tm = pl.pallas_call(
        multi_ar_lstm_kernel,
        out_shape=jax.ShapeDtypeStruct((S, B), jnp.float32),
        grid=(B // Bt,),
        in_specs=in_specs,
        out_specs=pl.BlockSpec((S, Bt), lambda b: (0, b)),
        scratch_shapes=[
            pltpu.VMEM((S, Bt, 4 * H), jnp.float32),   # LSTM x-gates, time-major
            pltpu.VMEM((S, Bt, H), jnp.float32),       # hidden outputs, time-major
            pltpu.VMEM((S, Bt, H), jnp.float32),       # attention context
        ],
        compiler_params=pltpu.CompilerParams(
            dimension_semantics=("parallel",),          # batch blocks -> megacore
            vmem_limit_bytes=32 * 1024 * 1024),
    )(*args)

    return jnp.transpose(out_tm)[:, :, None]             # (B, S, 1)


def init_params(key, W, E, H, A, R):
    ks = jax.random.split(key, 8)

    def lin(k, fin, fout):
        k1, k2 = jax.random.split(k)
        bound = 1.0 / np.sqrt(fin)
        w = jax.random.uniform(k1, (fin, fout), jnp.float32, -bound, bound)
        b = jax.random.uniform(k2, (1, fout), jnp.float32, -bound, bound)
        return w, b

    p = {}
    p["W_embed"], p["b_embed"] = lin(ks[0], W, E)
    p["W_attn1"], p["b_attn1"] = lin(ks[1], E, E)
    p["W_attn2"], p["b_attn2"] = lin(ks[2], E, A)
    # LSTM weights stored transposed (in_dim, 4H) for right-multiplication;
    # gate order i, f, g, o like torch.nn.LSTM
    p["W_ih"], p["b_ih"] = lin(ks[3], E, 4 * H)
    p["W_hh"], p["b_hh"] = lin(ks[4], H, 4 * H)
    p["W_dec1"], p["b_dec1"] = lin(ks[5], H, E)
    p["W_dec2"], p["b_dec2"] = lin(ks[6], E, 1)
    p["W_ar"], p["b_ar"] = lin(ks[7], H, R)
    return p


def reference_forward(inputs, mask, lengths, target, params):
    """Pure-JAX reference mirroring the PyTorch module (teacher-forced branch)."""
    B, S, W = inputs.shape
    H = params["W_hh"].shape[0]
    A = params["W_attn2"].shape[1]
    R = params["W_ar"].shape[1]

    x2 = inputs.reshape(B * S, W)
    embed = jax.nn.relu(x2 @ params["W_embed"] + params["b_embed"])
    a1 = jax.nn.relu(embed @ params["W_attn1"] + params["b_attn1"])
    attn = jax.nn.softmax(a1 @ params["W_attn2"] + params["b_attn2"], axis=1)
    attn3 = attn.reshape(B, S, A)

    gx = (embed @ params["W_ih"] + params["b_ih"] + params["b_hh"]).reshape(B, S, 4 * H)
    lm = (jnp.arange(S)[None, :] < lengths[:, None]).astype(jnp.float32)   # (B, S)

    def step(carry, xs):
        h, c = carry
        gxt, lmt = xs
        gates = gxt + h @ params["W_hh"]
        i_g = jax.nn.sigmoid(gates[:, :H])
        f_g = jax.nn.sigmoid(gates[:, H:2 * H])
        g_g = jnp.tanh(gates[:, 2 * H:3 * H])
        o_g = jax.nn.sigmoid(gates[:, 3 * H:])
        c = f_g * c + i_g * g_g
        h = o_g * jnp.tanh(c)
        return (h, c), h * lmt[:, None]

    (_, _), hs = lax.scan(step,
                          (jnp.zeros((B, H)), jnp.zeros((B, H))),
                          (gx.transpose(1, 0, 2), lm.T))
    h_bt = hs.transpose(1, 0, 2)

    def pad_shift(x, i):
        if i == 0:
            return x
        return jnp.concatenate(
            [jnp.zeros((B, i) + x.shape[2:], x.dtype), x[:, :S - i]], axis=1)

    context = sum(attn3[:, :, i:i + 1] * pad_shift(h_bt, i) for i in range(A))
    ctx2 = context.reshape(B * S, H)
    d1 = jax.nn.relu(ctx2 @ params["W_dec1"] + params["b_dec1"])
    in_part = (d1 @ params["W_dec2"] + params["b_dec2"]).reshape(B, S, 1)
    ar_w = (ctx2 @ params["W_ar"] + params["b_ar"]).reshape(B, S, R)
    ar_part = sum(ar_w[:, :, i:i + 1] * pad_shift(target, i) for i in range(R))
    return (in_part + ar_part) * mask


if __name__ == "__main__":
    B, S, W = 2, 8, 16          # batch, seq_len, window_embed_size
    E, H, A, R = 32, 64, 7, 2   # embed_dim, h_dim, attn_len, ar_order

    key = jax.random.PRNGKey(0)
    kx, kt, kp = jax.random.split(key, 3)
    inputs = jax.random.normal(kx, (B, S, W), jnp.float32)
    target = jax.random.normal(kt, (B, S, 1), jnp.float32)
    lengths = jnp.array([8, 6], dtype=jnp.int32)   # sorted desc (pack_padded_sequence)
    mask = (jnp.arange(S)[None, :] < lengths[:, None]).astype(jnp.float32)[:, :, None]

    params = init_params(kp, W, E, H, A, R)

    out = multi_ar_lstm_forward(inputs, mask, lengths, target, params)
    out = jax.block_until_ready(out)

    ref = reference_forward(inputs, mask, lengths, target, params)
    np.testing.assert_allclose(np.asarray(out), np.asarray(ref), rtol=2e-3, atol=2e-3)

    print("KERNEL_OK")
</pallas_src>

<mosaic_0001>
module attributes {stable_mosaic.version = 11 : i64} {
  func.func @multi_ar_lstm_kernel(%arg0: i32, %arg1: memref<8x2x16xf32, #tpu.memory_space<vmem>>, %arg2: memref<8x2xf32, #tpu.memory_space<vmem>>, %arg3: memref<8x2xf32, #tpu.memory_space<vmem>>, %arg4: memref<2x1xi32, #tpu.memory_space<vmem>>, %arg5: memref<16x32xf32, #tpu.memory_space<vmem>>, %arg6: memref<1x32xf32, #tpu.memory_space<vmem>>, %arg7: memref<32x288xf32, #tpu.memory_space<vmem>>, %arg8: memref<1x288xf32, #tpu.memory_space<vmem>>, %arg9: memref<32x7xf32, #tpu.memory_space<vmem>>, %arg10: memref<1x7xf32, #tpu.memory_space<vmem>>, %arg11: memref<64x256xf32, #tpu.memory_space<vmem>>, %arg12: memref<64x34xf32, #tpu.memory_space<vmem>>, %arg13: memref<1x34xf32, #tpu.memory_space<vmem>>, %arg14: memref<1x32xf32, #tpu.memory_space<vmem>>, %arg15: memref<1x1xf32, #tpu.memory_space<vmem>>, %arg16: memref<8x2xf32, #tpu.memory_space<vmem>>, %arg17: memref<8x2x256xf32, #tpu.memory_space<vmem>>, %arg18: memref<8x2x64xf32, #tpu.memory_space<vmem>>, %arg19: memref<8x2x64xf32, #tpu.memory_space<vmem>>) attributes {dimension_semantics = [#tpu.dimension_semantics<parallel>], iteration_bounds = array<i64: 1>, scalar_prefetch = 0 : i64, scratch_operands = 3 : i64, tpu.core_type = #tpu.core_type<tc>, window_params = [{transform_indices = @transform_0, window_bounds = array<i64: 8, 2, 16>}, {transform_indices = @transform_1, window_bounds = array<i64: 8, 2>}, {transform_indices = @transform_2, window_bounds = array<i64: 8, 2>}, {transform_indices = @transform_3, window_bounds = array<i64: 2, 1>}, {pipeline_mode = #tpu.pipeline_mode<synchronous>, transform_indices = @transform_4, window_bounds = array<i64: 16, 32>}, {pipeline_mode = #tpu.pipeline_mode<synchronous>, transform_indices = @transform_5, window_bounds = array<i64: 1, 32>}, {pipeline_mode = #tpu.pipeline_mode<synchronous>, transform_indices = @transform_6, window_bounds = array<i64: 32, 288>}, {pipeline_mode = #tpu.pipeline_mode<synchronous>, transform_indices = @transform_7, window_bounds = array<i64: 1, 288>}, {pipeline_mode = #tpu.pipeline_mode<synchronous>, transform_indices = @transform_8, window_bounds = array<i64: 32, 7>}, {pipeline_mode = #tpu.pipeline_mode<synchronous>, transform_indices = @transform_9, window_bounds = array<i64: 1, 7>}, {pipeline_mode = #tpu.pipeline_mode<synchronous>, transform_indices = @transform_10, window_bounds = array<i64: 64, 256>}, {pipeline_mode = #tpu.pipeline_mode<synchronous>, transform_indices = @transform_11, window_bounds = array<i64: 64, 34>}, {pipeline_mode = #tpu.pipeline_mode<synchronous>, transform_indices = @transform_12, window_bounds = array<i64: 1, 34>}, {pipeline_mode = #tpu.pipeline_mode<synchronous>, transform_indices = @transform_13, window_bounds = array<i64: 1, 32>}, {pipeline_mode = #tpu.pipeline_mode<synchronous>, transform_indices = @transform_14, window_bounds = array<i64: 1, 1>}, {transform_indices = @transform_15, window_bounds = array<i64: 8, 2>}]} {
    %c0 = arith.constant 0 : index
    %c0_0 = arith.constant 0 : index
    %c0_1 = arith.constant 0 : index
    %0 = vector.load %arg1[%c0, %c0_0, %c0_1] : memref<8x2x16xf32, #tpu.memory_space<vmem>>, vector<8x2x16xf32>
    %1 = vector.shape_cast %0 : vector<8x2x16xf32> to vector<16x16xf32>
    %c0_2 = arith.constant 0 : index
    %c0_3 = arith.constant 0 : index
    %2 = vector.load %arg5[%c0_2, %c0_3] : memref<16x32xf32, #tpu.memory_space<vmem>>, vector<16x32xf32>
    %cst = arith.constant dense<0.000000e+00> : vector<16x32xf32>
    %3 = tpu.matmul %1, %2, %cst {dimension_numbers = #tpu.dot_dimension_numbers<[1], [0], [0], [1], [0, 0, 1, 1], [], []>} : vector<16x16xf32>, vector<16x32xf32>, vector<16x32xf32> -> vector<16x32xf32>
    %c0_4 = arith.constant 0 : index
    %c0_5 = arith.constant 0 : index
    %4 = vector.load %arg6[%c0_4, %c0_5] : memref<1x32xf32, #tpu.memory_space<vmem>>, vector<1x32xf32>
    %5 = vector.broadcast %4 : vector<1x32xf32> to vector<16x32xf32>
    %6 = arith.addf %3, %5 : vector<16x32xf32>
    %cst_6 = arith.constant 0.000000e+00 : f32
    %7 = vector.broadcast %cst_6 : f32 to vector<16x32xf32>
    %8 = arith.maximumf %6, %7 : vector<16x32xf32>
    %c0_7 = arith.constant 0 : index
    %c0_8 = arith.constant 0 : index
    %9 = vector.load %arg7[%c0_7, %c0_8] : memref<32x288xf32, #tpu.memory_space<vmem>>, vector<32x288xf32>
    %cst_9 = arith.constant dense<0.000000e+00> : vector<16x288xf32>
    %10 = tpu.matmul %8, %9, %cst_9 {dimension_numbers = #tpu.dot_dimension_numbers<[1], [0], [0], [1], [0, 0, 1, 1], [], []>} : vector<16x32xf32>, vector<32x288xf32>, vector<16x288xf32> -> vector<16x288xf32>
    %c0_10 = arith.constant 0 : index
    %c0_11 = arith.constant 0 : index
    %11 = vector.load %arg8[%c0_10, %c0_11] : memref<1x288xf32, #tpu.memory_space<vmem>>, vector<1x288xf32>
    %12 = vector.broadcast %11 : vector<1x288xf32> to vector<16x288xf32>
    %13 = arith.addf %10, %12 : vector<16x288xf32>
    %14 = vector.extract_strided_slice %13 {offsets = [0, 0], sizes = [16, 32], strides = [1, 1]} : vector<16x288xf32> to vector<16x32xf32>
    %cst_12 = arith.constant 0.000000e+00 : f32
    %15 = vector.broadcast %cst_12 : f32 to vector<16x32xf32>
    %16 = arith.maximumf %14, %15 : vector<16x32xf32>
    %17 = vector.extract_strided_slice %13 {offsets = [0, 32], sizes = [16, 256], strides = [1, 1]} : vector<16x288xf32> to vector<16x256xf32>
    %18 = vector.shape_cast %17 : vector<16x256xf32> to vector<8x2x256xf32>
    %c0_13 = arith.constant 0 : index
    %c0_14 = arith.constant 0 : index
    %c0_15 = arith.constant 0 : index
    %19 = vector.load %arg17[%c0_13, %c0_14, %c0_15] : memref<8x2x256xf32, #tpu.memory_space<vmem>>, vector<8x2x256xf32>
    tpu.vector_store %arg17[%c0_13, %c0_14, %c0_15], %18 {strides = array<i32>} : memref<8x2x256xf32, #tpu.memory_space<vmem>>, vector<8x2x256xf32>,
    %c0_16 = arith.constant 0 : index
    %c0_17 = arith.constant 0 : index
    %20 = vector.load %arg9[%c0_16, %c0_17] : memref<32x7xf32, #tpu.memory_space<vmem>>, vector<32x7xf32>
    %cst_18 = arith.constant dense<0.000000e+00> : vector<16x7xf32>
    %21 = tpu.matmul %16, %20, %cst_18 {dimension_numbers = #tpu.dot_dimension_numbers<[1], [0], [0], [1], [0, 0, 1, 1], [], []>} : vector<16x32xf32>, vector<32x7xf32>, vector<16x7xf32> -> vector<16x7xf32>
    %c0_19 = arith.constant 0 : index
    %c0_20 = arith.constant 0 : index
    %22 = vector.load %arg10[%c0_19, %c0_20] : memref<1x7xf32, #tpu.memory_space<vmem>>, vector<1x7xf32>
    %23 = vector.broadcast %22 : vector<1x7xf32> to vector<16x7xf32>
    %24 = arith.addf %21, %23 : vector<16x7xf32>
    %cst_21 = arith.constant dense<0xFF800000> : vector<16xf32>
    %25 = vector.multi_reduction <maximumf>, %24, %cst_21 [1] : vector<16x7xf32> to vector<16xf32>
    %26 = vector.shape_cast %25 : vector<16xf32> to vector<16x1xf32>
    %27 = vector.broadcast %26 : vector<16x1xf32> to vector<16x7xf32>
    %28 = arith.subf %24, %27 : vector<16x7xf32>
    %29 = math.exp %28 : vector<16x7xf32>
    %cst_22 = arith.constant dense<0.000000e+00> : vector<16xf32>
    %30 = vector.multi_reduction <add>, %29, %cst_22 [1] : vector<16x7xf32> to vector<16xf32>
    %31 = vector.shape_cast %30 : vector<16xf32> to vector<16x1xf32>
    %32 = tpu.reciprocal %31 {approx = true} : vector<16x1xf32> -> vector<16x1xf32>
    %33 = vector.broadcast %32 : vector<16x1xf32> to vector<16x7xf32>
    %34 = arith.mulf %29, %33 : vector<16x7xf32>
    %35 = vector.shape_cast %34 : vector<16x7xf32> to vector<8x2x7xf32>
    %36 = tpu.iota {dimensions = array<i32: 1>} : vector<2x256xi32>
    %c128_i32 = arith.constant 128 : i32
    %37 = vector.broadcast %c128_i32 : i32 to vector<2x256xi32>
    %38 = arith.cmpi sge, %36, %37 : vector<2x256xi32>
    %c192_i32 = arith.constant 192 : i32
    %39 = vector.broadcast %c192_i32 : i32 to vector<2x256xi32>
    %40 = arith.cmpi slt, %36, %39 : vector<2x256xi32>
    %41 = arith.andi %38, %40 : vector<2x256xi1>
    %c0_23 = arith.constant 0 : index
    %c0_24 = arith.constant 0 : index
    %42 = vector.load %arg4[%c0_23, %c0_24] : memref<2x1xi32, #tpu.memory_space<vmem>>, vector<2x1xi32>
    %cst_25 = arith.constant 0.000000e+00 : f32
    %43 = vector.broadcast %cst_25 : f32 to vector<2x64xf32>
    %c0_i32 = arith.constant 0 : i32
    %44 = arith.index_cast %c0_i32 : i32 to index
    %c0_26 = arith.constant 0 : index
    %c0_27 = arith.constant 0 : index
    %45 = vector.load %arg17[%44, %c0_26, %c0_27] : memref<8x2x256xf32, #tpu.memory_space<vmem>>, vector<1x2x256xf32>
    %46 = vector.shape_cast %45 : vector<1x2x256xf32> to vector<2x256xf32>
    %c0_28 = arith.constant 0 : index
    %c0_29 = arith.constant 0 : index
    %47 = vector.load %arg11[%c0_28, %c0_29] : memref<64x256xf32, #tpu.memory_space<vmem>>, vector<64x256xf32>
    %cst_30 = arith.constant dense<0.000000e+00> : vector<2x256xf32>
    %48 = tpu.matmul %43, %47, %cst_30 {dimension_numbers = #tpu.dot_dimension_numbers<[1], [0], [0], [1], [0, 0, 1, 1], [], []>} : vector<2x64xf32>, vector<64x256xf32>, vector<2x256xf32> -> vector<2x256xf32>
    %49 = arith.addf %46, %48 : vector<2x256xf32>
    %cst_31 = arith.constant 2.000000e+00 : f32
    %50 = vector.broadcast %cst_31 : f32 to vector<2x256xf32>
    %51 = arith.mulf %49, %50 : vector<2x256xf32>
    %52 = arith.select %41, %51, %49 : vector<2x256xi1>, vector<2x256xf32>
    %53 = arith.negf %52 : vector<2x256xf32>
    %54 = math.exp %53 : vector<2x256xf32>
    %cst_32 = arith.constant 1.000000e+00 : f32
    %55 = vector.broadcast %cst_32 : f32 to vector<2x256xf32>
    %56 = arith.addf %55, %54 : vector<2x256xf32>
    %57 = arith.divf %55, %56 : vector<2x256xf32>
    %cst_33 = arith.constant 2.000000e+00 : f32
    %58 = vector.broadcast %cst_33 : f32 to vector<2x256xf32>
    %59 = arith.mulf %58, %57 : vector<2x256xf32>
    %cst_34 = arith.constant 1.000000e+00 : f32
    %60 = vector.broadcast %cst_34 : f32 to vector<2x256xf32>
    %61 = arith.subf %59, %60 : vector<2x256xf32>
    %62 = arith.select %41, %61, %57 : vector<2x256xi1>, vector<2x256xf32>
    %63 = vector.extract_strided_slice %62 {offsets = [0, 0], sizes = [2, 64], strides = [1, 1]} : vector<2x256xf32> to vector<2x64xf32>
    %64 = vector.extract_strided_slice %62 {offsets = [0, 64], sizes = [2, 64], strides = [1, 1]} : vector<2x256xf32> to vector<2x64xf32>
    %65 = vector.extract_strided_slice %62 {offsets = [0, 128], sizes = [2, 64], strides = [1, 1]} : vector<2x256xf32> to vector<2x64xf32>
    %66 = vector.extract_strided_slice %62 {offsets = [0, 192], sizes = [2, 64], strides = [1, 1]} : vector<2x256xf32> to vector<2x64xf32>
    %67 = arith.mulf %64, %43 : vector<2x64xf32>
    %68 = arith.mulf %63, %65 : vector<2x64xf32>
    %69 = arith.addf %67, %68 : vector<2x64xf32>
    %70 = math.tanh %69 : vector<2x64xf32>
    %71 = arith.mulf %66, %70 : vector<2x64xf32>
    %72 = vector.broadcast %c0_i32 : i32 to vector<2x1xi32>
    %73 = arith.cmpi slt, %72, %42 : vector<2x1xi32>
    %74 = arith.extui %73 : vector<2x1xi1> to vector<2x1xi32>
    %75 = arith.sitofp %74 : vector<2x1xi32> to vector<2x1xf32>
    %76 = vector.broadcast %75 : vector<2x1xf32> to vector<2x64xf32>
    %77 = arith.mulf %71, %76 : vector<2x64xf32>
    %78 = arith.index_cast %c0_i32 : i32 to index
    %c0_35 = arith.constant 0 : index
    %c0_36 = arith.constant 0 : index
    %79 = vector.load %arg18[%78, %c0_35, %c0_36] : memref<8x2x64xf32, #tpu.memory_space<vmem>>, vector<1x2x64xf32>
    %80 = vector.shape_cast %79 : vector<1x2x64xf32> to vector<2x64xf32>
    %81 = vector.shape_cast %77 : vector<2x64xf32> to vector<1x2x64xf32>
    tpu.vector_store %arg18[%78, %c0_35, %c0_36], %81 {strides = array<i32>} : memref<8x2x64xf32, #tpu.memory_space<vmem>>, vector<1x2x64xf32>,
    %c1_i32 = arith.constant 1 : i32
    %82 = arith.index_cast %c1_i32 : i32 to index
    %c0_37 = arith.constant 0 : index
    %c0_38 = arith.constant 0 : index
    %83 = vector.load %arg17[%82, %c0_37, %c0_38] : memref<8x2x256xf32, #tpu.memory_space<vmem>>, vector<1x2x256xf32>
    %84 = vector.shape_cast %83 : vector<1x2x256xf32> to vector<2x256xf32>
    %c0_39 = arith.constant 0 : index
    %c0_40 = arith.constant 0 : index
    %85 = vector.load %arg11[%c0_39, %c0_40] : memref<64x256xf32, #tpu.memory_space<vmem>>, vector<64x256xf32>
    %cst_41 = arith.constant dense<0.000000e+00> : vector<2x256xf32>
    %86 = tpu.matmul %71, %85, %cst_41 {dimension_numbers = #tpu.dot_dimension_numbers<[1], [0], [0], [1], [0, 0, 1, 1], [], []>} : vector<2x64xf32>, vector<64x256xf32>, vector<2x256xf32> -> vector<2x256xf32>
    %87 = arith.addf %84, %86 : vector<2x256xf32>
    %cst_42 = arith.constant 2.000000e+00 : f32
    %88 = vector.broadcast %cst_42 : f32 to vector<2x256xf32>
    %89 = arith.mulf %87, %88 : vector<2x256xf32>
    %90 = arith.select %41, %89, %87 : vector<2x256xi1>, vector<2x256xf32>
    %91 = arith.negf %90 : vector<2x256xf32>
    %92 = math.exp %91 : vector<2x256xf32>
    %cst_43 = arith.constant 1.000000e+00 : f32
    %93 = vector.broadcast %cst_43 : f32 to vector<2x256xf32>
    %94 = arith.addf %93, %92 : vector<2x256xf32>
    %95 = arith.divf %93, %94 : vector<2x256xf32>
    %cst_44 = arith.constant 2.000000e+00 : f32
    %96 = vector.broadcast %cst_44 : f32 to vector<2x256xf32>
    %97 = arith.mulf %96, %95 : vector<2x256xf32>
    %cst_45 = arith.constant 1.000000e+00 : f32
    %98 = vector.broadcast %cst_45 : f32 to vector<2x256xf32>
    %99 = arith.subf %97, %98 : vector<2x256xf32>
    %100 = arith.select %41, %99, %95 : vector<2x256xi1>, vector<2x256xf32>
    %101 = vector.extract_strided_slice %100 {offsets = [0, 0], sizes = [2, 64], strides = [1, 1]} : vector<2x256xf32> to vector<2x64xf32>
    %102 = vector.extract_strided_slice %100 {offsets = [0, 64], sizes = [2, 64], strides = [1, 1]} : vector<2x256xf32> to vector<2x64xf32>
    %103 = vector.extract_strided_slice %100 {offsets = [0, 128], sizes = [2, 64], strides = [1, 1]} : vector<2x256xf32> to vector<2x64xf32>
    %104 = vector.extract_strided_slice %100 {offsets = [0, 192], sizes = [2, 64], strides = [1, 1]} : vector<2x256xf32> to vector<2x64xf32>
    %105 = arith.mulf %102, %69 : vector<2x64xf32>
    %106 = arith.mulf %101, %103 : vector<2x64xf32>
    %107 = arith.addf %105, %106 : vector<2x64xf32>
    %108 = math.tanh %107 : vector<2x64xf32>
    %109 = arith.mulf %104, %108 : vector<2x64xf32>
    %110 = vector.broadcast %c1_i32 : i32 to vector<2x1xi32>
    %111 = arith.cmpi slt, %110, %42 : vector<2x1xi32>
    %112 = arith.extui %111 : vector<2x1xi1> to vector<2x1xi32>
    %113 = arith.sitofp %112 : vector<2x1xi32> to vector<2x1xf32>
    %114 = vector.broadcast %113 : vector<2x1xf32> to vector<2x64xf32>
    %115 = arith.mulf %109, %114 : vector<2x64xf32>
    %116 = arith.index_cast %c1_i32 : i32 to index
    %c0_46 = arith.constant 0 : index
    %c0_47 = arith.constant 0 : index
    %117 = vector.load %arg18[%116, %c0_46, %c0_47] : memref<8x2x64xf32, #tpu.memory_space<vmem>>, vector<1x2x64xf32>
    %118 = vector.shape_cast %117 : vector<1x2x64xf32> to vector<2x64xf32>
    %119 = vector.shape_cast %115 : vector<2x64xf32> to vector<1x2x64xf32>
    tpu.vector_store %arg18[%116, %c0_46, %c0_47], %119 {strides = array<i32>} : memref<8x2x64xf32, #tpu.memory_space<vmem>>, vector<1x2x64xf32>,
    %c2_i32 = arith.constant 2 : i32
    %120 = arith.index_cast %c2_i32 : i32 to index
    %c0_48 = arith.constant 0 : index
    %c0_49 = arith.constant 0 : index
    %121 = vector.load %arg17[%120, %c0_48, %c0_49] : memref<8x2x256xf32, #tpu.memory_space<vmem>>, vector<1x2x256xf32>
    %122 = vector.shape_cast %121 : vector<1x2x256xf32> to vector<2x256xf32>
    %c0_50 = arith.constant 0 : index
    %c0_51 = arith.constant 0 : index
    %123 = vector.load %arg11[%c0_50, %c0_51] : memref<64x256xf32, #tpu.memory_space<vmem>>, vector<64x256xf32>
    %cst_52 = arith.constant dense<0.000000e+00> : vector<2x256xf32>
    %124 = tpu.matmul %109, %123, %cst_52 {dimension_numbers = #tpu.dot_dimension_numbers<[1], [0], [0], [1], [0, 0, 1, 1], [], []>} : vector<2x64xf32>, vector<64x256xf32>, vector<2x256xf32> -> vector<2x256xf32>
    %125 = arith.addf %122, %124 : vector<2x256xf32>
    %cst_53 = arith.constant 2.000000e+00 : f32
    %126 = vector.broadcast %cst_53 : f32 to vector<2x256xf32>
    %127 = arith.mulf %125, %126 : vector<2x256xf32>
    %128 = arith.select %41, %127, %125 : vector<2x256xi1>, vector<2x256xf32>
    %129 = arith.negf %128 : vector<2x256xf32>
    %130 = math.exp %129 : vector<2x256xf32>
    %cst_54 = arith.constant 1.000000e+00 : f32
    %131 = vector.broadcast %cst_54 : f32 to vector<2x256xf32>
    %132 = arith.addf %131, %130 : vector<2x256xf32>
    %133 = arith.divf %131, %132 : vector<2x256xf32>
    %cst_55 = arith.constant 2.000000e+00 : f32
    %134 = vector.broadcast %cst_55 : f32 to vector<2x256xf32>
    %135 = arith.mulf %134, %133 : vector<2x256xf32>
    %cst_56 = arith.constant 1.000000e+00 : f32
    %136 = vector.broadcast %cst_56 : f32 to vector<2x256xf32>
    %137 = arith.subf %135, %136 : vector<2x256xf32>
    %138 = arith.select %41, %137, %133 : vector<2x256xi1>, vector<2x256xf32>
    %139 = vector.extract_strided_slice %138 {offsets = [0, 0], sizes = [2, 64], strides = [1, 1]} : vector<2x256xf32> to vector<2x64xf32>
    %140 = vector.extract_strided_slice %138 {offsets = [0, 64], sizes = [2, 64], strides = [1, 1]} : vector<2x256xf32> to vector<2x64xf32>
    %141 = vector.extract_strided_slice %138 {offsets = [0, 128], sizes = [2, 64], strides = [1, 1]} : vector<2x256xf32> to vector<2x64xf32>
    %142 = vector.extract_strided_slice %138 {offsets = [0, 192], sizes = [2, 64], strides = [1, 1]} : vector<2x256xf32> to vector<2x64xf32>
    %143 = arith.mulf %140, %107 : vector<2x64xf32>
    %144 = arith.mulf %139, %141 : vector<2x64xf32>
    %145 = arith.addf %143, %144 : vector<2x64xf32>
    %146 = math.tanh %145 : vector<2x64xf32>
    %147 = arith.mulf %142, %146 : vector<2x64xf32>
    %148 = vector.broadcast %c2_i32 : i32 to vector<2x1xi32>
    %149 = arith.cmpi slt, %148, %42 : vector<2x1xi32>
    %150 = arith.extui %149 : vector<2x1xi1> to vector<2x1xi32>
    %151 = arith.sitofp %150 : vector<2x1xi32> to vector<2x1xf32>
    %152 = vector.broadcast %151 : vector<2x1xf32> to vector<2x64xf32>
    %153 = arith.mulf %147, %152 : vector<2x64xf32>
    %154 = arith.index_cast %c2_i32 : i32 to index
    %c0_57 = arith.constant 0 : index
    %c0_58 = arith.constant 0 : index
    %155 = vector.load %arg18[%154, %c0_57, %c0_58] : memref<8x2x64xf32, #tpu.memory_space<vmem>>, vector<1x2x64xf32>
    %156 = vector.shape_cast %155 : vector<1x2x64xf32> to vector<2x64xf32>
    %157 = vector.shape_cast %153 : vector<2x64xf32> to vector<1x2x64xf32>
    tpu.vector_store %arg18[%154, %c0_57, %c0_58], %157 {strides = array<i32>} : memref<8x2x64xf32, #tpu.memory_space<vmem>>, vector<1x2x64xf32>,
    %c3_i32 = arith.constant 3 : i32
    %158 = arith.index_cast %c3_i32 : i32 to index
    %c0_59 = arith.constant 0 : index
    %c0_60 = arith.constant 0 : index
    %159 = vector.load %arg17[%158, %c0_59, %c0_60] : memref<8x2x256xf32, #tpu.memory_space<vmem>>, vector<1x2x256xf32>
    %160 = vector.shape_cast %159 : vector<1x2x256xf32> to vector<2x256xf32>
    %c0_61 = arith.constant 0 : index
    %c0_62 = arith.constant 0 : index
    %161 = vector.load %arg11[%c0_61, %c0_62] : memref<64x256xf32, #tpu.memory_space<vmem>>, vector<64x256xf32>
    %cst_63 = arith.constant dense<0.000000e+00> : vector<2x256xf32>
    %162 = tpu.matmul %147, %161, %cst_63 {dimension_numbers = #tpu.dot_dimension_numbers<[1], [0], [0], [1], [0, 0, 1, 1], [], []>} : vector<2x64xf32>, vector<64x256xf32>, vector<2x256xf32> -> vector<2x256xf32>
    %163 = arith.addf %160, %162 : vector<2x256xf32>
    %cst_64 = arith.constant 2.000000e+00 : f32
    %164 = vector.broadcast %cst_64 : f32 to vector<2x256xf32>
    %165 = arith.mulf %163, %164 : vector<2x256xf32>
    %166 = arith.select %41, %165, %163 : vector<2x256xi1>, vector<2x256xf32>
    %167 = arith.negf %166 : vector<2x256xf32>
    %168 = math.exp %167 : vector<2x256xf32>
    %cst_65 = arith.constant 1.000000e+00 : f32
    %169 = vector.broadcast %cst_65 : f32 to vector<2x256xf32>
    %170 = arith.addf %169, %168 : vector<2x256xf32>
    %171 = arith.divf %169, %170 : vector<2x256xf32>
    %cst_66 = arith.constant 2.000000e+00 : f32
    %172 = vector.broadcast %cst_66 : f32 to vector<2x256xf32>
    %173 = arith.mulf %172, %171 : vector<2x256xf32>
    %cst_67 = arith.constant 1.000000e+00 : f32
    %174 = vector.broadcast %cst_67 : f32 to vector<2x256xf32>
    %175 = arith.subf %173, %174 : vector<2x256xf32>
    %176 = arith.select %41, %175, %171 : vector<2x256xi1>, vector<2x256xf32>
    %177 = vector.extract_strided_slice %176 {offsets = [0, 0], sizes = [2, 64], strides = [1, 1]} : vector<2x256xf32> to vector<2x64xf32>
    %178 = vector.extract_strided_slice %176 {offsets = [0, 64], sizes = [2, 64], strides = [1, 1]} : vector<2x256xf32> to vector<2x64xf32>
    %179 = vector.extract_strided_slice %176 {offsets = [0, 128], sizes = [2, 64], strides = [1, 1]} : vector<2x256xf32> to vector<2x64xf32>
    %180 = vector.extract_strided_slice %176 {offsets = [0, 192], sizes = [2, 64], strides = [1, 1]} : vector<2x256xf32> to vector<2x64xf32>
    %181 = arith.mulf %178, %145 : vector<2x64xf32>
    %182 = arith.mulf %177, %179 : vector<2x64xf32>
    %183 = arith.addf %181, %182 : vector<2x64xf32>
    %184 = math.tanh %183 : vector<2x64xf32>
    %185 = arith.mulf %180, %184 : vector<2x64xf32>
    %186 = vector.broadcast %c3_i32 : i32 to vector<2x1xi32>
    %187 = arith.cmpi slt, %186, %42 : vector<2x1xi32>
    %188 = arith.extui %187 : vector<2x1xi1> to vector<2x1xi32>
    %189 = arith.sitofp %188 : vector<2x1xi32> to vector<2x1xf32>
    %190 = vector.broadcast %189 : vector<2x1xf32> to vector<2x64xf32>
    %191 = arith.mulf %185, %190 : vector<2x64xf32>
    %192 = arith.index_cast %c3_i32 : i32 to index
    %c0_68 = arith.constant 0 : index
    %c0_69 = arith.constant 0 : index
    %193 = vector.load %arg18[%192, %c0_68, %c0_69] : memref<8x2x64xf32, #tpu.memory_space<vmem>>, vector<1x2x64xf32>
    %194 = vector.shape_cast %193 : vector<1x2x64xf32> to vector<2x64xf32>
    %195 = vector.shape_cast %191 : vector<2x64xf32> to vector<1x2x64xf32>
    tpu.vector_store %arg18[%192, %c0_68, %c0_69], %195 {strides = array<i32>} : memref<8x2x64xf32, #tpu.memory_space<vmem>>, vector<1x2x64xf32>,
    %c4_i32 = arith.constant 4 : i32
    %196 = arith.index_cast %c4_i32 : i32 to index
    %c0_70 = arith.constant 0 : index
    %c0_71 = arith.constant 0 : index
    %197 = vector.load %arg17[%196, %c0_70, %c0_71] : memref<8x2x256xf32, #tpu.memory_space<vmem>>, vector<1x2x256xf32>
    %198 = vector.shape_cast %197 : vector<1x2x256xf32> to vector<2x256xf32>
    %c0_72 = arith.constant 0 : index
    %c0_73 = arith.constant 0 : index
    %199 = vector.load %arg11[%c0_72, %c0_73] : memref<64x256xf32, #tpu.memory_space<vmem>>, vector<64x256xf32>
    %cst_74 = arith.constant dense<0.000000e+00> : vector<2x256xf32>
    %200 = tpu.matmul %185, %199, %cst_74 {dimension_numbers = #tpu.dot_dimension_numbers<[1], [0], [0], [1], [0, 0, 1, 1], [], []>} : vector<2x64xf32>, vector<64x256xf32>, vector<2x256xf32> -> vector<2x256xf32>
    %201 = arith.addf %198, %200 : vector<2x256xf32>
    %cst_75 = arith.constant 2.000000e+00 : f32
    %202 = vector.broadcast %cst_75 : f32 to vector<2x256xf32>
    %203 = arith.mulf %201, %202 : vector<2x256xf32>
    %204 = arith.select %41, %203, %201 : vector<2x256xi1>, vector<2x256xf32>
    %205 = arith.negf %204 : vector<2x256xf32>
    %206 = math.exp %205 : vector<2x256xf32>
    %cst_76 = arith.constant 1.000000e+00 : f32
    %207 = vector.broadcast %cst_76 : f32 to vector<2x256xf32>
    %208 = arith.addf %207, %206 : vector<2x256xf32>
    %209 = arith.divf %207, %208 : vector<2x256xf32>
    %cst_77 = arith.constant 2.000000e+00 : f32
    %210 = vector.broadcast %cst_77 : f32 to vector<2x256xf32>
    %211 = arith.mulf %210, %209 : vector<2x256xf32>
    %cst_78 = arith.constant 1.000000e+00 : f32
    %212 = vector.broadcast %cst_78 : f32 to vector<2x256xf32>
    %213 = arith.subf %211, %212 : vector<2x256xf32>
    %214 = arith.select %41, %213, %209 : vector<2x256xi1>, vector<2x256xf32>
    %215 = vector.extract_strided_slice %214 {offsets = [0, 0], sizes = [2, 64], strides = [1, 1]} : vector<2x256xf32> to vector<2x64xf32>
    %216 = vector.extract_strided_slice %214 {offsets = [0, 64], sizes = [2, 64], strides = [1, 1]} : vector<2x256xf32> to vector<2x64xf32>
    %217 = vector.extract_strided_slice %214 {offsets = [0, 128], sizes = [2, 64], strides = [1, 1]} : vector<2x256xf32> to vector<2x64xf32>
    %218 = vector.extract_strided_slice %214 {offsets = [0, 192], sizes = [2, 64], strides = [1, 1]} : vector<2x256xf32> to vector<2x64xf32>
    %219 = arith.mulf %216, %183 : vector<2x64xf32>
    %220 = arith.mulf %215, %217 : vector<2x64xf32>
    %221 = arith.addf %219, %220 : vector<2x64xf32>
    %222 = math.tanh %221 : vector<2x64xf32>
    %223 = arith.mulf %218, %222 : vector<2x64xf32>
    %224 = vector.broadcast %c4_i32 : i32 to vector<2x1xi32>
    %225 = arith.cmpi slt, %224, %42 : vector<2x1xi32>
    %226 = arith.extui %225 : vector<2x1xi1> to vector<2x1xi32>
    %227 = arith.sitofp %226 : vector<2x1xi32> to vector<2x1xf32>
    %228 = vector.broadcast %227 : vector<2x1xf32> to vector<2x64xf32>
    %229 = arith.mulf %223, %228 : vector<2x64xf32>
    %230 = arith.index_cast %c4_i32 : i32 to index
    %c0_79 = arith.constant 0 : index
    %c0_80 = arith.constant 0 : index
    %231 = vector.load %arg18[%230, %c0_79, %c0_80] : memref<8x2x64xf32, #tpu.memory_space<vmem>>, vector<1x2x64xf32>
    %232 = vector.shape_cast %231 : vector<1x2x64xf32> to vector<2x64xf32>
    %233 = vector.shape_cast %229 : vector<2x64xf32> to vector<1x2x64xf32>
    tpu.vector_store %arg18[%230, %c0_79, %c0_80], %233 {strides = array<i32>} : memref<8x2x64xf32, #tpu.memory_space<vmem>>, vector<1x2x64xf32>,
    %c5_i32 = arith.constant 5 : i32
    %234 = arith.index_cast %c5_i32 : i32 to index
    %c0_81 = arith.constant 0 : index
    %c0_82 = arith.constant 0 : index
    %235 = vector.load %arg17[%234, %c0_81, %c0_82] : memref<8x2x256xf32, #tpu.memory_space<vmem>>, vector<1x2x256xf32>
    %236 = vector.shape_cast %235 : vector<1x2x256xf32> to vector<2x256xf32>
    %c0_83 = arith.constant 0 : index
    %c0_84 = arith.constant 0 : index
    %237 = vector.load %arg11[%c0_83, %c0_84] : memref<64x256xf32, #tpu.memory_space<vmem>>, vector<64x256xf32>
    %cst_85 = arith.constant dense<0.000000e+00> : vector<2x256xf32>
    %238 = tpu.matmul %223, %237, %cst_85 {dimension_numbers = #tpu.dot_dimension_numbers<[1], [0], [0], [1], [0, 0, 1, 1], [], []>} : vector<2x64xf32>, vector<64x256xf32>, vector<2x256xf32> -> vector<2x256xf32>
    %239 = arith.addf %236, %238 : vector<2x256xf32>
    %cst_86 = arith.constant 2.000000e+00 : f32
    %240 = vector.broadcast %cst_86 : f32 to vector<2x256xf32>
    %241 = arith.mulf %239, %240 : vector<2x256xf32>
    %242 = arith.select %41, %241, %239 : vector<2x256xi1>, vector<2x256xf32>
    %243 = arith.negf %242 : vector<2x256xf32>
    %244 = math.exp %243 : vector<2x256xf32>
    %cst_87 = arith.constant 1.000000e+00 : f32
    %245 = vector.broadcast %cst_87 : f32 to vector<2x256xf32>
    %246 = arith.addf %245, %244 : vector<2x256xf32>
    %247 = arith.divf %245, %246 : vector<2x256xf32>
    %cst_88 = arith.constant 2.000000e+00 : f32
    %248 = vector.broadcast %cst_88 : f32 to vector<2x256xf32>
    %249 = arith.mulf %248, %247 : vector<2x256xf32>
    %cst_89 = arith.constant 1.000000e+00 : f32
    %250 = vector.broadcast %cst_89 : f32 to vector<2x256xf32>
    %251 = arith.subf %249, %250 : vector<2x256xf32>
    %252 = arith.select %41, %251, %247 : vector<2x256xi1>, vector<2x256xf32>
    %253 = vector.extract_strided_slice %252 {offsets = [0, 0], sizes = [2, 64], strides = [1, 1]} : vector<2x256xf32> to vector<2x64xf32>
    %254 = vector.extract_strided_slice %252 {offsets = [0, 64], sizes = [2, 64], strides = [1, 1]} : vector<2x256xf32> to vector<2x64xf32>
    %255 = vector.extract_strided_slice %252 {offsets = [0, 128], sizes = [2, 64], strides = [1, 1]} : vector<2x256xf32> to vector<2x64xf32>
    %256 = vector.extract_strided_slice %252 {offsets = [0, 192], sizes = [2, 64], strides = [1, 1]} : vector<2x256xf32> to vector<2x64xf32>
    %257 = arith.mulf %254, %221 : vector<2x64xf32>
    %258 = arith.mulf %253, %255 : vector<2x64xf32>
    %259 = arith.addf %257, %258 : vector<2x64xf32>
    %260 = math.tanh %259 : vector<2x64xf32>
    %261 = arith.mulf %256, %260 : vector<2x64xf32>
    %262 = vector.broadcast %c5_i32 : i32 to vector<2x1xi32>
    %263 = arith.cmpi slt, %262, %42 : vector<2x1xi32>
    %264 = arith.extui %263 : vector<2x1xi1> to vector<2x1xi32>
    %265 = arith.sitofp %264 : vector<2x1xi32> to vector<2x1xf32>
    %266 = vector.broadcast %265 : vector<2x1xf32> to vector<2x64xf32>
    %267 = arith.mulf %261, %266 : vector<2x64xf32>
    %268 = arith.index_cast %c5_i32 : i32 to index
    %c0_90 = arith.constant 0 : index
    %c0_91 = arith.constant 0 : index
    %269 = vector.load %arg18[%268, %c0_90, %c0_91] : memref<8x2x64xf32, #tpu.memory_space<vmem>>, vector<1x2x64xf32>
    %270 = vector.shape_cast %269 : vector<1x2x64xf32> to vector<2x64xf32>
    %271 = vector.shape_cast %267 : vector<2x64xf32> to vector<1x2x64xf32>
    tpu.vector_store %arg18[%268, %c0_90, %c0_91], %271 {strides = array<i32>} : memref<8x2x64xf32, #tpu.memory_space<vmem>>, vector<1x2x64xf32>,
    %c6_i32 = arith.constant 6 : i32
    %272 = arith.index_cast %c6_i32 : i32 to index
    %c0_92 = arith.constant 0 : index
    %c0_93 = arith.constant 0 : index
    %273 = vector.load %arg17[%272, %c0_92, %c0_93] : memref<8x2x256xf32, #tpu.memory_space<vmem>>, vector<1x2x256xf32>
    %274 = vector.shape_cast %273 : vector<1x2x256xf32> to vector<2x256xf32>
    %c0_94 = arith.constant 0 : index
    %c0_95 = arith.constant 0 : index
    %275 = vector.load %arg11[%c0_94, %c0_95] : memref<64x256xf32, #tpu.memory_space<vmem>>, vector<64x256xf32>
    %cst_96 = arith.constant dense<0.000000e+00> : vector<2x256xf32>
    %276 = tpu.matmul %261, %275, %cst_96 {dimension_numbers = #tpu.dot_dimension_numbers<[1], [0], [0], [1], [0, 0, 1, 1], [], []>} : vector<2x64xf32>, vector<64x256xf32>, vector<2x256xf32> -> vector<2x256xf32>
    %277 = arith.addf %274, %276 : vector<2x256xf32>
    %cst_97 = arith.constant 2.000000e+00 : f32
    %278 = vector.broadcast %cst_97 : f32 to vector<2x256xf32>
    %279 = arith.mulf %277, %278 : vector<2x256xf32>
    %280 = arith.select %41, %279, %277 : vector<2x256xi1>, vector<2x256xf32>
    %281 = arith.negf %280 : vector<2x256xf32>
    %282 = math.exp %281 : vector<2x256xf32>
    %cst_98 = arith.constant 1.000000e+00 : f32
    %283 = vector.broadcast %cst_98 : f32 to vector<2x256xf32>
    %284 = arith.addf %283, %282 : vector<2x256xf32>
    %285 = arith.divf %283, %284 : vector<2x256xf32>
    %cst_99 = arith.constant 2.000000e+00 : f32
    %286 = vector.broadcast %cst_99 : f32 to vector<2x256xf32>
    %287 = arith.mulf %286, %285 : vector<2x256xf32>
    %cst_100 = arith.constant 1.000000e+00 : f32
    %288 = vector.broadcast %cst_100 : f32 to vector<2x256xf32>
    %289 = arith.subf %287, %288 : vector<2x256xf32>
    %290 = arith.select %41, %289, %285 : vector<2x256xi1>, vector<2x256xf32>
    %291 = vector.extract_strided_slice %290 {offsets = [0, 0], sizes = [2, 64], strides = [1, 1]} : vector<2x256xf32> to vector<2x64xf32>
    %292 = vector.extract_strided_slice %290 {offsets = [0, 64], sizes = [2, 64], strides = [1, 1]} : vector<2x256xf32> to vector<2x64xf32>
    %293 = vector.extract_strided_slice %290 {offsets = [0, 128], sizes = [2, 64], strides = [1, 1]} : vector<2x256xf32> to vector<2x64xf32>
    %294 = vector.extract_strided_slice %290 {offsets = [0, 192], sizes = [2, 64], strides = [1, 1]} : vector<2x256xf32> to vector<2x64xf32>
    %295 = arith.mulf %292, %259 : vector<2x64xf32>
    %296 = arith.mulf %291, %293 : vector<2x64xf32>
    %297 = arith.addf %295, %296 : vector<2x64xf32>
    %298 = math.tanh %297 : vector<2x64xf32>
    %299 = arith.mulf %294, %298 : vector<2x64xf32>
    %300 = vector.broadcast %c6_i32 : i32 to vector<2x1xi32>
    %301 = arith.cmpi slt, %300, %42 : vector<2x1xi32>
    %302 = arith.extui %301 : vector<2x1xi1> to vector<2x1xi32>
    %303 = arith.sitofp %302 : vector<2x1xi32> to vector<2x1xf32>
    %304 = vector.broadcast %303 : vector<2x1xf32> to vector<2x64xf32>
    %305 = arith.mulf %299, %304 : vector<2x64xf32>
    %306 = arith.index_cast %c6_i32 : i32 to index
    %c0_101 = arith.constant 0 : index
    %c0_102 = arith.constant 0 : index
    %307 = vector.load %arg18[%306, %c0_101, %c0_102] : memref<8x2x64xf32, #tpu.memory_space<vmem>>, vector<1x2x64xf32>
    %308 = vector.shape_cast %307 : vector<1x2x64xf32> to vector<2x64xf32>
    %309 = vector.shape_cast %305 : vector<2x64xf32> to vector<1x2x64xf32>
    tpu.vector_store %arg18[%306, %c0_101, %c0_102], %309 {strides = array<i32>} : memref<8x2x64xf32, #tpu.memory_space<vmem>>, vector<1x2x64xf32>,
    %c7_i32 = arith.constant 7 : i32
    %310 = arith.index_cast %c7_i32 : i32 to index
    %c0_103 = arith.constant 0 : index
    %c0_104 = arith.constant 0 : index
    %311 = vector.load %arg17[%310, %c0_103, %c0_104] : memref<8x2x256xf32, #tpu.memory_space<vmem>>, vector<1x2x256xf32>
    %312 = vector.shape_cast %311 : vector<1x2x256xf32> to vector<2x256xf32>
    %c0_105 = arith.constant 0 : index
    %c0_106 = arith.constant 0 : index
    %313 = vector.load %arg11[%c0_105, %c0_106] : memref<64x256xf32, #tpu.memory_space<vmem>>, vector<64x256xf32>
    %cst_107 = arith.constant dense<0.000000e+00> : vector<2x256xf32>
    %314 = tpu.matmul %299, %313, %cst_107 {dimension_numbers = #tpu.dot_dimension_numbers<[1], [0], [0], [1], [0, 0, 1, 1], [], []>} : vector<2x64xf32>, vector<64x256xf32>, vector<2x256xf32> -> vector<2x256xf32>
    %315 = arith.addf %312, %314 : vector<2x256xf32>
    %cst_108 = arith.constant 2.000000e+00 : f32
    %316 = vector.broadcast %cst_108 : f32 to vector<2x256xf32>
    %317 = arith.mulf %315, %316 : vector<2x256xf32>
    %318 = arith.select %41, %317, %315 : vector<2x256xi1>, vector<2x256xf32>
    %319 = arith.negf %318 : vector<2x256xf32>
    %320 = math.exp %319 : vector<2x256xf32>
    %cst_109 = arith.constant 1.000000e+00 : f32
    %321 = vector.broadcast %cst_109 : f32 to vector<2x256xf32>
    %322 = arith.addf %321, %320 : vector<2x256xf32>
    %323 = arith.divf %321, %322 : vector<2x256xf32>
    %cst_110 = arith.constant 2.000000e+00 : f32
    %324 = vector.broadcast %cst_110 : f32 to vector<2x256xf32>
    %325 = arith.mulf %324, %323 : vector<2x256xf32>
    %cst_111 = arith.constant 1.000000e+00 : f32
    %326 = vector.broadcast %cst_111 : f32 to vector<2x256xf32>
    %327 = arith.subf %325, %326 : vector<2x256xf32>
    %328 = arith.select %41, %327, %323 : vector<2x256xi1>, vector<2x256xf32>
    %329 = vector.extract_strided_slice %328 {offsets = [0, 0], sizes = [2, 64], strides = [1, 1]} : vector<2x256xf32> to vector<2x64xf32>
    %330 = vector.extract_strided_slice %328 {offsets = [0, 64], sizes = [2, 64], strides = [1, 1]} : vector<2x256xf32> to vector<2x64xf32>
    %331 = vector.extract_strided_slice %328 {offsets = [0, 128], sizes = [2, 64], strides = [1, 1]} : vector<2x256xf32> to vector<2x64xf32>
    %332 = vector.extract_strided_slice %328 {offsets = [0, 192], sizes = [2, 64], strides = [1, 1]} : vector<2x256xf32> to vector<2x64xf32>
    %333 = arith.mulf %330, %297 : vector<2x64xf32>
    %334 = arith.mulf %329, %331 : vector<2x64xf32>
    %335 = arith.addf %333, %334 : vector<2x64xf32>
    %336 = math.tanh %335 : vector<2x64xf32>
    %337 = arith.mulf %332, %336 : vector<2x64xf32>
    %338 = vector.broadcast %c7_i32 : i32 to vector<2x1xi32>
    %339 = arith.cmpi slt, %338, %42 : vector<2x1xi32>
    %340 = arith.extui %339 : vector<2x1xi1> to vector<2x1xi32>
    %341 = arith.sitofp %340 : vector<2x1xi32> to vector<2x1xf32>
    %342 = vector.broadcast %341 : vector<2x1xf32> to vector<2x64xf32>
    %343 = arith.mulf %337, %342 : vector<2x64xf32>
    %344 = arith.index_cast %c7_i32 : i32 to index
    %c0_112 = arith.constant 0 : index
    %c0_113 = arith.constant 0 : index
    %345 = vector.load %arg18[%344, %c0_112, %c0_113] : memref<8x2x64xf32, #tpu.memory_space<vmem>>, vector<1x2x64xf32>
    %346 = vector.shape_cast %345 : vector<1x2x64xf32> to vector<2x64xf32>
    %347 = vector.shape_cast %343 : vector<2x64xf32> to vector<1x2x64xf32>
    tpu.vector_store %arg18[%344, %c0_112, %c0_113], %347 {strides = array<i32>} : memref<8x2x64xf32, #tpu.memory_space<vmem>>, vector<1x2x64xf32>,
    %c8_i32 = arith.constant 8 : i32
    %348 = vector.extract_strided_slice %35 {offsets = [0, 0, 0], sizes = [8, 2, 1], strides = [1, 1, 1]} : vector<8x2x7xf32> to vector<8x2x1xf32>
    %c0_114 = arith.constant 0 : index
    %c0_115 = arith.constant 0 : index
    %c0_116 = arith.constant 0 : index
    %349 = vector.load %arg18[%c0_114, %c0_115, %c0_116] : memref<8x2x64xf32, #tpu.memory_space<vmem>>, vector<8x2x64xf32>
    %350 = vector.broadcast %348 : vector<8x2x1xf32> to vector<8x2x64xf32>
    %351 = arith.mulf %350, %349 : vector<8x2x64xf32>
    %c0_117 = arith.constant 0 : index
    %c0_118 = arith.constant 0 : index
    %c0_119 = arith.constant 0 : index
    %352 = vector.load %arg19[%c0_117, %c0_118, %c0_119] : memref<8x2x64xf32, #tpu.memory_space<vmem>>, vector<8x2x64xf32>
    tpu.vector_store %arg19[%c0_117, %c0_118, %c0_119], %351 {strides = array<i32>} : memref<8x2x64xf32, #tpu.memory_space<vmem>>, vector<8x2x64xf32>,
    %c1 = arith.constant 1 : index
    %c0_120 = arith.constant 0 : index
    %c0_121 = arith.constant 0 : index
    %353 = vector.load %arg19[%c1, %c0_120, %c0_121] : memref<8x2x64xf32, #tpu.memory_space<vmem>>, vector<7x2x64xf32>
    %354 = vector.extract_strided_slice %35 {offsets = [1, 0, 1], sizes = [7, 2, 1], strides = [1, 1, 1]} : vector<8x2x7xf32> to vector<7x2x1xf32>
    %c0_122 = arith.constant 0 : index
    %c0_123 = arith.constant 0 : index
    %c0_124 = arith.constant 0 : index
    %355 = vector.load %arg18[%c0_122, %c0_123, %c0_124] : memref<8x2x64xf32, #tpu.memory_space<vmem>>, vector<7x2x64xf32>
    %356 = vector.broadcast %354 : vector<7x2x1xf32> to vector<7x2x64xf32>
    %357 = arith.mulf %356, %355 : vector<7x2x64xf32>
    %358 = arith.addf %353, %357 : vector<7x2x64xf32>
    %c1_125 = arith.constant 1 : index
    %c0_126 = arith.constant 0 : index
    %c0_127 = arith.constant 0 : index
    %359 = vector.load %arg19[%c1_125, %c0_126, %c0_127] : memref<8x2x64xf32, #tpu.memory_space<vmem>>, vector<7x2x64xf32>
    tpu.vector_store %arg19[%c1_125, %c0_126, %c0_127], %358 {strides = array<i32>} : memref<8x2x64xf32, #tpu.memory_space<vmem>>, vector<7x2x64xf32>,
    %c2 = arith.constant 2 : index
    %c0_128 = arith.constant 0 : index
    %c0_129 = arith.constant 0 : index
    %360 = vector.load %arg19[%c2, %c0_128, %c0_129] : memref<8x2x64xf32, #tpu.memory_space<vmem>>, vector<6x2x64xf32>
    %361 = vector.extract_strided_slice %35 {offsets = [2, 0, 2], sizes = [6, 2, 1], strides = [1, 1, 1]} : vector<8x2x7xf32> to vector<6x2x1xf32>
    %c0_130 = arith.constant 0 : index
    %c0_131 = arith.constant 0 : index
    %c0_132 = arith.constant 0 : index
    %362 = vector.load %arg18[%c0_130, %c0_131, %c0_132] : memref<8x2x64xf32, #tpu.memory_space<vmem>>, vector<6x2x64xf32>
    %363 = vector.broadcast %361 : vector<6x2x1xf32> to vector<6x2x64xf32>
    %364 = arith.mulf %363, %362 : vector<6x2x64xf32>
    %365 = arith.addf %360, %364 : vector<6x2x64xf32>
    %c2_133 = arith.constant 2 : index
    %c0_134 = arith.constant 0 : index
    %c0_135 = arith.constant 0 : index
    %366 = vector.load %arg19[%c2_133, %c0_134, %c0_135] : memref<8x2x64xf32, #tpu.memory_space<vmem>>, vector<6x2x64xf32>
    tpu.vector_store %arg19[%c2_133, %c0_134, %c0_135], %365 {strides = array<i32>} : memref<8x2x64xf32, #tpu.memory_space<vmem>>, vector<6x2x64xf32>,
    %c3 = arith.constant 3 : index
    %c0_136 = arith.constant 0 : index
    %c0_137 = arith.constant 0 : index
    %367 = vector.load %arg19[%c3, %c0_136, %c0_137] : memref<8x2x64xf32, #tpu.memory_space<vmem>>, vector<5x2x64xf32>
    %368 = vector.extract_strided_slice %35 {offsets = [3, 0, 3], sizes = [5, 2, 1], strides = [1, 1, 1]} : vector<8x2x7xf32> to vector<5x2x1xf32>
    %c0_138 = arith.constant 0 : index
    %c0_139 = arith.constant 0 : index
    %c0_140 = arith.constant 0 : index
    %369 = vector.load %arg18[%c0_138, %c0_139, %c0_140] : memref<8x2x64xf32, #tpu.memory_space<vmem>>, vector<5x2x64xf32>
    %370 = vector.broadcast %368 : vector<5x2x1xf32> to vector<5x2x64xf32>
    %371 = arith.mulf %370, %369 : vector<5x2x64xf32>
    %372 = arith.addf %367, %371 : vector<5x2x64xf32>
    %c3_141 = arith.constant 3 : index
    %c0_142 = arith.constant 0 : index
    %c0_143 = arith.constant 0 : index
    %373 = vector.load %arg19[%c3_141, %c0_142, %c0_143] : memref<8x2x64xf32, #tpu.memory_space<vmem>>, vector<5x2x64xf32>
    tpu.vector_store %arg19[%c3_141, %c0_142, %c0_143], %372 {strides = array<i32>} : memref<8x2x64xf32, #tpu.memory_space<vmem>>, vector<5x2x64xf32>,
    %c4 = arith.constant 4 : index
    %c0_144 = arith.constant 0 : index
    %c0_145 = arith.constant 0 : index
    %374 = vector.load %arg19[%c4, %c0_144, %c0_145] : memref<8x2x64xf32, #tpu.memory_space<vmem>>, vector<4x2x64xf32>
    %375 = vector.extract_strided_slice %35 {offsets = [4, 0, 4], sizes = [4, 2, 1], strides = [1, 1, 1]} : vector<8x2x7xf32> to vector<4x2x1xf32>
    %c0_146 = arith.constant 0 : index
    %c0_147 = arith.constant 0 : index
    %c0_148 = arith.constant 0 : index
    %376 = vector.load %arg18[%c0_146, %c0_147, %c0_148] : memref<8x2x64xf32, #tpu.memory_space<vmem>>, vector<4x2x64xf32>
    %377 = vector.broadcast %375 : vector<4x2x1xf32> to vector<4x2x64xf32>
    %378 = arith.mulf %377, %376 : vector<4x2x64xf32>
    %379 = arith.addf %374, %378 : vector<4x2x64xf32>
    %c4_149 = arith.constant 4 : index
    %c0_150 = arith.constant 0 : index
    %c0_151 = arith.constant 0 : index
    %380 = vector.load %arg19[%c4_149, %c0_150, %c0_151] : memref<8x2x64xf32, #tpu.memory_space<vmem>>, vector<4x2x64xf32>
    tpu.vector_store %arg19[%c4_149, %c0_150, %c0_151], %379 {strides = array<i32>} : memref<8x2x64xf32, #tpu.memory_space<vmem>>, vector<4x2x64xf32>,
    %c5 = arith.constant 5 : index
    %c0_152 = arith.constant 0 : index
    %c0_153 = arith.constant 0 : index
    %381 = vector.load %arg19[%c5, %c0_152, %c0_153] : memref<8x2x64xf32, #tpu.memory_space<vmem>>, vector<3x2x64xf32>
    %382 = vector.extract_strided_slice %35 {offsets = [5, 0, 5], sizes = [3, 2, 1], strides = [1, 1, 1]} : vector<8x2x7xf32> to vector<3x2x1xf32>
    %c0_154 = arith.constant 0 : index
    %c0_155 = arith.constant 0 : index
    %c0_156 = arith.constant 0 : index
    %383 = vector.load %arg18[%c0_154, %c0_155, %c0_156] : memref<8x2x64xf32, #tpu.memory_space<vmem>>, vector<3x2x64xf32>
    %384 = vector.broadcast %382 : vector<3x2x1xf32> to vector<3x2x64xf32>
    %385 = arith.mulf %384, %383 : vector<3x2x64xf32>
    %386 = arith.addf %381, %385 : vector<3x2x64xf32>
    %c5_157 = arith.constant 5 : index
    %c0_158 = arith.constant 0 : index
    %c0_159 = arith.constant 0 : index
    %387 = vector.load %arg19[%c5_157, %c0_158, %c0_159] : memref<8x2x64xf32, #tpu.memory_space<vmem>>, vector<3x2x64xf32>
    tpu.vector_store %arg19[%c5_157, %c0_158, %c0_159], %386 {strides = array<i32>} : memref<8x2x64xf32, #tpu.memory_space<vmem>>, vector<3x2x64xf32>,
    %c6 = arith.constant 6 : index
    %c0_160 = arith.constant 0 : index
    %c0_161 = arith.constant 0 : index
    %388 = vector.load %arg19[%c6, %c0_160, %c0_161] : memref<8x2x64xf32, #tpu.memory_space<vmem>>, vector<2x2x64xf32>
    %389 = vector.extract_strided_slice %35 {offsets = [6, 0, 6], sizes = [2, 2, 1], strides = [1, 1, 1]} : vector<8x2x7xf32> to vector<2x2x1xf32>
    %c0_162 = arith.constant 0 : index
    %c0_163 = arith.constant 0 : index
    %c0_164 = arith.constant 0 : index
    %390 = vector.load %arg18[%c0_162, %c0_163, %c0_164] : memref<8x2x64xf32, #tpu.memory_space<vmem>>, vector<2x2x64xf32>
    %391 = vector.broadcast %389 : vector<2x2x1xf32> to vector<2x2x64xf32>
    %392 = arith.mulf %391, %390 : vector<2x2x64xf32>
    %393 = arith.addf %388, %392 : vector<2x2x64xf32>
    %c6_165 = arith.constant 6 : index
    %c0_166 = arith.constant 0 : index
    %c0_167 = arith.constant 0 : index
    %394 = vector.load %arg19[%c6_165, %c0_166, %c0_167] : memref<8x2x64xf32, #tpu.memory_space<vmem>>, vector<2x2x64xf32>
    tpu.vector_store %arg19[%c6_165, %c0_166, %c0_167], %393 {strides = array<i32>} : memref<8x2x64xf32, #tpu.memory_space<vmem>>, vector<2x2x64xf32>,
    %c0_168 = arith.constant 0 : index
    %c0_169 = arith.constant 0 : index
    %c0_170 = arith.constant 0 : index
    %395 = vector.load %arg19[%c0_168, %c0_169, %c0_170] : memref<8x2x64xf32, #tpu.memory_space<vmem>>, vector<8x2x64xf32>
    %396 = vector.shape_cast %395 : vector<8x2x64xf32> to vector<16x64xf32>
    %c0_171 = arith.constant 0 : index
    %c0_172 = arith.constant 0 : index
    %397 = vector.load %arg12[%c0_171, %c0_172] : memref<64x34xf32, #tpu.memory_space<vmem>>, vector<64x34xf32>
    %cst_173 = arith.constant dense<0.000000e+00> : vector<16x34xf32>
    %398 = tpu.matmul %396, %397, %cst_173 {dimension_numbers = #tpu.dot_dimension_numbers<[1], [0], [0], [1], [0, 0, 1, 1], [], []>} : vector<16x64xf32>, vector<64x34xf32>, vector<16x34xf32> -> vector<16x34xf32>
    %c0_174 = arith.constant 0 : index
    %c0_175 = arith.constant 0 : index
    %399 = vector.load %arg13[%c0_174, %c0_175] : memref<1x34xf32, #tpu.memory_space<vmem>>, vector<1x34xf32>
    %400 = vector.broadcast %399 : vector<1x34xf32> to vector<16x34xf32>
    %401 = arith.addf %398, %400 : vector<16x34xf32>
    %402 = vector.extract_strided_slice %401 {offsets = [0, 0], sizes = [16, 32], strides = [1, 1]} : vector<16x34xf32> to vector<16x32xf32>
    %cst_176 = arith.constant 0.000000e+00 : f32
    %403 = vector.broadcast %cst_176 : f32 to vector<16x32xf32>
    %404 = arith.maximumf %402, %403 : vector<16x32xf32>
    %405 = vector.extract_strided_slice %401 {offsets = [0, 32], sizes = [16, 2], strides = [1, 1]} : vector<16x34xf32> to vector<16x2xf32>
    %406 = vector.shape_cast %405 : vector<16x2xf32> to vector<8x2x2xf32>
    %407 = vector.shape_cast %404 : vector<16x32xf32> to vector<8x2x32xf32>
    %c0_177 = arith.constant 0 : index
    %c0_178 = arith.constant 0 : index
    %408 = vector.load %arg14[%c0_177, %c0_178] : memref<1x32xf32, #tpu.memory_space<vmem>>, vector<1x32xf32>
    %409 = vector.shape_cast %408 : vector<1x32xf32> to vector<1x1x32xf32>
    %410 = vector.broadcast %409 : vector<1x1x32xf32> to vector<8x2x32xf32>
    %411 = arith.mulf %407, %410 : vector<8x2x32xf32>
    %cst_179 = arith.constant dense<0.000000e+00> : vector<8x2xf32>
    %412 = vector.multi_reduction <add>, %411, %cst_179 [2] : vector<8x2x32xf32> to vector<8x2xf32>
    %c0_180 = arith.constant 0 : index
    %c0_181 = arith.constant 0 : index
    %413 = vector.load %arg15[%c0_180, %c0_181] : memref<1x1xf32, #tpu.memory_space<vmem>>, vector<1x1xf32>
    %414 = vector.broadcast %413 : vector<1x1xf32> to vector<8x2xf32>
    %415 = arith.addf %412, %414 : vector<8x2xf32>
    %c0_182 = arith.constant 0 : index
    %c0_183 = arith.constant 0 : index
    %416 = vector.load %arg3[%c0_182, %c0_183] : memref<8x2xf32, #tpu.memory_space<vmem>>, vector<8x2xf32>
    %417 = vector.extract_strided_slice %406 {offsets = [0, 0, 0], sizes = [8, 2, 1], strides = [1, 1, 1]} : vector<8x2x2xf32> to vector<8x2x1xf32>
    %418 = vector.shape_cast %417 : vector<8x2x1xf32> to vector<8x2xf32>
    %419 = arith.mulf %418, %416 : vector<8x2xf32>
    %cst_184 = arith.constant 0.000000e+00 : f32
    %420 = vector.broadcast %cst_184 : f32 to vector<1x2xf32>
    %421 = vector.extract_strided_slice %416 {offsets = [0, 0], sizes = [7, 2], strides = [1, 1]} : vector<8x2xf32> to vector<7x2xf32>
    %422 = tpu.concatenate %420, %421 in 0 : vector<1x2xf32>, vector<7x2xf32> -> vector<8x2xf32>
    %423 = vector.extract_strided_slice %406 {offsets = [0, 0, 1], sizes = [8, 2, 1], strides = [1, 1, 1]} : vector<8x2x2xf32> to vector<8x2x1xf32>
    %424 = vector.shape_cast %423 : vector<8x2x1xf32> to vector<8x2xf32>
    %425 = arith.mulf %424, %422 : vector<8x2xf32>
    %426 = arith.addf %419, %425 : vector<8x2xf32>
    %427 = arith.addf %415, %426 : vector<8x2xf32>
    %c0_185 = arith.constant 0 : index
    %c0_186 = arith.constant 0 : index
    %428 = vector.load %arg2[%c0_185, %c0_186] : memref<8x2xf32, #tpu.memory_space<vmem>>, vector<8x2xf32>
    %429 = arith.mulf %427, %428 : vector<8x2xf32>
    %c0_187 = arith.constant 0 : index
    %c0_188 = arith.constant 0 : index
    %430 = vector.load %arg16[%c0_187, %c0_188] : memref<8x2xf32, #tpu.memory_space<vmem>>, vector<8x2xf32>
    tpu.vector_store %arg16[%c0_187, %c0_188], %429 {strides = array<i32>} : memref<8x2xf32, #tpu.memory_space<vmem>>, vector<8x2xf32>,
    return
  }
  func.func @transform_0(%arg0: i32) -> (i32, i32, i32) {
    %c0_i32 = arith.constant 0 : i32
    %c0_i32_0 = arith.constant 0 : i32
    %c0_i32_1 = arith.constant 0 : i32
    return %c0_i32, %arg0, %c0_i32_0 : i32, i32, i32
  }
  func.func @transform_1(%arg0: i32) -> (i32, i32) {
    %c0_i32 = arith.constant 0 : i32
    %c0_i32_0 = arith.constant 0 : i32
    return %c0_i32, %arg0 : i32, i32
  }
  func.func @transform_2(%arg0: i32) -> (i32, i32) {
    %c0_i32 = arith.constant 0 : i32
    %c0_i32_0 = arith.constant 0 : i32
    return %c0_i32, %arg0 : i32, i32
  }
  func.func @transform_3(%arg0: i32) -> (i32, i32) {
    %c0_i32 = arith.constant 0 : i32
    %c0_i32_0 = arith.constant 0 : i32
    return %arg0, %c0_i32 : i32, i32
  }
  func.func @transform_4(%arg0: i32) -> (i32, i32) {
    %c0_i32 = arith.constant 0 : i32
    %c0_i32_0 = arith.constant 0 : i32
    %c0_i32_1 = arith.constant 0 : i32
    return %c0_i32, %c0_i32_0 : i32, i32
  }
  func.func @transform_5(%arg0: i32) -> (i32, i32) {
    %c0_i32 = arith.constant 0 : i32
    %c0_i32_0 = arith.constant 0 : i32
    %c0_i32_1 = arith.constant 0 : i32
    return %c0_i32, %c0_i32_0 : i32, i32
  }
  func.func @transform_6(%arg0: i32) -> (i32, i32) {
    %c0_i32 = arith.constant 0 : i32
    %c0_i32_0 = arith.constant 0 : i32
    %c0_i32_1 = arith.constant 0 : i32
    return %c0_i32, %c0_i32_0 : i32, i32
  }
  func.func @transform_7(%arg0: i32) -> (i32, i32) {
    %c0_i32 = arith.constant 0 : i32
    %c0_i32_0 = arith.constant 0 : i32
    %c0_i32_1 = arith.constant 0 : i32
    return %c0_i32, %c0_i32_0 : i32, i32
  }
  func.func @transform_8(%arg0: i32) -> (i32, i32) {
    %c0_i32 = arith.constant 0 : i32
    %c0_i32_0 = arith.constant 0 : i32
    %c0_i32_1 = arith.constant 0 : i32
    return %c0_i32, %c0_i32_0 : i32, i32
  }
  func.func @transform_9(%arg0: i32) -> (i32, i32) {
    %c0_i32 = arith.constant 0 : i32
    %c0_i32_0 = arith.constant 0 : i32
    %c0_i32_1 = arith.constant 0 : i32
    return %c0_i32, %c0_i32_0 : i32, i32
  }
  func.func @transform_10(%arg0: i32) -> (i32, i32) {
    %c0_i32 = arith.constant 0 : i32
    %c0_i32_0 = arith.constant 0 : i32
    %c0_i32_1 = arith.constant 0 : i32
    return %c0_i32, %c0_i32_0 : i32, i32
  }
  func.func @transform_11(%arg0: i32) -> (i32, i32) {
    %c0_i32 = arith.constant 0 : i32
    %c0_i32_0 = arith.constant 0 : i32
    %c0_i32_1 = arith.constant 0 : i32
    return %c0_i32, %c0_i32_0 : i32, i32
  }
  func.func @transform_12(%arg0: i32) -> (i32, i32) {
    %c0_i32 = arith.constant 0 : i32
    %c0_i32_0 = arith.constant 0 : i32
    %c0_i32_1 = arith.constant 0 : i32
    return %c0_i32, %c0_i32_0 : i32, i32
  }
  func.func @transform_13(%arg0: i32) -> (i32, i32) {
    %c0_i32 = arith.constant 0 : i32
    %c0_i32_0 = arith.constant 0 : i32
    %c0_i32_1 = arith.constant 0 : i32
    return %c0_i32, %c0_i32_0 : i32, i32
  }
  func.func @transform_14(%arg0: i32) -> (i32, i32) {
    %c0_i32 = arith.constant 0 : i32
    %c0_i32_0 = arith.constant 0 : i32
    %c0_i32_1 = arith.constant 0 : i32
    return %c0_i32, %c0_i32_0 : i32, i32
  }
  func.func @transform_15(%arg0: i32) -> (i32, i32) {
    %c0_i32 = arith.constant 0 : i32
    %c0_i32_0 = arith.constant 0 : i32
    return %c0_i32, %arg0 : i32, i32
  }
}

</mosaic_0001>

<bundles_post_ra>
// kernel: tpu_custom_call.1
= control target key start
LH: loop header
LB: loop body
LE: loop exit
PB: predicated region body
PF: predicated region fallthrough
CT: control target
= control target key end

     0   :  { %s5012_s0 = inlined_call_operand.vmem [shape: f32[8,2,16], index: 0, kind: input, shape index: {}]   ;;  %s5013_s1 = inlined_call_operand.vmem [shape: f32[8,2], index: 1, kind: input, shape index: {}]   ;;  %s5014_s2 = inlined_call_operand.vmem [shape: f32[8,2], index: 2, kind: input, shape index: {}]   ;;  %s5015_s3 = inlined_call_operand.vmem [shape: s32[2,1], index: 3, kind: input, shape index: {}]   ;;  %s5016_s4 = inlined_call_operand.hbm [shape: f32[16,32], index: 4, kind: input, shape index: {}]   ;;  %s5017_s5 = inlined_call_operand.vmem [shape: f32[1,32], index: 5, kind: input, shape index: {}]   ;;  %s5018_s6 = inlined_call_operand.hbm [shape: f32[32,288], index: 6, kind: input, shape index: {}]   ;;  %s5019_s7 = inlined_call_operand.vmem [shape: f32[1,288], index: 7, kind: input, shape index: {}]   ;;  %s5020_s8 = inlined_call_operand.vmem [shape: f32[32,7], index: 8, kind: input, shape index: {}]   ;;  %s5021_s9 = inlined_call_operand.vmem [shape: f32[1,7], index: 9, kind: input, shape index: {}]   ;;  %s5022_s10 = inlined_call_operand.vmem [shape: f32[64,256], index: 10, kind: input, shape index: {}]   ;;  %s5023_s11 = inlined_call_operand.vmem [shape: f32[64,34], index: 11, kind: input, shape index: {}]   ;;  %s5024_s12 = inlined_call_operand.vmem [shape: f32[1,34], index: 12, kind: input, shape index: {}]   ;;  %s5025_s13 = inlined_call_operand.hbm [shape: f32[1,32], index: 13, kind: input, shape index: {}]   ;;  %s5026_s14 = inlined_call_operand.<no memory space> [shape: f32[1,1], index: 14, kind: input, shape index: {}]   ;;  %s5027_s15 = inlined_call_operand.vmem [shape: f32[8,2], index: 15, kind: output, shape index: {}]  }
   0x1   :  { %v20_v0 = vstv %s5026_s14 }
   0x2   :  { %21 = vst [vmem:[#allocation5] sm:$0x1] %v20_v0 }
   0x3   :  { %22 = vsyncpa [#allocation7], 0 }
   0x4   :  { %23 = vsyncpa [#allocation9], 0  ;;  %s3914_s20 = smov [#allocation8]  }
   0x5   :  { %s51_s21 = sshll.u32 %s3914_s20, 4  ;;  %s52_s21 = int_to_ptr.vmem [resolvable:$true] %s51_s21 }
   0x6   :  { %s3858_s22 = scalar_lea.vmem %s52_s21, 1536  ;;  %p3863_p1 = scmp.lt.s32.totalorder %s52_s21, %s52_s21 }
   0x7   :  { %p3859_p0 = scmp.ne.s32.totalorder %s52_s21, %s3858_s22  ;;  %p3864_p2 = scmp.lt.s32.totalorder %s3858_s22, %s3858_s22 }
   0x9   :  { %p3865_p3 = por %p3864_p2, %p3863_p1 }
   0xb   :  { %p3866_p4 = pnand %p3865_p3, %p3859_p0 }
   0xd   :  { %3869 = shalt.err (!%p3866_p4)
}
   0xe   :  { %s3915_s23 = smov 384   ;;  %s3916_s24 = smov 24  }
   0xf   :  { %57 = dma.hbm_to_vmem [thread:$0]  %s5018_s6, 1536, %s52_s21, [#allocation9], %s3915_s23, %s3915_s23, %s3916_s24  }
  0x10   :  { %s3917_s14 = smov [#allocation6]  }
  0x11   :  { %s37_s27 = sshll.u32 %s3917_s14, 4  ;;  %s38_s27 = int_to_ptr.vmem [resolvable:$true] %s37_s27 }
  0x12   :  { %s3878_s28 = scalar_lea.vmem %s38_s27, 256  ;;  %p3883_p6 = scmp.lt.s32.totalorder %s38_s27, %s38_s27 }
  0x13   :  { %p3879_p5 = scmp.ne.s32.totalorder %s38_s27, %s3878_s28  ;;  %p3884_p7 = scmp.lt.s32.totalorder %s3878_s28, %s3878_s28 }
  0x15   :  { %p3885_p8 = por %p3884_p7, %p3883_p6 }
  0x17   :  { %p3886_p9 = pnand %p3885_p8, %p3879_p5 }
  0x19   :  { %3889 = shalt.err (!%p3886_p9)
}
  0x1a   :  { %s3918_s29 = smov 128   ;;  %s3919_s30 = smov 8  }
  0x1b   :  { %43 = dma.hbm_to_vmem [thread:$0]  %s5016_s4, 256, %s38_s27, [#allocation7], %s3918_s29, %s3918_s29, %s3919_s30  }
  0x1c   :  { %s3920_s18 = smov [#allocation10]  }
  0x1d   :  { %s76_s19 = sshll.u32 %s3920_s18, 4  ;;  %s77_s19 = int_to_ptr.vmem [resolvable:$true] %s76_s19 }
  0x1e   :  { %s3898_s6 = scalar_lea.vmem %s77_s19, 16  ;;  %s3902_s20 = scalar_lea.vmem %s77_s19, 32 }
  0x1f   :  { %p3899_p10 = scmp.ne.s32.totalorder %s77_s19, %s3898_s6  ;;  %p3903_p11 = scmp.lt.s32.totalorder %s77_s19, %s77_s19 }
  0x20   :  { %p3904_p12 = scmp.lt.s32.totalorder %s3902_s20, %s3898_s6 }
  0x22   :  { %p3905_p13 = por %p3904_p12, %p3903_p11 }
  0x24   :  { %p3906_p0 = pnand %p3905_p13, %p3899_p10 }
  0x26   :  { %3909 = shalt.err (!%p3906_p0)
}
  0x27   :  { %79 = dma.hbm_to_vmem [thread:$0]  %s5025_s13, 16, %s77_s19, [#allocation9]  }
  0x28   :  { %3910 = dma.done.wait [#allocation7], 256  }
  0x29   :  { %3911 = vsyncadd [#allocation7], 4294967040 }
  0x2a   :  { %3912 = dma.done.wait [#allocation9], 1552  }
  0x2b   :  { %3913 = vsyncadd [#allocation9], 4294965744  ;;  %v121_v1 = vlaneseq  ;;  %v3921_v2 = vmov 1983009808   ;;  %v100_v6 = vld [vmem:[#allocation6 + $0x8] sm:$0xff]  ;;  %v99_v7 = vld [vmem:[#allocation6] sm:$0xff] }
  0x2c   :  { %v119_v3 = vunpack.c.l.s4 %v3921_v2  ;;  %v91_v8 = vld [vmem:[%s5012_s0] sm:$0x3]  ;;  %3648 = vmatprep.subr.mxu1 %v100_v6  ;;  %v92_v10 = vld [vmem:[%s5012_s0 + $0x2] sm:$0x3]  ;;  %v93_v11 = vld [vmem:[%s5012_s0 + $0x4] sm:$0x3] }
  0x2d   :  { %v4027_v5 = vshrl.u32 %v121_v1, 7  ;;  %v94_v12 = vld [vmem:[%s5012_s0 + $0x6] sm:$0x3]  ;;  %3649 = vmatpush3.msra.mxu1 %v100_v6  ;;  %v116_v13 = vcombine.low %v91_v8, %v92_v10  ;;  %v95_v15 = vld [vmem:[%s5012_s0 + $0x8] sm:$0x3]  ;;  %vm150_vm0 = vcmask 130048  }
  0x2e   :  { %v120_v4 = vunpack.c.0.s8 %v119_v3  ;;  %v117_v14 = vcombine.low %v93_v11, %v94_v12  ;;  %v96_v16 = vld [vmem:[%s5012_s0 + $0xa] sm:$0x3]  ;;  %v97_v17 = vld [vmem:[%s5012_s0 + $0xc] sm:$0x3]  ;;  %3650 = vmatprep.subr.mxu1 %v99_v7  ;;  %v98_v18 = vld [vmem:[%s5012_s0 + $0xe] sm:$0x3] }
  0x2f   :  { %v133_v19 = vcombine.low %v95_v15, %v96_v16  ;;  %v242_v20 = vld [vmem:[#allocation8 + $0x50] sm:$0xff]  ;;  %3651 = vmatpush3.msra.mxu1 %v99_v7  ;;  %v134_v23 = vcombine.low %v97_v17, %v98_v18  ;;  %v241_v28 = vld [vmem:[#allocation8 + $0x48] sm:$0xff]  ;;  %v243_v29 = vld [vmem:[#allocation8 + $0x58] sm:$0xff]  ;;  %v3922_v39 = vmov 0.0   ;;  %vm261_vm1 = vcmask 261120  }
  0x30   :  { %v4033_v9 = vsub.s32 %v120_v4, %v4027_v5  ;;  %292 = vmatprep.subr.mxu1 %v242_v20  ;;  %3655 = vmatprep.subr.mxu0 %v243_v29  ;;  %v239_v30 = vld [vmem:[#allocation8 + $0x38] sm:$0xff]  ;;  %v238_v31 = vld [vmem:[#allocation8 + $0x30] sm:$0xff]  ;;  %v240_v32 = vld [vmem:[#allocation8 + $0x40] sm:$0xff]  ;;  %v4199_v4 = vsub.s32 0, %v4027_v5  ;;  %v4205_v7 = vsub.s32 2, %v4027_v5  ;;  %v4208_v8 = vsub.s32 1, %v4027_v5 }
  0x31   :  { %3656 = vmatpush3.msra.mxu0 %v243_v29  ;;  %v236_v33 = vld [vmem:[#allocation8 + $0x20] sm:$0xff]  ;;  %v235_v34 = vld [vmem:[#allocation8 + $0x18] sm:$0xff]  ;;  %v237_v35 = vld [vmem:[#allocation8 + $0x28] sm:$0xff]  ;;  %vm522_vm2 = vcmask 785408   ;;  %vm725_vm4 = vcmask 523264   ;;  %vm639_vm5 = vcmask 56320  }
  0x32   :  { %v124_v21 = vrot.slane %v116_v13, %v4033_v9  ;;  %v131_v22 = vrot.slane %v117_v14, %v4033_v9  ;;  %v141_v24 = vrot.slane %v133_v19, %v4033_v9  ;;  %v148_v26 = vrot.slane %v134_v23, %v4033_v9  ;;  %3657 = vmatprep.subr.mxu0 %v240_v32  ;;  %v233_v36 = vld [vmem:[#allocation8 + $0x8] sm:$0xff]  ;;  %v232_v37 = vld [vmem:[#allocation8] sm:$0xff]  ;;  %v234_v38 = vld [vmem:[#allocation8 + $0x10] sm:$0xff] }
  0x33   :  { %3658 = vmatpush3.msra.mxu0 %v240_v32  ;;  %v4064_v40 = vld [vmem:[%s5022_s10 + $0x78] sm:$0xff]  ;;  %v3560_v41 = vld [vmem:[%s5017_s5] ss:$0 sm:$0xff]  ;;  %v4073_v48 = vld [vmem:[%s5022_s10 + $0x70] sm:$0xff]  ;;  %vm877_vm14 = vcmask 517120   ;;  %vm3098_vm15 = vcmask 1040384  }
  0x34   :  { %v132_v25 = vcombine.low %v124_v21, %v131_v22  ;;  %v149_v27 = vcombine.low %v141_v24, %v148_v26  ;;  %3659 = vmatprep.subr.mxu0 %v237_v35  ;;  %v4080_v49 = vld [vmem:[%s5022_s10 + $0x68] sm:$0xff]  ;;  %v4087_v50 = vld [vmem:[%s5022_s10 + $0x60] sm:$0xff]  ;;  %v4093_v51 = vld [vmem:[%s5022_s10 + $0x58] sm:$0xff] }
  0x35   :  { %3660 = vmatpush3.msra.mxu0 %v237_v35  ;;  %v4100_v52 = vld [vmem:[%s5022_s10 + $0x50] sm:$0xff]  ;;  %v4107_v53 = vld [vmem:[%s5022_s10 + $0x48] sm:$0xff]  ;;  %v4113_v54 = vld [vmem:[%s5022_s10 + $0x40] sm:$0xff] }
  0x36   :  { %3652 = vmatprep.mubr.msk.f32.mxu1 %vm150_vm0, %v132_v25  ;;  %3661 = vmatprep.subr.mxu0 %v234_v38  ;;  %v4119_v55 = vld [vmem:[%s5022_s10 + $0x38] sm:$0xff]  ;;  %v4125_v56 = vld [vmem:[%s5022_s10 + $0x30] sm:$0xff]  ;;  %v4131_v57 = vld [vmem:[%s5022_s10 + $0x28] sm:$0xff] }
  0x37   :  { %3653 = vmatmul.mubr.msk.f32.vlgmr.msra.gmra.mxu1 %vm150_vm0, %v149_v27  ;;  %3662 = vmatpush3.msra.mxu0 %v234_v38  ;;  %v4137_v58 = vld [vmem:[%s5022_s10 + $0x20] sm:$0xff]  ;;  %v4143_v59 = vld [vmem:[%s5022_s10 + $0x18] sm:$0xff]  ;;  %v4149_v60 = vld [vmem:[%s5022_s10 + $0x10] sm:$0xff]  ;;  %vm2889_vm0 = vcmask 254976  }
  0x38   :  { %293 = vmatpush1.msra.mxu1 %v241_v28  ;;  %332 = vmatprep.mubr.f32.mxu1 %v3922_v39  ;;  %v4155_v61 = vld [vmem:[%s5022_s10 + $0x8] sm:$0xff]  ;;  %v4161_v62 = vld [vmem:[%s5022_s10] sm:$0xff]  ;;  %v550_v63 = vld [vmem:[%s5020_s8 + $0x18] sm:$0xff] }
  0x39   :  { %294 = vmatprep.subr.mxu1 %v239_v30  ;;  %745 = vmatprep.subr.mxu0 %v4064_v40  ;;  %v549_v0 = vld [vmem:[%s5020_s8 + $0x10] sm:$0xff]  ;;  %v548_v2 = vld [vmem:[%s5020_s8 + $0x8] sm:$0xff]  ;;  %v547_v3 = vld [vmem:[%s5020_s8] sm:$0xff]  ;;  %s3924_s8 = smov 64  }
  0x3a   :  { %295 = vmatpush1.msra.mxu1 %v238_v31  ;;  %v244_v6 = vld [vmem:[%s5019_s7] sm:$0x7]  ;;  %s3923_s7 = smov 96  }
  0x3b   :  { %296 = vmatprep.subr.mxu1 %v236_v33  ;;  %v249_v10 = vrot.slane %v244_v6, %v4199_v4  ;;  %v257_v11 = vrot.slane %v244_v6, %v4205_v7  ;;  %v253_v12 = vrot.slane %v244_v6, %v4208_v8 }
  0x3c   :  { %297 = vmatpush1.msra.mxu1 %v235_v34 }
  0x3d   :  { %298 = vmatprep.subr.mxu1 %v233_v36 }
  0x3e   :  { %299 = vmatpush1.msra.mxu1 %v232_v37 }
  0x3f   :  { %3666 = vmatprep.subr.mxu1 %v550_v63 }
  0xf7   :  { %v3654_v42 = vpop.f32.mrf.mxu1 }
  0xf8   :  { %v227_v43 = vadd.f32 %v3654_v42, %v3560_v41 }
  0xf9   :  { %v221_v44 = vpop.f32.mrf.mxu1 }
  0xfa   :  { %v222_v45 = vadd.f32 %v3560_v41, %v221_v44  ;;  %v231_v47 = vmax.f32 %v227_v43, 0.0 }
  0xfc   :  { %v230_v46 = vmax.f32 %v222_v45, 0.0 }
  0xfe   :  { %3563 = vmatmul.mubr.msk.f32.vlgmr.msra.gmra.mxu1 %vm261_vm1, %v230_v46  ;;  %3663 = vmatprep.mubr.msk.f32.mxu0 %vm261_vm1, %v230_v46 }
  0xff   :  { %3664 = vmatmul.mubr.msk.f32.vlgmr.msra.gmra.mxu0 %vm261_vm1, %v231_v47  ;;  %338 = vmatprep.mubr.f32.mxu1 %v3922_v39 }
 0x100   :  { %746 = vmatpush1.msra.mxu0 %v4073_v48  ;;  %793 = vmatprep.mubr.f32.mxu0 %v3922_v39 }
 0x101   :  { %747 = vmatprep.subr.mxu0 %v4080_v49  ;;  %3667 = vmatpush3.msra.mxu1 %v550_v63 }
 0x102   :  { %3564 = vmatmul.mubr.msk.f32.gmra.mxu1 %vm261_vm1, %v231_v47  ;;  %748 = vmatpush1.msra.mxu0 %v4087_v50 }
 0x103   :  { %749 = vmatprep.subr.mxu0 %v4093_v51  ;;  %3668 = vmatprep.subr.mxu1 %v549_v0 }
 0x104   :  { %750 = vmatpush1.msra.mxu0 %v4100_v52  ;;  %3669 = vmatpush3.msra.mxu1 %v549_v0 }
 0x105   :  { %751 = vmatprep.subr.mxu0 %v4107_v53  ;;  %3670 = vmatprep.subr.mxu1 %v548_v2 }
 0x106   :  { %752 = vmatpush1.msra.mxu0 %v4113_v54  ;;  %3671 = vmatpush3.msra.mxu1 %v548_v2 }
 0x107   :  { %753 = vmatprep.subr.mxu0 %v4119_v55  ;;  %3672 = vmatprep.subr.mxu1 %v547_v3 }
 0x108   :  { %754 = vmatpush1.msra.mxu0 %v4125_v56  ;;  %3673 = vmatpush3.msra.mxu1 %v547_v3 }
 0x109   :  { %755 = vmatprep.subr.mxu0 %v4131_v57  ;;  %918 = vmatprep.subr.mxu1 %v4064_v40 }
 0x10a   :  { %756 = vmatpush1.msra.mxu0 %v4137_v58 }
 0x10b   :  { %757 = vmatprep.subr.mxu0 %v4143_v59 }
 0x10c   :  { %758 = vmatpush1.msra.mxu0 %v4149_v60 }
 0x10d   :  { %759 = vmatprep.subr.mxu0 %v4155_v61 }
 0x10e   :  { %760 = vmatpush1.msra.mxu0 %v4161_v62 }
 0x10f   :  { %794 = vmatmul.mubr.f32.vlgmr.msra.gmra.mxu0 %v3922_v39  ;;  %1091 = vmatprep.subr.mxu0 %v4064_v40 }
 0x110   :  { %1092 = vmatpush1.msra.mxu0 %v4073_v48  ;;  %1139 = vmatprep.mubr.f32.mxu0 %v3922_v39 }
 0x111   :  { %1093 = vmatprep.subr.mxu0 %v4080_v49 }
 0x112   :  { %1094 = vmatpush1.msra.mxu0 %v4087_v50 }
 0x113   :  { %1095 = vmatprep.subr.mxu0 %v4093_v51 }
 0x114   :  { %1096 = vmatpush1.msra.mxu0 %v4100_v52 }
 0x115   :  { %1097 = vmatprep.subr.mxu0 %v4107_v53 }
 0x116   :  { %1098 = vmatpush1.msra.mxu0 %v4113_v54 }
 0x117   :  { %1099 = vmatprep.subr.mxu0 %v4119_v55 }
 0x118   :  { %1100 = vmatpush1.msra.mxu0 %v4125_v56 }
 0x119   :  { %1101 = vmatprep.subr.mxu0 %v4131_v57 }
 0x11a   :  { %1102 = vmatpush1.msra.mxu0 %v4137_v58 }
 0x11b   :  { %1103 = vmatprep.subr.mxu0 %v4143_v59 }
 0x11c   :  { %1104 = vmatpush1.msra.mxu0 %v4149_v60 }
 0x11d   :  { %1105 = vmatprep.subr.mxu0 %v4155_v61 }
 0x11e   :  { %1106 = vmatpush1.msra.mxu0 %v4161_v62 }
 0x11f   :  { %1437 = vmatprep.subr.mxu0 %v4064_v40 }
 0x1be   :  { %v334_v13 = vpop.f32.mrf.mxu1 }
 0x1bf   :  { %v335_v14 = vadd.f32 %v334_v13, %v249_v10  ;;  %v3665_v15 = vpop.f32.mrf.mxu0 }
 0x1c0   :  { %v417_v16 = vadd.f32 %v3665_v15, %v257_v11  ;;  %v336_v17 = vpop.f32.mrf.mxu1 }
 0x1c1   :  { %v420_v18 = vmax.f32 %v335_v14, 0.0  ;;  %v337_v19 = vadd.f32 %v336_v17, %v253_v12  ;;  %v411_v20 = vpop.f32.mrf.mxu0 }
 0x1c2   :  { %v412_v21 = vadd.f32 %v411_v20, %v257_v11  ;;  %v340_v22 = vpop.f32.mrf.mxu1  ;;  %v465_v26 = vcombine.high %v417_v16, %v417_v16  ;;  %v4232_v41 = vrot.slane %v417_v16, %v4033_v9 }
 0x1c3   :  { %v428_v23 = vcombine.low %v335_v14, %v337_v19  ;;  %v429_v24 = vcombine.high %v335_v14, %v337_v19  ;;  %v341_v25 = vadd.f32 %v340_v22, %v249_v10  ;;  %3674 = vmatprep.mubr.msk.f32.mxu1 %vm261_vm1, %v420_v18  ;;  %v4275_v14 = vand.u32 127, %v121_v1 }
 0x1c4   :  { %v430_v27 = vcombine.high %v412_v21, %v412_v21  ;;  %v4215_v28 = vrot.slane %v412_v21, %v4033_v9  ;;  %v342_v29 = vpop.f32.mrf.mxu1  ;;  %v4241_v44 = vrot.slane %v465_v26, %v4033_v9 }
 0x1c5   :  { %v4218_v30 = vrot.slane %v429_v24, %v4033_v9  ;;  %v421_v31 = vmax.f32 %v341_v25, 0.0  ;;  %v343_v32 = vadd.f32 %v342_v29, %v253_v12  ;;  %v4221_v33 = vrot.slane %v428_v23, %v4033_v9 }
 0x1c6   :  { %v4224_v34 = vrot.slane %v430_v27, %v4033_v9  ;;  %v4279_v18 = vadd.s32 128, %v4275_v14 }
 0x1c7   :  { %v463_v35 = vcombine.low %v341_v25, %v343_v32  ;;  %v464_v36 = vcombine.high %v341_v25, %v343_v32  ;;  %3675 = vmatmul.mubr.msk.f32.vlgmr.msra.gmra.mxu1 %vm261_vm1, %v421_v31  ;;  %v459_v37 = vcombine.low %v4221_v33, %v4215_v28  ;;  %v460_v38 = vcombine.high %v4221_v33, %v4215_v28 }
 0x1c8   :  { %919 = vmatpush1.msra.mxu1 %v4073_v48  ;;  %966 = vmatprep.mubr.f32.mxu1 %v3922_v39  ;;  %v461_v42 = vcombine.low %v4218_v30, %v4224_v34  ;;  %v462_v43 = vcombine.high %v4218_v30, %v4224_v34  ;;  %vm704_vm3 = vcmp.lt.s32.totalorder %v4279_v18, 192  ;;  %vm3537_vm1 = vcmask 1041409  }
 0x1c9   :  { %v4244_v45 = vrot.slane %v463_v35, %v4033_v9  ;;  %v4247_v46 = vrot.slane %v464_v36, %v4033_v9  ;;  %498 = vrot.lane.b32.xlu0 %v459_v37, %s3923_s7  ;;  %920 = vmatprep.subr.mxu1 %v4080_v49 }
 0x1ca   :  { %921 = vmatpush1.msra.mxu1 %v4087_v50 }
 0x1cb   :  { %922 = vmatprep.subr.mxu1 %v4093_v51  ;;  %v494_v47 = vcombine.low %v4244_v45, %v4232_v41  ;;  %v495_v63 = vcombine.high %v4244_v45, %v4232_v41  ;;  %v496_v0 = vcombine.low %v4247_v46, %v4241_v44  ;;  %v497_v2 = vcombine.high %v4247_v46, %v4241_v44 }
 0x1cc   :  { %923 = vmatpush1.msra.mxu1 %v4100_v52 }
 0x1cd   :  { %924 = vmatprep.subr.mxu1 %v4107_v53 }
 0x1ce   :  { %925 = vmatpush1.msra.mxu1 %v4113_v54 }
 0x1cf   :  { %926 = vmatprep.subr.mxu1 %v4119_v55  ;;  %v795_v3 = vpop.f32.mrf.mxu0 }
 0x1d0   :  { %927 = vmatpush1.msra.mxu1 %v4125_v56 }
 0x1d1   :  { %928 = vmatprep.subr.mxu1 %v4131_v57  ;;  %v797_v12 = vpop.f32.mrf.mxu0 }
 0x1d2   :  { %929 = vmatpush1.msra.mxu1 %v4137_v58  ;;  %v802_v13 = vcombine.low %v795_v3, %v797_v12 }
 0x1d3   :  { %930 = vmatprep.subr.mxu1 %v4143_v59 }
 0x1d4   :  { %931 = vmatpush1.msra.mxu1 %v4149_v60  ;;  %v809_v15 = vrot.slane %v802_v13, %v4033_v9 }
 0x1d5   :  { %932 = vmatprep.subr.mxu1 %v4155_v61 }
 0x1d6   :  { %933 = vmatpush1.msra.mxu1 %v4161_v62 }
 0x1d7   :  { %1264 = vmatprep.subr.mxu1 %v4064_v40 }
 0x23b   :  { %v499_v6 = vpop.permute.xlu0 %498 }
 0x23c   :  { %v514_v10 = vrot.slane %v499_v6, 2 }
 0x23e   :  { %v523_v11 = vsel %vm522_vm2, %v499_v6, %v514_v10  ;;  %v4292_v10 = vld [vmem:[%s5021_s9] ss:$0 sm:$0xff] }
 0x23f   :  { %539 = vst [vmem:[#allocation2] sm:$0xf] %v523_v11 }
 0x246   :  { %v708_v16 = vld [vmem:[#allocation2] sm:$0xf] }
 0x247   :  { %v811_v17 = vadd.f32 %v809_v15, %v708_v16 }
 0x249   :  { %v812_v19 = vmul.f32 2.0, %v811_v17  ;;  %v831_v20 = vrot.slane %v811_v17, %v4033_v9 }
 0x24b   :  { %v820_v21 = vrot.slane %v812_v19, %v4033_v9  ;;  %v832_v23 = vcombine.high %v831_v20, %v831_v20  ;;  %v3570_v24 = vmul.f32 -1.442695, %v831_v20 }
 0x24d   :  { %v821_v22 = vcombine.high %v820_v21, %v820_v21 }
 0x24f   :  { %v836_v1 = vsel %vm704_vm3, %v821_v22, %v832_v23 }
 0x250   :  { %v3571_v25 = vmul.f32 -1.442695, %v836_v1 }
 0x252   :  { %3762 = vpow2.f32 %v3571_v25 }
 0x253   :  { %3764 = vpow2.f32 %v3570_v24 }
 0x25f   :  { %v3763_v26 = vpop.eup %3762 }
 0x260   :  { %v3765_v27 = vpop.eup %3764  ;;  %v844_v29 = vadd.f32 1.0, %v3763_v26 }
 0x261   :  { %v843_v31 = vadd.f32 1.0, %v3765_v27 }
 0x262   :  { %3766 = vrcp.f32 %v844_v29 }
 0x263   :  { %3768 = vrcp.f32 %v843_v31 }
 0x26f   :  { %v3767_v32 = vpop.eup %3766 }
 0x270   :  { %v850_v35 = vmul.f32 2.0, %v3767_v32  ;;  %v3769_v37 = vpop.eup %3768 }
 0x271   :  { %v855_v13 = vmul.f32 0.0, %v3769_v37 }
 0x272   :  { %v3573_v36 = vadd.f32 -1.0, %v850_v35 }
 0x274   :  { %v854_v3 = vsel %vm704_vm3, %v3573_v36, %v3767_v32 }
 0x275   :  { %v856_v6 = vmul.f32 %v3769_v37, %v854_v3 }
 0x277   :  { %858 = vrot.lane.b32.xlu0 %v856_v6, %s3924_s8 }
 0x287   :  { %v3676_v11 = vpop.f32.mrf.mxu1 }
 0x288   :  { %v4295_v12 = vadd.f32 %v3676_v11, %v4292_v10 }
 0x289   :  { %v4324_v33 = vpop.f32.mrf.mxu1 }
 0x2e9   :  { %v859_v15 = vpop.permute.xlu0 %858 }
 0x2ea   :  { %v861_v16 = vadd.f32 %v859_v15, %v855_v13 }
 0x2ec   :  { %3770 = vtanh.f32 %v861_v16 }
 0x2f9   :  { %v3771_v17 = vpop.eup %3770 }
 0x2fa   :  { %v4297_v19 = vmul.f32 %v3771_v17, %v854_v3 }
 0x2fc   :  { %898 = vrot.lane.b32.xlu1 %v4297_v19, %s3924_s8 }
 0x300   :  { %500 = vrot.lane.b32.xlu1 %v460_v38, %s3923_s7 }
 0x36e   :  { %v899_v20 = vpop.permute.xlu1 %898 }
 0x36f   :  { %3575 = vmatmul.mubr.msk.f32.vlgmr.msra.gmra.mxu1 %vm725_vm4, %v899_v20 }
 0x370   :  { %1265 = vmatpush1.msra.mxu1 %v4073_v48  ;;  %1312 = vmatprep.mubr.f32.mxu1 %v3922_v39 }
 0x371   :  { %1266 = vmatprep.subr.mxu1 %v4080_v49 }
 0x372   :  { %v501_v21 = vpop.permute.xlu1 %500  ;;  %1267 = vmatpush1.msra.mxu1 %v4087_v50 }
 0x373   :  { %v515_v22 = vrot.slane %v501_v21, 2  ;;  %1268 = vmatprep.subr.mxu1 %v4093_v51 }
 0x374   :  { %1269 = vmatpush1.msra.mxu1 %v4100_v52 }
 0x375   :  { %v524_v28 = vsel %vm522_vm2, %v501_v21, %v515_v22  ;;  %1270 = vmatprep.subr.mxu1 %v4107_v53 }
 0x376   :  { %540 = vst [vmem:[#allocation2 + $0x4] sm:$0xf] %v524_v28  ;;  %1271 = vmatpush1.msra.mxu1 %v4113_v54 }
 0x377   :  { %1272 = vmatprep.subr.mxu1 %v4119_v55 }
 0x378   :  { %1273 = vmatpush1.msra.mxu1 %v4125_v56 }
 0x379   :  { %1274 = vmatprep.subr.mxu1 %v4131_v57 }
 0x37a   :  { %1275 = vmatpush1.msra.mxu1 %v4137_v58 }
 0x37b   :  { %1276 = vmatprep.subr.mxu1 %v4143_v59 }
 0x37c   :  { %1277 = vmatpush1.msra.mxu1 %v4149_v60 }
 0x37d   :  { %1278 = vmatprep.subr.mxu1 %v4155_v61  ;;  %v880_v25 = vld [vmem:[#allocation2 + $0x4] sm:$0xf] }
 0x37e   :  { %1279 = vmatpush1.msra.mxu1 %v4161_v62 }
 0x37f   :  { %1610 = vmatprep.subr.mxu1 %v4064_v40 }
 0x42f   :  { %v968_v38 = vpop.f32.mrf.mxu1 }
 0x431   :  { %v970_v23 = vpop.f32.mrf.mxu1 }
 0x432   :  { %v975_v1 = vcombine.low %v968_v38, %v970_v23 }
 0x434   :  { %v982_v24 = vrot.slane %v975_v1, %v4033_v9 }
 0x436   :  { %v984_v26 = vadd.f32 %v982_v24, %v880_v25 }
 0x438   :  { %v985_v27 = vmul.f32 2.0, %v984_v26  ;;  %v1004_v29 = vrot.slane %v984_v26, %v4033_v9 }
 0x43a   :  { %v993_v31 = vrot.slane %v985_v27, %v4033_v9  ;;  %v1005_v35 = vcombine.high %v1004_v29, %v1004_v29  ;;  %v3576_v37 = vmul.f32 -1.442695, %v1004_v29 }
 0x43c   :  { %v994_v32 = vcombine.high %v993_v31, %v993_v31 }
 0x43e   :  { %v1009_v36 = vsel %vm704_vm3, %v994_v32, %v1005_v35 }
 0x43f   :  { %v3577_v3 = vmul.f32 -1.442695, %v1009_v36 }
 0x441   :  { %3772 = vpow2.f32 %v3577_v3 }
 0x442   :  { %3774 = vpow2.f32 %v3576_v37 }
 0x44e   :  { %v3773_v6 = vpop.eup %3772 }
 0x44f   :  { %v3775_v11 = vpop.eup %3774  ;;  %v1017_v13 = vadd.f32 1.0, %v3773_v6 }
 0x450   :  { %v1016_v15 = vadd.f32 1.0, %v3775_v11 }
 0x451   :  { %3776 = vrcp.f32 %v1017_v13 }
 0x452   :  { %3778 = vrcp.f32 %v1016_v15 }
 0x45e   :  { %v3777_v17 = vpop.eup %3776 }
 0x45f   :  { %v1023_v20 = vmul.f32 2.0, %v3777_v17  ;;  %v3779_v22 = vpop.eup %3778 }
 0x460   :  { %v1028_v23 = vmul.f32 %v3779_v22, %v861_v16 }
 0x461   :  { %v3579_v21 = vadd.f32 -1.0, %v1023_v20 }
 0x463   :  { %v1027_v28 = vsel %vm704_vm3, %v3579_v21, %v3777_v17 }
 0x464   :  { %v1029_v38 = vmul.f32 %v3779_v22, %v1027_v28 }
 0x466   :  { %1031 = vrot.lane.b32.xlu0 %v1029_v38, %s3924_s8 }
 0x46a   :  { %502 = vrot.lane.b32.xlu0 %v461_v42, %s3923_s7 }
 0x4d8   :  { %v1032_v1 = vpop.permute.xlu0 %1031 }
 0x4d9   :  { %v1034_v24 = vadd.f32 %v1032_v1, %v1028_v23 }
 0x4db   :  { %3780 = vtanh.f32 %v1034_v24 }
 0x4dc   :  { %v503_v25 = vpop.permute.xlu0 %502 }
 0x4dd   :  { %v516_v26 = vrot.slane %v503_v25, 2 }
 0x4df   :  { %v525_v27 = vsel %vm522_vm2, %v503_v25, %v516_v26 }
 0x4e0   :  { %541 = vst [vmem:[#allocation2 + $0x8] sm:$0xf] %v525_v27 }
 0x4e7   :  { %v1053_v37 = vld [vmem:[#allocation2 + $0x8] sm:$0xf] }
 0x4e8   :  { %v3781_v29 = vpop.eup %3780 }
 0x4e9   :  { %v4339_v31 = vmul.f32 %v3781_v29, %v1027_v28 }
 0x4eb   :  { %1071 = vrot.lane.b32.xlu1 %v4339_v31, %s3924_s8 }
 0x55d   :  { %v1072_v32 = vpop.permute.xlu1 %1071 }
 0x55e   :  { %3581 = vmatmul.mubr.msk.f32.vlgmr.msra.gmra.mxu0 %vm725_vm4, %v1072_v32 }
 0x55f   :  { %1438 = vmatpush1.msra.mxu0 %v4073_v48  ;;  %1485 = vmatprep.mubr.f32.mxu0 %v3922_v39 }
 0x560   :  { %1439 = vmatprep.subr.mxu0 %v4080_v49 }
 0x561   :  { %1440 = vmatpush1.msra.mxu0 %v4087_v50 }
 0x562   :  { %1441 = vmatprep.subr.mxu0 %v4093_v51 }
 0x563   :  { %1442 = vmatpush1.msra.mxu0 %v4100_v52 }
 0x564   :  { %1443 = vmatprep.subr.mxu0 %v4107_v53 }
 0x565   :  { %1444 = vmatpush1.msra.mxu0 %v4113_v54 }
 0x566   :  { %1445 = vmatprep.subr.mxu0 %v4119_v55 }
 0x567   :  { %1446 = vmatpush1.msra.mxu0 %v4125_v56 }
 0x568   :  { %1447 = vmatprep.subr.mxu0 %v4131_v57 }
 0x569   :  { %1448 = vmatpush1.msra.mxu0 %v4137_v58 }
 0x56a   :  { %1449 = vmatprep.subr.mxu0 %v4143_v59 }
 0x56b   :  { %1450 = vmatpush1.msra.mxu0 %v4149_v60 }
 0x56c   :  { %1451 = vmatprep.subr.mxu0 %v4155_v61 }
 0x56d   :  { %1452 = vmatpush1.msra.mxu0 %v4161_v62 }
 0x56e   :  { %1783 = vmatprep.subr.mxu0 %v4064_v40 }
 0x61e   :  { %v1141_v42 = vpop.f32.mrf.mxu0 }
 0x620   :  { %v1143_v16 = vpop.f32.mrf.mxu0 }
 0x621   :  { %v1148_v35 = vcombine.low %v1141_v42, %v1143_v16 }
 0x623   :  { %v1155_v36 = vrot.slane %v1148_v35, %v4033_v9 }
 0x625   :  { %v1157_v3 = vadd.f32 %v1155_v36, %v1053_v37 }
 0x627   :  { %v1158_v6 = vmul.f32 2.0, %v1157_v3  ;;  %v1177_v11 = vrot.slane %v1157_v3, %v4033_v9 }
 0x629   :  { %v1166_v13 = vrot.slane %v1158_v6, %v4033_v9  ;;  %v1178_v17 = vcombine.high %v1177_v11, %v1177_v11  ;;  %v3582_v21 = vmul.f32 -1.442695, %v1177_v11 }
 0x62b   :  { %v1167_v15 = vcombine.high %v1166_v13, %v1166_v13 }
 0x62d   :  { %v1182_v20 = vsel %vm704_vm3, %v1167_v15, %v1178_v17 }
 0x62e   :  { %v3583_v22 = vmul.f32 -1.442695, %v1182_v20 }
 0x630   :  { %3782 = vpow2.f32 %v3583_v22 }
 0x631   :  { %3784 = vpow2.f32 %v3582_v21 }
 0x63d   :  { %v3783_v40 = vpop.eup %3782 }
 0x63e   :  { %v3785_v28 = vpop.eup %3784  ;;  %v1190_v38 = vadd.f32 1.0, %v3783_v40 }
 0x63f   :  { %v1189_v23 = vadd.f32 1.0, %v3785_v28 }
 0x640   :  { %3786 = vrcp.f32 %v1190_v38 }
 0x641   :  { %3788 = vrcp.f32 %v1189_v23 }
 0x64d   :  { %v3787_v1 = vpop.eup %3786 }
 0x64e   :  { %v1196_v25 = vmul.f32 2.0, %v3787_v1  ;;  %v3789_v27 = vpop.eup %3788 }
 0x64f   :  { %v1201_v42 = vmul.f32 %v3789_v27, %v1034_v24 }
 0x650   :  { %v3585_v26 = vadd.f32 -1.0, %v1196_v25 }
 0x652   :  { %v1200_v29 = vsel %vm704_vm3, %v3585_v26, %v3787_v1 }
 0x653   :  { %v1202_v32 = vmul.f32 %v3789_v27, %v1200_v29 }
 0x655   :  { %1204 = vrot.lane.b32.xlu1 %v1202_v32, %s3924_s8 }
 0x659   :  { %504 = vrot.lane.b32.xlu1 %v462_v43, %s3923_s7 }
 0x6c7   :  { %v1205_v16 = vpop.permute.xlu1 %1204 }
 0x6c8   :  { %v1207_v35 = vadd.f32 %v1205_v16, %v1201_v42 }
 0x6ca   :  { %3790 = vtanh.f32 %v1207_v35 }
 0x6cb   :  { %v505_v36 = vpop.permute.xlu1 %504 }
 0x6cc   :  { %v517_v37 = vrot.slane %v505_v36, 2 }
 0x6ce   :  { %v526_v3 = vsel %vm522_vm2, %v505_v36, %v517_v37 }
 0x6cf   :  { %542 = vst [vmem:[#allocation2 + $0xc] sm:$0xf] %v526_v3 }
 0x6d6   :  { %v1226_v15 = vld [vmem:[#allocation2 + $0xc] sm:$0xf] }
 0x6d7   :  { %v3791_v6 = vpop.eup %3790 }
 0x6d8   :  { %v4374_v11 = vmul.f32 %v3791_v6, %v1200_v29 }
 0x6da   :  { %1244 = vrot.lane.b32.xlu0 %v4374_v11, %s3924_s8 }
 0x74c   :  { %v1245_v13 = vpop.permute.xlu0 %1244 }
 0x74d   :  { %3587 = vmatmul.mubr.msk.f32.vlgmr.msra.gmra.mxu1 %vm725_vm4, %v1245_v13 }
 0x74e   :  { %1611 = vmatpush1.msra.mxu1 %v4073_v48  ;;  %1658 = vmatprep.mubr.f32.mxu1 %v3922_v39 }
 0x74f   :  { %1612 = vmatprep.subr.mxu1 %v4080_v49 }
 0x750   :  { %1613 = vmatpush1.msra.mxu1 %v4087_v50 }
 0x751   :  { %1614 = vmatprep.subr.mxu1 %v4093_v51 }
 0x752   :  { %1615 = vmatpush1.msra.mxu1 %v4100_v52 }
 0x753   :  { %1616 = vmatprep.subr.mxu1 %v4107_v53 }
 0x754   :  { %1617 = vmatpush1.msra.mxu1 %v4113_v54 }
 0x755   :  { %1618 = vmatprep.subr.mxu1 %v4119_v55 }
 0x756   :  { %1619 = vmatpush1.msra.mxu1 %v4125_v56 }
 0x757   :  { %1620 = vmatprep.subr.mxu1 %v4131_v57 }
 0x758   :  { %1621 = vmatpush1.msra.mxu1 %v4137_v58 }
 0x759   :  { %1622 = vmatprep.subr.mxu1 %v4143_v59 }
 0x75a   :  { %1623 = vmatpush1.msra.mxu1 %v4149_v60 }
 0x75b   :  { %1624 = vmatprep.subr.mxu1 %v4155_v61 }
 0x75c   :  { %1625 = vmatpush1.msra.mxu1 %v4161_v62 }
 0x80d   :  { %v1314_v30 = vpop.f32.mrf.mxu1 }
 0x80f   :  { %v1316_v34 = vpop.f32.mrf.mxu1 }
 0x810   :  { %v1321_v43 = vcombine.low %v1314_v30, %v1316_v34 }
 0x812   :  { %v1328_v24 = vrot.slane %v1321_v43, %v4033_v9 }
 0x814   :  { %v1330_v17 = vadd.f32 %v1328_v24, %v1226_v15 }
 0x816   :  { %v1331_v20 = vmul.f32 2.0, %v1330_v17  ;;  %v1350_v21 = vrot.slane %v1330_v17, %v4033_v9 }
 0x818   :  { %v1339_v22 = vrot.slane %v1331_v20, %v4033_v9  ;;  %v1351_v28 = vcombine.high %v1350_v21, %v1350_v21  ;;  %v3588_v23 = vmul.f32 -1.442695, %v1350_v21 }
 0x81a   :  { %v1340_v40 = vcombine.high %v1339_v22, %v1339_v22 }
 0x81c   :  { %v1355_v38 = vsel %vm704_vm3, %v1340_v40, %v1351_v28 }
 0x81d   :  { %v3589_v1 = vmul.f32 -1.442695, %v1355_v38 }
 0x81f   :  { %3792 = vpow2.f32 %v3589_v1 }
 0x820   :  { %3794 = vpow2.f32 %v3588_v23 }
 0x82c   :  { %v3793_v25 = vpop.eup %3792 }
 0x82d   :  { %v3795_v26 = vpop.eup %3794  ;;  %v1363_v27 = vadd.f32 1.0, %v3793_v25 }
 0x82e   :  { %v1362_v29 = vadd.f32 1.0, %v3795_v26 }
 0x82f   :  { %3796 = vrcp.f32 %v1363_v27 }
 0x830   :  { %3798 = vrcp.f32 %v1362_v29 }
 0x83c   :  { %v3797_v32 = vpop.eup %3796 }
 0x83d   :  { %v1369_v42 = vmul.f32 2.0, %v3797_v32  ;;  %v3799_v36 = vpop.eup %3798 }
 0x83e   :  { %v1374_v6 = vmul.f32 %v3799_v36, %v1207_v35 }
 0x83f   :  { %v3591_v16 = vadd.f32 -1.0, %v1369_v42 }
 0x841   :  { %v1373_v37 = vsel %vm704_vm3, %v3591_v16, %v3797_v32 }
 0x842   :  { %v1375_v3 = vmul.f32 %v3799_v36, %v1373_v37 }
 0x844   :  { %1377 = vrot.lane.b32.xlu0 %v1375_v3, %s3924_s8 }
 0x848   :  { %506 = vrot.lane.b32.xlu0 %v494_v47, %s3923_s7 }
 0x8b6   :  { %v1378_v13 = vpop.permute.xlu0 %1377 }
 0x8b7   :  { %v1380_v30 = vadd.f32 %v1378_v13, %v1374_v6 }
 0x8b9   :  { %3800 = vtanh.f32 %v1380_v30 }
 0x8ba   :  { %v507_v34 = vpop.permute.xlu0 %506 }
 0x8bb   :  { %v518_v43 = vrot.slane %v507_v34, 2 }
 0x8bd   :  { %v527_v24 = vsel %vm522_vm2, %v507_v34, %v518_v43 }
 0x8be   :  { %543 = vst [vmem:[#allocation2 + $0x10] sm:$0xf] %v527_v24 }
 0x8c6   :  { %v3801_v15 = vpop.eup %3800 }
 0x8c7   :  { %v4408_v17 = vmul.f32 %v3801_v15, %v1373_v37 }
 0x8c9   :  { %1417 = vrot.lane.b32.xlu1 %v4408_v17, %s3924_s8 }
 0x93b   :  { %v1418_v20 = vpop.permute.xlu1 %1417 }
 0x93c   :  { %3593 = vmatmul.mubr.msk.f32.vlgmr.msra.gmra.mxu0 %vm725_vm4, %v1418_v20 }
 0x93d   :  { %1784 = vmatpush1.msra.mxu0 %v4073_v48  ;;  %1831 = vmatprep.mubr.f32.mxu0 %v3922_v39 }
 0x93e   :  { %1785 = vmatprep.subr.mxu0 %v4080_v49 }
 0x93f   :  { %1786 = vmatpush1.msra.mxu0 %v4087_v50 }
 0x940   :  { %1787 = vmatprep.subr.mxu0 %v4093_v51 }
 0x941   :  { %1788 = vmatpush1.msra.mxu0 %v4100_v52  ;;  %v1399_v52 = vld [vmem:[#allocation2 + $0x10] sm:$0xf] }
 0x942   :  { %1789 = vmatprep.subr.mxu0 %v4107_v53 }
 0x943   :  { %1790 = vmatpush1.msra.mxu0 %v4113_v54 }
 0x944   :  { %1791 = vmatprep.subr.mxu0 %v4119_v55 }
 0x945   :  { %1792 = vmatpush1.msra.mxu0 %v4125_v56 }
 0x946   :  { %1793 = vmatprep.subr.mxu0 %v4131_v57 }
 0x947   :  { %1794 = vmatpush1.msra.mxu0 %v4137_v58 }
 0x948   :  { %1795 = vmatprep.subr.mxu0 %v4143_v59 }
 0x949   :  { %1796 = vmatpush1.msra.mxu0 %v4149_v60 }
 0x94a   :  { %1797 = vmatprep.subr.mxu0 %v4155_v61 }
 0x94b   :  { %1798 = vmatpush1.msra.mxu0 %v4161_v62 }
 0x9fc   :  { %v1487_v48 = vpop.f32.mrf.mxu0 }
 0x9fe   :  { %v1489_v49 = vpop.f32.mrf.mxu0 }
 0x9ff   :  { %v1494_v50 = vcombine.low %v1487_v48, %v1489_v49 }
 0xa01   :  { %v1501_v51 = vrot.slane %v1494_v50, %v4033_v9 }
 0xa03   :  { %v1503_v53 = vadd.f32 %v1501_v51, %v1399_v52 }
 0xa05   :  { %v1504_v54 = vmul.f32 2.0, %v1503_v53  ;;  %v1523_v55 = vrot.slane %v1503_v53, %v4033_v9 }
 0xa07   :  { %v1512_v56 = vrot.slane %v1504_v54, %v4033_v9  ;;  %v1524_v58 = vcombine.high %v1523_v55, %v1523_v55  ;;  %v3594_v60 = vmul.f32 -1.442695, %v1523_v55 }
 0xa09   :  { %v1513_v57 = vcombine.high %v1512_v56, %v1512_v56 }
 0xa0b   :  { %v1528_v59 = vsel %vm704_vm3, %v1513_v57, %v1524_v58 }
 0xa0c   :  { %v3595_v61 = vmul.f32 -1.442695, %v1528_v59 }
 0xa0e   :  { %3802 = vpow2.f32 %v3595_v61 }
 0xa0f   :  { %3804 = vpow2.f32 %v3594_v60 }
 0xa1b   :  { %v3803_v62 = vpop.eup %3802 }
 0xa1c   :  { %v3805_v47 = vpop.eup %3804  ;;  %v1536_v35 = vadd.f32 1.0, %v3803_v62 }
 0xa1d   :  { %v1535_v21 = vadd.f32 1.0, %v3805_v47 }
 0xa1e   :  { %3806 = vrcp.f32 %v1536_v35 }
 0xa1f   :  { %3808 = vrcp.f32 %v1535_v21 }
 0xa2b   :  { %v3807_v22 = vpop.eup %3806 }
 0xa2c   :  { %v1542_v40 = vmul.f32 2.0, %v3807_v22  ;;  %v3809_v38 = vpop.eup %3808 }
 0xa2d   :  { %v1547_v25 = vmul.f32 %v3809_v38, %v1380_v30 }
 0xa2e   :  { %v3597_v28 = vadd.f32 -1.0, %v1542_v40 }
 0xa30   :  { %v1546_v23 = vsel %vm704_vm3, %v3597_v28, %v3807_v22 }
 0xa31   :  { %v1548_v1 = vmul.f32 %v3809_v38, %v1546_v23 }
 0xa33   :  { %1550 = vrot.lane.b32.xlu1 %v1548_v1, %s3924_s8 }
 0xa37   :  { %508 = vrot.lane.b32.xlu1 %v495_v63, %s3923_s7 }
 0xaa5   :  { %v1551_v26 = vpop.permute.xlu1 %1550 }
 0xaa6   :  { %v1553_v27 = vadd.f32 %v1551_v26, %v1547_v25 }
 0xaa8   :  { %3810 = vtanh.f32 %v1553_v27 }
 0xaa9   :  { %v509_v29 = vpop.permute.xlu1 %508 }
 0xaaa   :  { %v519_v32 = vrot.slane %v509_v29, 2 }
 0xaac   :  { %v528_v42 = vsel %vm522_vm2, %v509_v29, %v519_v32 }
 0xaad   :  { %544 = vst [vmem:[#allocation2 + $0x14] sm:$0xf] %v528_v42 }
 0xab4   :  { %v1572_v6 = vld [vmem:[#allocation2 + $0x14] sm:$0xf] }
 0xab5   :  { %v3811_v16 = vpop.eup %3810 }
 0xab6   :  { %v4442_v36 = vmul.f32 %v3811_v16, %v1546_v23 }
 0xab8   :  { %1590 = vrot.lane.b32.xlu0 %v4442_v36, %s3924_s8 }
 0xb2a   :  { %v1591_v37 = vpop.permute.xlu0 %1590 }
 0xb2b   :  { %3599 = vmatmul.mubr.msk.f32.vlgmr.msra.gmra.mxu1 %vm725_vm4, %v1591_v37 }
 0xb2c   :  { %2004 = vmatprep.mubr.f32.mxu1 %v3922_v39 }
 0xbeb   :  { %v1660_v41 = vpop.f32.mrf.mxu1 }
 0xbed   :  { %v1662_v45 = vpop.f32.mrf.mxu1 }
 0xbee   :  { %v1667_v63 = vcombine.low %v1660_v41, %v1662_v45 }
 0xbf0   :  { %v1674_v3 = vrot.slane %v1667_v63, %v4033_v9 }
 0xbf2   :  { %v1676_v13 = vadd.f32 %v1674_v3, %v1572_v6 }
 0xbf4   :  { %v1677_v30 = vmul.f32 2.0, %v1676_v13  ;;  %v1696_v34 = vrot.slane %v1676_v13, %v4033_v9 }
 0xbf6   :  { %v1685_v43 = vrot.slane %v1677_v30, %v4033_v9  ;;  %v1697_v15 = vcombine.high %v1696_v34, %v1696_v34  ;;  %v3600_v48 = vmul.f32 -1.442695, %v1696_v34 }
 0xbf8   :  { %v1686_v24 = vcombine.high %v1685_v43, %v1685_v43 }
 0xbfa   :  { %v1701_v20 = vsel %vm704_vm3, %v1686_v24, %v1697_v15 }
 0xbfb   :  { %v3601_v49 = vmul.f32 -1.442695, %v1701_v20 }
 0xbfd   :  { %3812 = vpow2.f32 %v3601_v49  ;;  %v631_v49 = vadd.f32 %v4292_v10, %v4324_v33  ;;  %v1933_v10 = vld [vmem:[%s5022_s10 + $0x70] sm:$0xff]  ;;  %v1932_v33 = vld [vmem:[%s5022_s10 + $0x68] sm:$0xff] }
 0xbfe   :  { %3814 = vpow2.f32 %v3600_v48 }
 0xc0a   :  { %v3813_v50 = vpop.eup %3812 }
 0xc0b   :  { %v3815_v51 = vpop.eup %3814  ;;  %v1709_v52 = vadd.f32 1.0, %v3813_v50  ;;  %v640_v50 = vsel %vm639_vm5, %v631_v49, -inf }
 0xc0c   :  { %v1708_v53 = vadd.f32 1.0, %v3815_v51  ;;  %v4489_v51 = vld [vmem:[%s5015_s3] sm:$0x3] }
 0xc0d   :  { %3816 = vrcp.f32 %v1709_v52  ;;  %vm1902_vm6 = vcmp.gt.s32.totalorder %v4489_v51, 6  ;;  %vm2075_vm7 = vcmp.gt.s32.totalorder %v4489_v51, 7  ;;  %vm1556_vm8 = vcmp.gt.s32.totalorder %v4489_v51, 4 }
 0xc0e   :  { %3818 = vrcp.f32 %v1708_v53  ;;  %v3610_v52 = vsel %vm1902_vm6, 1.0, %v3922_v39  ;;  %v3616_v44 = vsel %vm2075_vm7, 1.0, %v3922_v39  ;;  %v1931_v53 = vld [vmem:[%s5022_s10 + $0x60] sm:$0xff]  ;;  %vm1729_vm9 = vcmp.gt.s32.totalorder %v4489_v51, 5 }
 0xc0f   :  { %v3717_v46 = vpack.i.bf16 %v3616_v44, %v3610_v52  ;;  %vm1210_vm10 = vcmp.gt.s32.totalorder %v4489_v51, 2  ;;  %vm1383_vm11 = vcmp.gt.s32.totalorder %v4489_v51, 3  ;;  %vm864_vm12 = vcmp.gt.s32.totalorder %v4489_v51, 0 }
 0xc10   :  { %vm1037_vm13 = vcmp.gt.s32.totalorder %v4489_v51, 1  ;;  %vm3547_vm6 = vcmask 1046534   ;;  %vm3549_vm7 = vcmask 1047559  }
 0xc1a   :  { %v3817_v54 = vpop.eup %3816 }
 0xc1b   :  { %v1715_v55 = vmul.f32 2.0, %v3817_v54  ;;  %v3819_v57 = vpop.eup %3818 }
 0xc1c   :  { %v1720_v60 = vmul.f32 %v3819_v57, %v1553_v27 }
 0xc1d   :  { %v3603_v56 = vadd.f32 -1.0, %v1715_v55  ;;  %v1929_v55 = vld [vmem:[%s5022_s10 + $0x50] sm:$0xff] }
 0xc1f   :  { %v1719_v58 = vsel %vm704_vm3, %v3603_v56, %v3817_v54  ;;  %v1930_v54 = vld [vmem:[%s5022_s10 + $0x58] sm:$0xff]  ;;  %v1928_v56 = vld [vmem:[%s5022_s10 + $0x48] sm:$0xff] }
 0xc20   :  { %v1721_v59 = vmul.f32 %v3819_v57, %v1719_v58  ;;  %v1927_v57 = vld [vmem:[%s5022_s10 + $0x40] sm:$0xff] }
 0xc22   :  { %1723 = vrot.lane.b32.xlu0 %v1721_v59, %s3924_s8  ;;  %v1925_v59 = vld [vmem:[%s5022_s10 + $0x30] sm:$0xff] }
 0xc26   :  { %510 = vrot.lane.b32.xlu0 %v496_v0, %s3923_s7  ;;  %v3925_v0 = vmov 0  }
 0xc27   :  { %3716 = vset.pattern.permute.xlu1 %v3925_v0  ;;  %3722 = vset.pattern.permute.xlu0 %v3925_v0 }
 0xc94   :  { %v1724_v61 = vpop.permute.xlu0 %1723 }
 0xc95   :  { %v4460_v62 = vadd.f32 %v1724_v61, %v1720_v60  ;;  %v1924_v60 = vld [vmem:[%s5022_s10 + $0x28] sm:$0xff]  ;;  %v1923_v61 = vld [vmem:[%s5022_s10 + $0x20] sm:$0xff] }
 0xc97   :  { %3820 = vtanh.f32 %v4460_v62 }
 0xc98   :  { %v511_v47 = vpop.permute.xlu0 %510 }
 0xc99   :  { %v520_v35 = vrot.slane %v511_v47, 2 }
 0xc9b   :  { %v529_v21 = vsel %vm522_vm2, %v511_v47, %v520_v35  ;;  %v1922_v47 = vld [vmem:[%s5022_s10 + $0x18] sm:$0xff]  ;;  %v1921_v35 = vld [vmem:[%s5022_s10 + $0x10] sm:$0xff] }
 0xc9c   :  { %545 = vst [vmem:[#allocation2 + $0x18] sm:$0xf] %v529_v21  ;;  %v1920_v21 = vld [vmem:[%s5022_s10 + $0x8] sm:$0xff] }
 0xca3   :  { %v1745_v26 = vld [vmem:[#allocation2 + $0x18] sm:$0xf] }
 0xca4   :  { %v3821_v22 = vpop.eup %3820 }
 0xca5   :  { %v4464_v40 = vmul.f32 %v3821_v22, %v1719_v58  ;;  %v1926_v58 = vld [vmem:[%s5022_s10 + $0x38] sm:$0xff]  ;;  %v1919_v22 = vld [vmem:[%s5022_s10] sm:$0xff] }
 0xca7   :  { %1763 = vrot.lane.b32.xlu1 %v4464_v40, %s3924_s8 }
 0xd19   :  { %v1764_v28 = vpop.permute.xlu1 %1763 }
 0xd1a   :  { %3605 = vmatmul.mubr.msk.f32.vlgmr.msra.gmra.mxu0 %vm725_vm4, %v1764_v28 }
 0xdda   :  { %v1833_v38 = vpop.f32.mrf.mxu0 }
 0xddc   :  { %v1835_v23 = vpop.f32.mrf.mxu0 }
 0xddd   :  { %v1840_v1 = vcombine.low %v1833_v38, %v1835_v23 }
 0xddf   :  { %v1847_v25 = vrot.slane %v1840_v1, %v4033_v9 }
 0xde1   :  { %v1849_v27 = vadd.f32 %v1847_v25, %v1745_v26 }
 0xde3   :  { %v1850_v29 = vmul.f32 2.0, %v1849_v27  ;;  %v1869_v32 = vrot.slane %v1849_v27, %v4033_v9 }
 0xde5   :  { %v1858_v42 = vrot.slane %v1850_v29, %v4033_v9  ;;  %v1870_v37 = vcombine.high %v1869_v32, %v1869_v32  ;;  %v3606_v45 = vmul.f32 -1.442695, %v1869_v32  ;;  %v643_v32 = vsel %vm639_vm5, %v4295_v12, -inf }
 0xde7   :  { %v1859_v16 = vcombine.high %v1858_v42, %v1858_v42 }
 0xde9   :  { %v1874_v41 = vsel %vm704_vm3, %v1859_v16, %v1870_v37 }
 0xdea   :  { %v3607_v63 = vmul.f32 -1.442695, %v1874_v41 }
 0xdec   :  { %3822 = vpow2.f32 %v3607_v63 }
 0xded   :  { %3824 = vpow2.f32 %v3606_v45 }
 0xdf9   :  { %v3823_v3 = vpop.eup %3822 }
 0xdfa   :  { %v3825_v6 = vpop.eup %3824  ;;  %v1882_v13 = vadd.f32 1.0, %v3823_v3 }
 0xdfb   :  { %v1881_v30 = vadd.f32 1.0, %v3825_v6 }
 0xdfc   :  { %3826 = vrcp.f32 %v1882_v13 }
 0xdfd   :  { %3828 = vrcp.f32 %v1881_v30 }
 0xe09   :  { %v3827_v34 = vpop.eup %3826 }
 0xe0a   :  { %v1888_v43 = vmul.f32 2.0, %v3827_v34  ;;  %v3829_v15 = vpop.eup %3828 }
 0xe0b   :  { %v1893_v28 = vmul.f32 %v3829_v15, %v4460_v62 }
 0xe0c   :  { %v3609_v24 = vadd.f32 -1.0, %v1888_v43 }
 0xe0e   :  { %v1892_v20 = vsel %vm704_vm3, %v3609_v24, %v3827_v34  ;;  %v3926_v34 = vmov 1  }
 0xe0f   :  { %v1894_v48 = vmul.f32 %v3829_v15, %v1892_v20 }
 0xe11   :  { %1896 = vrot.lane.b32.xlu1 %v1894_v48, %s3924_s8 }
 0xe15   :  { %512 = vrot.lane.b32.xlu1 %v497_v2, %s3923_s7  ;;  %v1934_v2 = vld [vmem:[%s5022_s10 + $0x78] sm:$0xff] }
 0xe16   :  { %1956 = vmatprep.subr.mxu1 %v1934_v2 }
 0xe17   :  { %1957 = vmatpush1.msra.mxu1 %v1933_v10 }
 0xe18   :  { %1958 = vmatprep.subr.mxu1 %v1932_v33 }
 0xe19   :  { %1959 = vmatpush1.msra.mxu1 %v1931_v53 }
 0xe1a   :  { %1960 = vmatprep.subr.mxu1 %v1930_v54 }
 0xe1b   :  { %1961 = vmatpush1.msra.mxu1 %v1929_v55 }
 0xe1c   :  { %1962 = vmatprep.subr.mxu1 %v1928_v56 }
 0xe1d   :  { %1963 = vmatpush1.msra.mxu1 %v1927_v57 }
 0xe1e   :  { %1964 = vmatprep.subr.mxu1 %v1926_v58 }
 0xe1f   :  { %1965 = vmatpush1.msra.mxu1 %v1925_v59 }
 0xe20   :  { %1966 = vmatprep.subr.mxu1 %v1924_v60 }
 0xe21   :  { %1967 = vmatpush1.msra.mxu1 %v1923_v61 }
 0xe22   :  { %1968 = vmatprep.subr.mxu1 %v1922_v47 }
 0xe23   :  { %1969 = vmatpush1.msra.mxu1 %v1921_v35 }
 0xe24   :  { %1970 = vmatprep.subr.mxu1 %v1920_v21 }
 0xe25   :  { %1971 = vmatpush1.msra.mxu1 %v1919_v22 }
 0xe39   :  { %641 = vmax.xlane.f32.xlu1 %v640_v50 }
 0xe4a   :  { %3718 = vperm.xlu1 %3716, %v3717_v46  }
 0xe4e   :  { %3738 = vset.pattern.permute.xlu1 %v3926_v34 }
 0xe83   :  { %v1897_v38 = vpop.permute.xlu1 %1896 }
 0xe84   :  { %v4544_v23 = vadd.f32 %v1897_v38, %v1893_v28  ;;  %v3598_v38 = vsel %vm1556_vm8, 1.0, %v3922_v39  ;;  %vm3552_vm8 = vcmask 15360  }
 0xe86   :  { %3830 = vtanh.f32 %v4544_v23 }
 0xe87   :  { %v513_v1 = vpop.permute.xlu1 %512 }
 0xe88   :  { %v521_v25 = vrot.slane %v513_v1, 2 }
 0xe8a   :  { %v530_v26 = vsel %vm522_vm2, %v513_v1, %v521_v25  ;;  %v3604_v1 = vsel %vm1729_vm9, 1.0, %v3922_v39  ;;  %vm3539_vm2 = vcmask 1042434  }
 0xe8b   :  { %546 = vst [vmem:[#allocation2 + $0x1c] sm:$0xf] %v530_v26  ;;  %v3723_v26 = vpack.i.bf16 %v3598_v38, %v3604_v1 }
 0xe92   :  { %v1918_v48 = vld [vmem:[#allocation2 + $0x1c] sm:$0xf] }
 0xe93   :  { %v3831_v27 = vpop.eup %3830 }
 0xe94   :  { %v4548_v29 = vmul.f32 %v3831_v27, %v1892_v20  ;;  %v3586_v27 = vsel %vm1210_vm10, 1.0, %v3922_v39 }
 0xe96   :  { %1936 = vrot.lane.b32.xlu0 %v4548_v29, %s3924_s8 }
 0xeb5   :  { %644 = vmax.xlane.f32.xlu0 %v643_v32  ;;  %v3592_v32 = vsel %vm1383_vm11, 1.0, %v3922_v39 }
 0xeb6   :  { %v3728_v18 = vpack.i.bf16 %v3586_v27, %v3592_v32  ;;  %v3932_v32 = vmov 6  }
 0xec2   :  { %v642_v62 = vpop.xlane.xlu1 %641 }
 0xec3   :  { %v646_v42 = vsub.f32 %v631_v49, %v642_v62  ;;  %v3574_v62 = vsel %vm864_vm12, 1.0, %v3922_v39 }
 0xec5   :  { %v648_v16 = vmul.f32 1.442695, %v646_v42  ;;  %v3580_v42 = vsel %vm1037_vm13, 1.0, %v3922_v39 }
 0xec7   :  { %3832 = vpow2.f32 %v648_v16  ;;  %v3719_v16 = vpop.permute.xlu1 %3718 }
 0xed4   :  { %v4554_v37 = vpop.eup %3832 }
 0xed5   :  { %v652_v41 = vsel %vm639_vm5, %v4554_v37, 0.0 }
 0xed6   :  { %653 = vadd.xlane.f32.xlu1 %v652_v41  ;;  %v3927_v41 = vmov 2  }
 0xf08   :  { %v1937_v45 = vpop.permute.xlu0 %1936 }
 0xf09   :  { %3611 = vmatmul.mubr.msk.f32.vlgmr.msra.gmra.mxu1 %vm725_vm4, %v1937_v45  ;;  %v3733_v45 = vpack.i.bf16 %v3574_v62, %v3580_v42  ;;  %v2651_v62 = vld [vmem:[%s5023_s11 + $0x18] sm:$0xff]  ;;  %v2650_v42 = vld [vmem:[%s5023_s11 + $0x10] sm:$0xff] }
 0xf3e   :  { %v645_v63 = vpop.xlane.xlu0 %644 }
 0xf3f   :  { %v647_v3 = vsub.f32 %v4295_v12, %v645_v63  ;;  %v3720_v63 = vunpack.i.l.bf16 %v3719_v16 }
 0xf41   :  { %v650_v6 = vmul.f32 1.442695, %v647_v3  ;;  %v1910_v3 = vmul.f32 %v3720_v63, %v4548_v29  ;;  %v2932_v63 = vld [vmem:[%s5014_s2] sm:$0xff] }
 0xf43   :  { %3834 = vpow2.f32 %v650_v6 }
 0xf50   :  { %v3835_v13 = vpop.eup %3834 }
 0xf51   :  { %v655_v30 = vsel %vm639_vm5, %v3835_v13, 0.0  ;;  %vm3545_vm5 = vcmask 1045509  }
 0xf52   :  { %656 = vadd.xlane.f32.xlu0 %v655_v30 }
 0xf5f   :  { %v654_v39 = vpop.xlane.xlu1 %653 }
 0xfc9   :  { %v2006_v43 = vpop.f32.mrf.mxu1 }
 0xfcb   :  { %v2008_v24 = vpop.f32.mrf.mxu1 }
 0xfcc   :  { %v2013_v15 = vcombine.low %v2006_v43, %v2008_v24 }
 0xfce   :  { %v2020_v20 = vrot.slane %v2013_v15, %v4033_v9 }
 0xfd0   :  { %v2022_v49 = vadd.f32 %v2020_v20, %v1918_v48 }
 0xfd2   :  { %v2023_v50 = vmul.f32 2.0, %v2022_v49  ;;  %v2042_v52 = vrot.slane %v2022_v49, %v4033_v9 }
 0xfd4   :  { %v2031_v12 = vrot.slane %v2023_v50, %v4033_v9  ;;  %v2043_v46 = vcombine.high %v2042_v52, %v2042_v52  ;;  %v3612_v2 = vmul.f32 -1.442695, %v2042_v52 }
 0xfd6   :  { %v2032_v44 = vcombine.high %v2031_v12, %v2031_v12  ;;  %3836 = vpow2.f32 %v3612_v2 }
 0xfd8   :  { %v2047_v10 = vsel %vm704_vm3, %v2032_v44, %v2043_v46  ;;  %v3928_v44 = vmov 269488144  }
 0xfd9   :  { %v3613_v33 = vmul.f32 -1.442695, %v2047_v10  ;;  %v2103_v46 = vunpack.c.l.s4 %v3928_v44 }
 0xfdb   :  { %3838 = vpow2.f32 %v3613_v33  ;;  %v657_v53 = vpop.xlane.xlu0 %656  ;;  %v2104_v10 = vunpack.c.0.s8 %v2103_v46 }
 0xfdc   :  { %3840 = vrcp.f32 %v657_v53 }
 0xfe3   :  { %v3837_v54 = vpop.eup %3836 }
 0xfe4   :  { %v2054_v59 = vadd.f32 1.0, %v3837_v54 }
 0xfe8   :  { %v3839_v55 = vpop.eup %3838 }
 0xfe9   :  { %v3841_v56 = vpop.eup %3840  ;;  %v2055_v57 = vadd.f32 1.0, %v3839_v55 }
 0xfea   :  { %v661_v58 = vmul.f32 %v3841_v56, %v3835_v13  ;;  %v4627_v56 = vsub.s32 %v2104_v10, %v4027_v5 }
 0xfeb   :  { %3842 = vrcp.f32 %v2055_v57 }
 0xfec   :  { %v681_v60 = vcombine.high %v661_v58, %v661_v58  ;;  %3844 = vrcp.f32 %v2054_v59  ;;  %v4603_v48 = vrot.slane %v661_v58, %v4033_v9 }
 0xfed   :  { %3846 = vrcp.f32 %v654_v39  ;;  %v3096_v39 = vrot.slane %v2932_v63, 7 }
 0xfee   :  { %v4568_v61 = vrot.slane %v681_v60, %v4033_v9 }
 0xff0   :  { %2273 = vperm.xlu1 %3738, %v4568_v61   ;;  %v4595_v51 = vcombine.high %v4568_v61, %v4568_v61 }
 0xff4   :  { %3739 = vset.pattern.permute.xlu1 %v3927_v41 }
 0xff8   :  { %v3843_v47 = vpop.eup %3842 }
 0xff9   :  { %v2061_v35 = vmul.f32 2.0, %v3843_v47  ;;  %v3845_v22 = vpop.eup %3844 }
 0xffa   :  { %v2066_v13 = vmul.f32 %v3845_v22, %v4544_v23  ;;  %v3847_v30 = vpop.eup %3846  ;;  %v4611_v23 = vcombine.high %v4603_v48, %v4603_v48 }
 0xffb   :  { %v3615_v21 = vadd.f32 -1.0, %v2061_v35  ;;  %v4600_v20 = vmul.f32 %v3847_v30, %v4554_v37  ;;  %v3929_v35 = vmov 3  }
 0xffd   :  { %v4575_v28 = vsel %vm704_vm3, %v3615_v21, %v3843_v47  ;;  %v664_v37 = vcombine.high %v4600_v20, %v4600_v20  ;;  %v671_v38 = vrot.slane %v4600_v20, %v4033_v9  ;;  %vm3541_vm3 = vcmask 1043459  }
 0xffe   :  { %v2067_v25 = vmul.f32 %v3845_v22, %v4575_v28 }
0x1000   :  { %2069 = vrot.lane.b32.xlu0 %v2067_v25, %s3924_s8  ;;  %v679_v25 = vcombine.high %v671_v38, %v671_v38 }
0x1004   :  { %3724 = vperm.xlu0 %3722, %v3723_v26   ;;  %v3931_v26 = vmov 5  }
0x1008   :  { %3729 = vperm.xlu0 %3722, %v3728_v18   ;;  %v2653_v18 = vld [vmem:[%s5023_s11 + $0x28] sm:$0xff] }
0x100c   :  { %3734 = vperm.xlu0 %3722, %v3733_v45   ;;  %v2648_v45 = vld [vmem:[%s5023_s11] sm:$0xff] }
0x1010   :  { %1912 = vrot.lane.b32.xlu0 %v1910_v3, %s3924_s8 }
0x1014   :  { %2165 = vperm.xlu0 %3722, %v4568_v61  }
0x1018   :  { %2176 = vperm.xlu0 %3722, %v4595_v51  }
0x1072   :  { %v2070_v6 = vpop.permute.xlu0 %2069 }
0x1073   :  { %v2072_v43 = vadd.f32 %v2070_v6, %v2066_v13  ;;  %v3099_v6 = vsel %vm3098_vm15, 0.0, %v3096_v39 }
0x1074   :  { %v3101_v13 = vcombine.high %v3099_v6, %v3099_v6  ;;  %v3108_v30 = vrot.slane %v3099_v6, %v4033_v9 }
0x1075   :  { %3848 = vtanh.f32 %v2072_v43  ;;  %v2934_v43 = vcombine.high %v2932_v63, %v2932_v63 }
0x107f   :  { %v3725_v24 = vpop.permute.xlu0 %3724 }
0x1080   :  { %v3727_v15 = vunpack.i.h.bf16 %v3725_v24  ;;  %v3726_v29 = vunpack.i.l.bf16 %v3725_v24  ;;  %v3115_v24 = vrot.slane %v3101_v13, %v4033_v9  ;;  %v4762_v13 = vsub.s32 7, %v4027_v5 }
0x1082   :  { %v1564_v49 = vmul.f32 %v3727_v15, %v4442_v36  ;;  %v1737_v50 = vmul.f32 %v3726_v29, %v4464_v40  ;;  %v678_v40 = vrot.slane %v664_v37, %v4033_v9  ;;  %v3849_v55 = vpop.eup %3848  ;;  %v3116_v15 = vcombine.high %v3108_v30, %v3108_v30 }
0x1083   :  { %v3730_v52 = vpop.permute.xlu0 %3729  ;;  %v2074_v59 = vmul.f32 %v3849_v55, %v4575_v28  ;;  %v3930_v28 = vmov 4   ;;  %v2941_v29 = vrot.slane %v2932_v63, %v4033_v9 }
0x1084   :  { %1566 = vrot.lane.b32.xlu1 %v1564_v49, %s3924_s8  ;;  %1739 = vrot.lane.b32.xlu0 %v1737_v50, %s3924_s8  ;;  %v3731_v36 = vunpack.i.l.bf16 %v3730_v52  ;;  %v4624_v53 = vcombine.high %v678_v40, %v678_v40  ;;  %v3732_v21 = vunpack.i.h.bf16 %v3730_v52  ;;  %v3118_v49 = vcombine.low %v3108_v30, %v3116_v15 }
0x1085   :  { %v2948_v50 = vrot.slane %v2934_v43, %v4033_v9  ;;  %v2949_v46 = vcombine.high %v2941_v29, %v2941_v29 }
0x1086   :  { %v1391_v33 = vmul.f32 %v3731_v36, %v4408_v17  ;;  %v3721_v17 = vunpack.i.h.bf16 %v3719_v16  ;;  %v1218_v22 = vmul.f32 %v3732_v21, %v4374_v11  ;;  %v2274_v16 = vpop.permute.xlu1 %2273 }
0x1087   :  { %v4615_v12 = vpop.permute.xlu0 %3734  ;;  %v2282_v20 = vrot.slane %v2274_v16, %v4627_v56 }
0x1088   :  { %2373 = vperm.xlu1 %3739, %v4568_v61   ;;  %2154 = vperm.xlu0 %3722, %v4611_v23   ;;  %v2083_v47 = vmul.f32 %v3721_v17, %v2074_v59  ;;  %v3736_v11 = vunpack.i.l.bf16 %v4615_v12 }
0x108a   :  { %v1045_v1 = vmul.f32 %v3736_v11, %v4339_v31  ;;  %v3737_v31 = vunpack.i.h.bf16 %v4615_v12  ;;  %v3126_v12 = vrot.slane %v3118_v49, %v4033_v9 }
0x108b   :  { %v1913_v2 = vpop.permute.xlu0 %1912 }
0x108c   :  { %1916 = vst.msk [vmem:[#allocation3 + $0xc] sm:$0x3] %vm877_vm14, %v1913_v2  ;;  %2384 = vperm.xlu1 %3739, %v4595_v51   ;;  %2143 = vperm.xlu0 %3722, %v4603_v48   ;;  %v872_v27 = vmul.f32 %v3737_v31, %v4297_v19  ;;  %v2655_v19 = vld [vmem:[%s5023_s11 + $0x38] sm:$0xff]  ;;  %v2950_v2 = vcombine.high %v2948_v50, %v2948_v50 }
0x108d   :  { %3677 = vmatprep.subr.mxu0 %v2655_v19 }
0x108e   :  { %3678 = vmatpush3.msra.mxu0 %v2655_v19 }
0x108f   :  { %v2166_v54 = vpop.permute.xlu0 %2165 }
0x1090   :  { %1393 = vrot.lane.b32.xlu1 %v1391_v33, %s3924_s8  ;;  %2132 = vperm.xlu0 %3722, %v4624_v53   ;;  %v2174_v57 = vrot.slane %v2166_v54, %v4627_v56  ;;  %v4719_v54 = vsub.s32 4, %v4027_v5 }
0x1091   :  { %3740 = vset.pattern.permute.xlu1 %v3926_v34 }
0x1093   :  { %v2096_v58 = vld [vmem:[#allocation3 + $0xc] sm:$0x3] }
0x1094   :  { %v2192_v60 = vmul.f32 %v2174_v57, %v2096_v58  ;;  %2251 = vperm.xlu1 %3740, %v4603_v48   ;;  %3742 = vset.pattern.permute.xlu0 %v3927_v41  ;;  %v2951_v57 = vcombine.low %v2941_v29, %v2949_v46 }
0x1095   :  { %2362 = vperm.xlu0 %3742, %v4611_v23  }
0x1096   :  { %2200 = vst.msk [vmem:[#allocation4 + $0xc] sm:$0x3] %vm877_vm14, %v2192_v60 }
0x1098   :  { %3741 = vset.pattern.permute.xlu1 %v3929_v35 }
0x1099   :  { %2457 = vperm.xlu1 %3741, %v4568_v61   ;;  %2085 = vrot.lane.b32.xlu0 %v2083_v47, %s3924_s8  ;;  %v2952_v47 = vcombine.low %v2948_v50, %v2950_v2 }
0x109b   :  { %v2966_v19 = vrot.slane %v2952_v47, %v4033_v9 }
0x109d   :  { %2468 = vperm.xlu1 %3741, %v4595_v51   ;;  %2351 = vperm.xlu0 %3742, %v4603_v48   ;;  %v2208_v44 = vld [vmem:[#allocation4 + $0xc] sm:$0x3] }
0x10a1   :  { %1220 = vrot.lane.b32.xlu1 %v1218_v22, %s3924_s8  ;;  %3744 = vset.pattern.permute.xlu0 %v3926_v34 }
0x10a2   :  { %2284 = vperm.xlu0 %3744, %v4595_v51   ;;  %3743 = vset.pattern.permute.xlu1 %v3926_v34 }
0x10a5   :  { %2240 = vperm.xlu1 %3743, %v4624_v53  }
0x10a6   :  { %2262 = vperm.xlu0 %3744, %v4611_v23  }
0x10a9   :  { %3745 = vset.pattern.permute.xlu1 %v3929_v35 }
0x10aa   :  { %2446 = vperm.xlu1 %3745, %v4611_v23   ;;  %2229 = vperm.xlu0 %3744, %v678_v40  }
0x10ae   :  { %3746 = vset.pattern.permute.xlu1 %v3930_v28  ;;  %3748 = vset.pattern.permute.xlu0 %v3930_v28 }
0x10af   :  { %2525 = vperm.xlu1 %3746, %v4568_v61   ;;  %2536 = vperm.xlu0 %3748, %v4595_v51  }
0x10b3   :  { %3747 = vset.pattern.permute.xlu1 %v3925_v0  ;;  %2514 = vperm.xlu0 %3748, %v4611_v23  }
0x10b4   :  { %2121 = vperm.xlu1 %3747, %v678_v40  }
0x10b7   :  { %3752 = vset.pattern.permute.xlu0 %v3925_v0 }
0x10b8   :  { %1047 = vrot.lane.b32.xlu1 %v1045_v1, %s3924_s8  ;;  %2110 = vperm.xlu0 %3752, %v679_v25   ;;  %v4737_v1 = vsub.s32 6, %v4027_v5 }
0x10b9   :  { %3749 = vset.pattern.permute.xlu1 %v3927_v41 }
0x10bc   :  { %2340 = vperm.xlu1 %3749, %v4624_v53   ;;  %3754 = vset.pattern.permute.xlu0 %v3927_v41  ;;  %v4698_v41 = vpop.permute.xlu0 %2176 }
0x10bd   :  { %2329 = vperm.xlu0 %3754, %v678_v40  }
0x10c0   :  { %3750 = vset.pattern.permute.xlu1 %v3929_v35 }
0x10c1   :  { %2435 = vperm.xlu1 %3750, %v4603_v48   ;;  %3757 = vset.pattern.permute.xlu0 %v3931_v26 }
0x10c2   :  { %2566 = vperm.xlu0 %3757, %v4611_v23  }
0x10c5   :  { %3751 = vset.pattern.permute.xlu1 %v3931_v26 }
0x10c6   :  { %2577 = vperm.xlu1 %3751, %v4568_v61   ;;  %3759 = vset.pattern.permute.xlu0 %v3925_v0 }
0x10c7   :  { %2099 = vperm.xlu0 %3759, %v671_v38   ;;  %v4734_v38 = vsub.s32 3, %v4027_v5 }
0x10ca   :  { %2588 = vperm.xlu1 %3751, %v4595_v51  }
0x10ce   :  { %874 = vrot.lane.b32.xlu1 %v872_v27, %s3924_s8 }
0x10cf   :  { %3753 = vset.pattern.permute.xlu1 %v3926_v34  ;;  %v2654_v34 = vld [vmem:[%s5023_s11 + $0x30] sm:$0xff] }
0x10d0   :  { %3679 = vmatprep.subr.mxu0 %v2654_v34 }
0x10d1   :  { %3680 = vmatpush3.msra.mxu0 %v2654_v34 }
0x10d2   :  { %2218 = vperm.xlu1 %3753, %v679_v25   ;;  %3681 = vmatprep.subr.mxu0 %v2653_v18 }
0x10d3   :  { %3682 = vmatpush3.msra.mxu0 %v2653_v18 }
0x10d6   :  { %3755 = vset.pattern.permute.xlu1 %v3929_v35 }
0x10d7   :  { %2424 = vperm.xlu1 %3755, %v4624_v53  }
0x10db   :  { %3756 = vset.pattern.permute.xlu1 %v3930_v28 }
0x10dc   :  { %2503 = vperm.xlu1 %3756, %v4603_v48   ;;  %v3117_v48 = vcombine.high %v3115_v24, %v3115_v24 }
0x10de   :  { %v3119_v37 = vcombine.low %v3115_v24, %v3117_v48 }
0x10e0   :  { %3758 = vset.pattern.permute.xlu1 %v3932_v32  ;;  %v3133_v40 = vrot.slane %v3119_v37, %v4033_v9  ;;  %v2959_v32 = vrot.slane %v2951_v57, %v4033_v9 }
0x10e1   :  { %2613 = vperm.xlu1 %3758, %v4568_v61   ;;  %v2652_v61 = vld [vmem:[%s5023_s11 + $0x20] sm:$0xff] }
0x10e2   :  { %3683 = vmatprep.subr.mxu0 %v2652_v61  ;;  %v4716_v53 = vcombine.low %v3126_v12, %v3133_v40  ;;  %v4753_v63 = vcombine.low %v2959_v32, %v2966_v19  ;;  %v4800_v32 = vld [vmem:[%s5013_s1] sm:$0xff] }
0x10e3   :  { %3684 = vmatpush3.msra.mxu0 %v2652_v61 }
0x10e4   :  { %3685 = vmatprep.subr.mxu0 %v2651_v62  ;;  %v3138_v60 = vrot.slane %v4716_v53, %v4199_v4  ;;  %v3152_v17 = vrot.slane %v4716_v53, %v4205_v7  ;;  %v3145_v28 = vrot.slane %v4716_v53, %v4208_v8  ;;  %v3166_v11 = vrot.slane %v4716_v53, %v4719_v54 }
0x10e5   :  { %2624 = vperm.xlu1 %3758, %v4595_v51   ;;  %3686 = vmatpush3.msra.mxu0 %v2651_v62  ;;  %v3180_v16 = vrot.slane %v4716_v53, %v4737_v1  ;;  %v2971_v6 = vrot.slane %v4753_v63, %v4199_v4  ;;  %v2985_v37 = vrot.slane %v4753_v63, %v4205_v7 }
0x10e6   :  { %3687 = vmatprep.subr.mxu0 %v2650_v42  ;;  %3154 = vbcast.lane.b32.xlu0 %v3152_v17, 256  ;;  %v2992_v17 = vrot.slane %v4753_v63, %v4734_v38  ;;  %v3013_v47 = vrot.slane %v4753_v63, %v4737_v1 }
0x10e7   :  { %3688 = vmatpush3.msra.mxu0 %v2650_v42 }
0x10e9   :  { %3760 = vset.pattern.permute.xlu1 %v3925_v0  ;;  %v2649_v0 = vld [vmem:[%s5023_s11 + $0x8] sm:$0xff] }
0x10ea   :  { %3689 = vmatprep.subr.mxu0 %v2649_v0  ;;  %3140 = vbcast.lane.b32.xlu1 %v3138_v60, 256 }
0x10eb   :  { %3690 = vmatpush3.msra.mxu0 %v2649_v0  ;;  %3168 = vbcast.lane.b32.xlu0 %v3166_v11, 256  ;;  %v3159_v0 = vrot.slane %v4716_v53, %v4734_v38 }
0x10ec   :  { %3691 = vmatprep.subr.mxu0 %v2648_v45 }
0x10ed   :  { %3692 = vmatpush3.msra.mxu0 %v2648_v45  ;;  %v4751_v45 = vsub.s32 5, %v4027_v5 }
0x10ee   :  { %3147 = vbcast.lane.b32.xlu1 %v3145_v28, 256 }
0x10ef   :  { %3182 = vbcast.lane.b32.xlu0 %v3180_v16, 256  ;;  %v3173_v39 = vrot.slane %v4716_v53, %v4751_v45  ;;  %v3006_v11 = vrot.slane %v4753_v63, %v4751_v45 }
0x10f2   :  { %3161 = vbcast.lane.b32.xlu1 %v3159_v0, 256 }
0x10f3   :  { %2973 = vbcast.lane.b32.xlu0 %v2971_v6, 256 }
0x10f6   :  { %v1567_v3 = vpop.permute.xlu1 %1566  ;;  %v1740_v51 = vpop.permute.xlu0 %1739  ;;  %3175 = vbcast.lane.b32.xlu1 %v3173_v39, 256 }
0x10f7   :  { %1570 = vst.msk [vmem:[#allocation3 + $0x8] sm:$0x3] %vm877_vm14, %v1567_v3  ;;  %1743 = vst.msk [vmem:[#allocation3 + $0xa] sm:$0x3] %vm877_vm14, %v1740_v51  ;;  %2987 = vbcast.lane.b32.xlu0 %v2985_v37, 256 }
0x10fe   :  { %v2215_v52 = vld [vmem:[#allocation3 + $0xa] sm:$0x3]  ;;  %v2326_v25 = vld [vmem:[#allocation3 + $0x8] sm:$0x3] }
0x10ff   :  { %v2299_v23 = vmul.f32 %v2282_v20, %v2215_v52  ;;  %v2095_v59 = vld [vmem:[#allocation3 + $0xa] sm:$0x3]  ;;  %v2094_v27 = vld [vmem:[#allocation3 + $0x8] sm:$0x3] }
0x1101   :  { %v2306_v36 = vadd.f32 %v2299_v23, %v2208_v44  ;;  %v3187_v23 = vrot.slane %v4716_v53, %v4762_v13  ;;  %v2999_v53 = vrot.slane %v4753_v63, %v4719_v54 }
0x1103   :  { %2313 = vst.msk [vmem:[#allocation4 + $0xc] sm:$0x3] %vm877_vm14, %v2306_v36  ;;  %v2374_v10 = vpop.permute.xlu1 %2373  ;;  %v2155_v33 = vpop.permute.xlu0 %2154  ;;  %3189 = vbcast.lane.b32.xlu1 %v3187_v23, 256  ;;  %3001 = vbcast.lane.b32.xlu0 %v2999_v53, 256 }
0x1104   :  { %v2163_v55 = vrot.slane %v2155_v33, %v4627_v56  ;;  %v2382_v58 = vrot.slane %v2374_v10, %v4627_v56  ;;  %v2978_v33 = vrot.slane %v4753_v63, %v4208_v8 }
0x1106   :  { %v2191_v35 = vmul.f32 %v2163_v55, %v2095_v59  ;;  %v2398_v31 = vmul.f32 %v2382_v58, %v2326_v25  ;;  %v2185_v55 = vrot.slane %v4698_v41, %v4627_v56  ;;  %v3020_v25 = vrot.slane %v4753_v63, %v4762_v13 }
0x1107   :  { %v4727_v21 = vpop.permute.xlu1 %2384  ;;  %v2144_v22 = vpop.permute.xlu0 %2143  ;;  %2980 = vbcast.lane.b32.xlu1 %v2978_v33, 256  ;;  %3015 = vbcast.lane.b32.xlu0 %v3013_v47, 256 }
0x1108   :  { %2199 = vst.msk [vmem:[#allocation4 + $0xa] sm:$0x3] %vm877_vm14, %v2191_v35  ;;  %v2152_v26 = vrot.slane %v2144_v22, %v4627_v56 }
0x110a   :  { %v2320_v34 = vld [vmem:[#allocation4 + $0xc] sm:$0x3]  ;;  %v2190_v18 = vmul.f32 %v2152_v26, %v2094_v27  ;;  %v2214_v27 = vld [vmem:[#allocation3 + $0x8] sm:$0x3] }
0x110b   :  { %v2404_v61 = vadd.f32 %v2398_v31, %v2320_v34  ;;  %v1394_v62 = vpop.permute.xlu1 %1393  ;;  %v2133_v42 = vpop.permute.xlu0 %2132  ;;  %2994 = vbcast.lane.b32.xlu1 %v2992_v17, 256  ;;  %v2216_v34 = vld [vmem:[#allocation3 + $0xc] sm:$0x3]  ;;  %3022 = vbcast.lane.b32.xlu0 %v3020_v25, 256 }
0x110c   :  { %2198 = vst.msk [vmem:[#allocation4 + $0x8] sm:$0x3] %vm877_vm14, %v2190_v18  ;;  %1397 = vst.msk [vmem:[#allocation3 + $0x6] sm:$0x3] %vm877_vm14, %v1394_v62  ;;  %v2141_v30 = vrot.slane %v2133_v42, %v4627_v56 }
0x110d   :  { %2410 = vst.msk [vmem:[#allocation4 + $0xc] sm:$0x3] %vm877_vm14, %v2404_v61 }
0x110f   :  { %v2252_v3 = vpop.permute.xlu1 %2251  ;;  %3008 = vbcast.lane.b32.xlu1 %v3006_v11, 256  ;;  %v2422_v11 = vld [vmem:[#allocation3 + $0x8] sm:$0x3] }
0x1110   :  { %v4755_v51 = vpop.permute.xlu0 %2362  ;;  %v2260_v43 = vrot.slane %v2252_v3, %v4627_v56  ;;  %v2207_v3 = vld [vmem:[#allocation4 + $0xa] sm:$0x3] }
0x1113   :  { %v2093_v24 = vld [vmem:[#allocation3 + $0x6] sm:$0x3]  ;;  %v2206_v50 = vld [vmem:[#allocation4 + $0x8] sm:$0x3] }
0x1114   :  { %v2213_v15 = vld [vmem:[#allocation3 + $0x6] sm:$0x3]  ;;  %v2189_v29 = vmul.f32 %v2141_v30, %v2093_v24  ;;  %v2458_v48 = vpop.permute.xlu1 %2457  ;;  %v2086_v49 = vpop.permute.xlu0 %2085  ;;  %v2416_v36 = vld [vmem:[#allocation4 + $0xc] sm:$0x3]  ;;  %v3411_v24 = vrot.slane %v4800_v32, %v4208_v8  ;;  %v3418_v8 = vrot.slane %v4800_v32, %v4205_v7 }
0x1115   :  { %v2297_v20 = vmul.f32 %v2260_v43, %v2213_v15  ;;  %v2466_v52 = vrot.slane %v2458_v48, %v4627_v56  ;;  %2089 = vst.msk [vmem:[#allocation3 + $0xe] sm:$0x3] %vm877_vm14, %v2086_v49  ;;  %v2421_v44 = vld [vmem:[#allocation3 + $0x6] sm:$0x3]  ;;  %v3621_v48 = vld [vmem:[#allocation5] ss:$0 sm:$0xff]  ;;  %v2371_v49 = vrot.slane %v4755_v51, %v4627_v56  ;;  %v3425_v51 = vrot.slane %v4800_v32, %v4734_v38 }
0x1116   :  { %2197 = vst.msk [vmem:[#allocation4 + $0x6] sm:$0x3] %vm877_vm14, %v2189_v29  ;;  %3413 = vbcast.lane.b32.xlu0 %v3411_v24, 256  ;;  %2921 = vperm.xlu1 %3760, %v3621_v48   ;;  %v2325_v23 = vld [vmem:[#allocation3 + $0x6] sm:$0x3] }
0x1117   :  { %v2304_v12 = vadd.f32 %v2297_v20, %v2206_v50  ;;  %v2481_v46 = vmul.f32 %v2466_v52, %v2421_v44  ;;  %v2393_v52 = vrot.slane %v4727_v21, %v4627_v56 }
0x1118   :  { %v4774_v40 = vpop.permute.xlu1 %2468  ;;  %v2352_v2 = vpop.permute.xlu0 %2351 }
0x1119   :  { %2311 = vst.msk [vmem:[#allocation4 + $0x8] sm:$0x3] %vm877_vm14, %v2304_v12  ;;  %v2486_v10 = vadd.f32 %v2481_v46, %v2416_v36  ;;  %v2360_v26 = vrot.slane %v2352_v2, %v4627_v56  ;;  %v2327_v36 = vld [vmem:[#allocation3 + $0xa] sm:$0x3]  ;;  %v2397_v2 = vmul.f32 %v2371_v49, %v2325_v23 }
0x111a   :  { %3420 = vbcast.lane.b32.xlu0 %v3418_v8, 256  ;;  %v2399_v33 = vmul.f32 %v2393_v52, %v2327_v36 }
0x111b   :  { %2491 = vst.msk [vmem:[#allocation4 + $0xc] sm:$0x3] %vm877_vm14, %v2486_v10 }
0x111c   :  { %v1221_v57 = vpop.permute.xlu1 %1220  ;;  %v2097_v58 = vld [vmem:[#allocation3 + $0xe] sm:$0x3] }
0x111d   :  { %1224 = vst.msk [vmem:[#allocation3 + $0x4] sm:$0x3] %vm877_vm14, %v1221_v57  ;;  %v2193_v59 = vmul.f32 %v2185_v55, %v2097_v58  ;;  %v2285_v60 = vpop.permute.xlu0 %2284  ;;  %v2205_v0 = vld [vmem:[#allocation4 + $0x6] sm:$0x3] }
0x111e   :  { %v2293_v41 = vrot.slane %v2285_v60, %v4627_v56  ;;  %3427 = vbcast.lane.b32.xlu0 %v3425_v51, 256 }
0x111f   :  { %2201 = vst.msk [vmem:[#allocation4 + $0xe] sm:$0x3] %vm877_vm14, %v2193_v59 }
0x1120   :  { %v2241_v35 = vpop.permute.xlu1 %2240  ;;  %v2300_v42 = vmul.f32 %v2293_v41, %v2216_v34  ;;  %v2318_v43 = vld [vmem:[#allocation4 + $0x8] sm:$0x3]  ;;  %v2477_v41 = vrot.slane %v4774_v40, %v4627_v56 }
0x1121   :  { %v2263_v22 = vpop.permute.xlu0 %2262  ;;  %v2249_v31 = vrot.slane %v2241_v35, %v4627_v56 }
0x1122   :  { %v2271_v28 = vrot.slane %v2263_v22, %v4627_v56  ;;  %v2496_v10 = vld [vmem:[#allocation4 + $0xc] sm:$0x3] }
0x1124   :  { %v2324_v19 = vld [vmem:[#allocation3 + $0x4] sm:$0x3]  ;;  %v2298_v61 = vmul.f32 %v2271_v28, %v2214_v27 }
0x1125   :  { %v2212_v18 = vld [vmem:[#allocation3 + $0x4] sm:$0x3]  ;;  %v2396_v62 = vmul.f32 %v2360_v26, %v2324_v19  ;;  %v2447_v63 = vpop.permute.xlu1 %2446  ;;  %v4802_v30 = vpop.permute.xlu0 %2229 }
0x1126   :  { %v2296_v16 = vmul.f32 %v2249_v31, %v2212_v18  ;;  %v2209_v39 = vld [vmem:[#allocation4 + $0xe] sm:$0x3]  ;;  %v2305_v6 = vadd.f32 %v2298_v61, %v2207_v3  ;;  %v2500_v12 = vld [vmem:[#allocation3 + $0x4] sm:$0x3]  ;;  %v2455_v35 = vrot.slane %v2447_v63, %v4627_v56  ;;  %v2482_v31 = vmul.f32 %v2477_v41, %v2422_v11 }
0x1127   :  { %v2307_v15 = vadd.f32 %v2300_v42, %v2209_v39  ;;  %v2402_v20 = vadd.f32 %v2396_v62, %v2318_v43  ;;  %v2092_v60 = vld [vmem:[#allocation3 + $0x4] sm:$0x3]  ;;  %v2238_v18 = vrot.slane %v4802_v30, %v4627_v56 }
0x1128   :  { %v2303_v29 = vadd.f32 %v2296_v16, %v2205_v0  ;;  %2312 = vst.msk [vmem:[#allocation4 + $0xa] sm:$0x3] %vm877_vm14, %v2305_v6  ;;  %v2420_v22 = vld [vmem:[#allocation3 + $0x4] sm:$0x3] }
0x1129   :  { %2314 = vst.msk [vmem:[#allocation4 + $0xe] sm:$0x3] %vm877_vm14, %v2307_v15  ;;  %2408 = vst.msk [vmem:[#allocation4 + $0x8] sm:$0x3] %vm877_vm14, %v2402_v20  ;;  %v2480_v25 = vmul.f32 %v2455_v35, %v2420_v22 }
0x112a   :  { %2310 = vst.msk [vmem:[#allocation4 + $0x6] sm:$0x3] %vm877_vm14, %v2303_v29  ;;  %v2526_v50 = vpop.permute.xlu1 %2525  ;;  %v4817_v44 = vpop.permute.xlu0 %2536 }
0x112b   :  { %v2534_v37 = vrot.slane %v2526_v50, %v4627_v56  ;;  %v2545_v20 = vrot.slane %v4817_v44, %v4627_v56 }
0x112d   :  { %v2548_v46 = vmul.f32 %v2534_v37, %v2500_v12 }
0x112e   :  { %v2515_v17 = vpop.permute.xlu0 %2514 }
0x112f   :  { %v2319_v53 = vld [vmem:[#allocation4 + $0xa] sm:$0x3]  ;;  %v2552_v7 = vadd.f32 %v2548_v46, %v2496_v10  ;;  %v2122_v55 = vpop.permute.xlu1 %2121  ;;  %v2523_v8 = vrot.slane %v2515_v17, %v4627_v56  ;;  %v2501_v46 = vld [vmem:[#allocation3 + $0x6] sm:$0x3] }
0x1130   :  { %v2321_v57 = vld [vmem:[#allocation4 + $0xe] sm:$0x3]  ;;  %v2403_v21 = vadd.f32 %v2397_v2, %v2319_v53  ;;  %v2130_v58 = vrot.slane %v2122_v55, %v4627_v56  ;;  %v2414_v52 = vld [vmem:[#allocation4 + $0x8] sm:$0x3]  ;;  %v2549_v44 = vmul.f32 %v2545_v20, %v2501_v46 }
0x1131   :  { %v2405_v59 = vadd.f32 %v2399_v33, %v2321_v57  ;;  %2556 = vst.msk [vmem:[#allocation4 + $0xc] sm:$0x3] %vm877_vm14, %v2552_v7  ;;  %v2317_v15 = vld [vmem:[#allocation4 + $0x6] sm:$0x3] }
0x1132   :  { %2409 = vst.msk [vmem:[#allocation4 + $0xa] sm:$0x3] %vm877_vm14, %v2403_v21  ;;  %v2188_v47 = vmul.f32 %v2130_v58, %v2092_v60 }
0x1133   :  { %2411 = vst.msk [vmem:[#allocation4 + $0xe] sm:$0x3] %vm877_vm14, %v2405_v59  ;;  %v1048_v38 = vpop.permute.xlu1 %1047  ;;  %v2111_v26 = vpop.permute.xlu0 %2110 }
0x1134   :  { %2196 = vst.msk [vmem:[#allocation4 + $0x4] sm:$0x3] %vm877_vm14, %v2188_v47  ;;  %1051 = vst.msk [vmem:[#allocation3 + $0x2] sm:$0x3] %vm877_vm14, %v1048_v38  ;;  %v2119_v42 = vrot.slane %v2111_v26, %v4627_v56  ;;  %v2564_v47 = vld [vmem:[#allocation3 + $0x4] sm:$0x3] }
0x1137   :  { %v2341_v28 = vpop.permute.xlu1 %2340 }
0x1138   :  { %v2349_v0 = vrot.slane %v2341_v28, %v4627_v56  ;;  %v2330_v23 = vpop.permute.xlu0 %2329  ;;  %v2560_v57 = vld [vmem:[#allocation4 + $0xc] sm:$0x3] }
0x1139   :  { %v2415_v27 = vld [vmem:[#allocation4 + $0xa] sm:$0x3]  ;;  %v2338_v11 = vrot.slane %v2330_v23, %v4627_v56 }
0x113a   :  { %v2417_v19 = vld [vmem:[#allocation4 + $0xe] sm:$0x3]  ;;  %v2485_v34 = vadd.f32 %v2480_v25, %v2415_v27 }
0x113b   :  { %v2487_v61 = vadd.f32 %v2482_v31, %v2417_v19  ;;  %v2211_v62 = vld [vmem:[#allocation3 + $0x2] sm:$0x3]  ;;  %v2204_v39 = vld [vmem:[#allocation4 + $0x4] sm:$0x3] }
0x113c   :  { %2490 = vst.msk [vmem:[#allocation4 + $0xa] sm:$0x3] %vm877_vm14, %v2485_v34  ;;  %v2295_v40 = vmul.f32 %v2238_v18, %v2211_v62  ;;  %v2091_v16 = vld [vmem:[#allocation3 + $0x2] sm:$0x3]  ;;  %v2436_v63 = vpop.permute.xlu1 %2435 }
0x113d   :  { %v2323_v3 = vld [vmem:[#allocation3 + $0x2] sm:$0x3]  ;;  %2492 = vst.msk [vmem:[#allocation4 + $0xe] sm:$0x3] %vm877_vm14, %v2487_v61  ;;  %v2187_v6 = vmul.f32 %v2119_v42, %v2091_v16  ;;  %v2444_v24 = vrot.slane %v2436_v63, %v4627_v56  ;;  %v2567_v59 = vpop.permute.xlu0 %2566 }
0x113e   :  { %v2395_v43 = vmul.f32 %v2349_v0, %v2323_v3  ;;  %v2302_v30 = vadd.f32 %v2295_v40, %v2204_v39  ;;  %v2419_v29 = vld [vmem:[#allocation3 + $0x2] sm:$0x3]  ;;  %v2575_v25 = vrot.slane %v2567_v59, %v4627_v56 }
0x113f   :  { %v2499_v48 = vld [vmem:[#allocation3 + $0x2] sm:$0x3]  ;;  %2195 = vst.msk [vmem:[#allocation4 + $0x2] sm:$0x3] %vm877_vm14, %v2187_v6  ;;  %v2479_v50 = vmul.f32 %v2444_v24, %v2419_v29 }
0x1140   :  { %v2401_v49 = vadd.f32 %v2395_v43, %v2317_v15  ;;  %2309 = vst.msk [vmem:[#allocation4 + $0x4] sm:$0x3] %vm877_vm14, %v2302_v30  ;;  %v2547_v36 = vmul.f32 %v2523_v8, %v2499_v48  ;;  %v2563_v51 = vld [vmem:[#allocation3 + $0x2] sm:$0x3] }
0x1141   :  { %v2484_v37 = vadd.f32 %v2479_v50, %v2414_v52  ;;  %v2578_v12 = vpop.permute.xlu1 %2577 }
0x1142   :  { %2407 = vst.msk [vmem:[#allocation4 + $0x6] sm:$0x3] %vm877_vm14, %v2401_v49  ;;  %v2586_v2 = vrot.slane %v2578_v12, %v4627_v56  ;;  %v2100_v38 = vpop.permute.xlu0 %2099 }
0x1143   :  { %v2495_v10 = vld [vmem:[#allocation4 + $0xa] sm:$0x3]  ;;  %2489 = vst.msk [vmem:[#allocation4 + $0x8] sm:$0x3] %vm877_vm14, %v2484_v37  ;;  %v2108_v26 = vrot.slane %v2100_v38, %v4627_v56 }
0x1144   :  { %v2497_v33 = vld [vmem:[#allocation4 + $0xe] sm:$0x3]  ;;  %v2551_v53 = vadd.f32 %v2547_v36, %v2495_v10  ;;  %v2599_v7 = vmul.f32 %v2586_v2, %v2563_v51 }
0x1145   :  { %v2553_v55 = vadd.f32 %v2549_v44, %v2497_v33  ;;  %v2589_v21 = vpop.permute.xlu1 %2588 }
0x1146   :  { %2555 = vst.msk [vmem:[#allocation4 + $0xa] sm:$0x3] %vm877_vm14, %v2551_v53  ;;  %v2602_v58 = vadd.f32 %v2599_v7, %v2560_v57  ;;  %v2597_v60 = vrot.slane %v2589_v21, %v4627_v56  ;;  %v2203_v43 = vld [vmem:[#allocation4 + $0x2] sm:$0x3] }
0x1147   :  { %2557 = vst.msk [vmem:[#allocation4 + $0xe] sm:$0x3] %vm877_vm14, %v2553_v55  ;;  %v2316_v40 = vld [vmem:[#allocation4 + $0x4] sm:$0x3] }
0x1148   :  { %2605 = vst.msk [vmem:[#allocation4 + $0xc] sm:$0x3] %vm877_vm14, %v2602_v58  ;;  %v2600_v35 = vmul.f32 %v2597_v60, %v2564_v47  ;;  %v2611_v58 = vld [vmem:[#allocation3 + $0x2] sm:$0x3] }
0x1149   :  { %v875_v17 = vpop.permute.xlu1 %874  ;;  %v2413_v29 = vld [vmem:[#allocation4 + $0x6] sm:$0x3] }
0x114a   :  { %878 = vst.msk [vmem:[#allocation3] sm:$0x3] %vm877_vm14, %v875_v17  ;;  %v2494_v52 = vld [vmem:[#allocation4 + $0x8] sm:$0x3] }
0x114d   :  { %v2219_v41 = vpop.permute.xlu1 %2218  ;;  %v2559_v16 = vld [vmem:[#allocation4 + $0xa] sm:$0x3] }
0x114e   :  { %v2561_v22 = vld [vmem:[#allocation4 + $0xe] sm:$0x3]  ;;  %v2227_v34 = vrot.slane %v2219_v41, %v4627_v56 }
0x114f   :  { %v2603_v28 = vadd.f32 %v2600_v35, %v2561_v22  ;;  %v2608_v51 = vld [vmem:[#allocation4 + $0xc] sm:$0x3] }
0x1151   :  { %2606 = vst.msk [vmem:[#allocation4 + $0xe] sm:$0x3] %vm877_vm14, %v2603_v28  ;;  %v2090_v31 = vld [vmem:[#allocation3] sm:$0x3] }
0x1152   :  { %v2322_v27 = vld [vmem:[#allocation3] sm:$0x3]  ;;  %v2186_v18 = vmul.f32 %v2108_v26, %v2090_v31  ;;  %v2425_v0 = vpop.permute.xlu1 %2424 }
0x1153   :  { %v2562_v19 = vld [vmem:[#allocation3] sm:$0x3]  ;;  %v2394_v61 = vmul.f32 %v2338_v11, %v2322_v27  ;;  %v2433_v63 = vrot.slane %v2425_v0, %v4627_v56 }
0x1154   :  { %v2598_v62 = vmul.f32 %v2575_v25, %v2562_v19  ;;  %v2210_v42 = vld [vmem:[#allocation3] sm:$0x3]  ;;  %2194 = vst.msk [vmem:[#allocation4] sm:$0x3] %vm877_vm14, %v2186_v18  ;;  %v3432_v19 = vrot.slane %v4800_v32, %v4719_v54 }
0x1155   :  { %v2294_v3 = vmul.f32 %v2227_v34, %v2210_v42  ;;  %v2400_v39 = vadd.f32 %v2394_v61, %v2316_v40  ;;  %v2418_v24 = vld [vmem:[#allocation3] sm:$0x3]  ;;  %v3404_v34 = vrot.slane %v4800_v32, %v4199_v4 }
0x1156   :  { %v2601_v6 = vadd.f32 %v2598_v62, %v2559_v16  ;;  %v2478_v15 = vmul.f32 %v2433_v63, %v2418_v24  ;;  %v2498_v50 = vld [vmem:[#allocation3] sm:$0x3]  ;;  %3434 = vbcast.lane.b32.xlu0 %v3432_v19, 256 }
0x1157   :  { %v2301_v30 = vadd.f32 %v2294_v3, %v2203_v43  ;;  %2406 = vst.msk [vmem:[#allocation4 + $0x4] sm:$0x3] %vm877_vm14, %v2400_v39  ;;  %v2504_v48 = vpop.permute.xlu1 %2503  ;;  %v2610_v46 = vld [vmem:[#allocation3] sm:$0x3]  ;;  %3406 = vbcast.lane.b32.xlu1 %v3404_v34, 256 }
0x1158   :  { %2604 = vst.msk [vmem:[#allocation4 + $0xa] sm:$0x3] %vm877_vm14, %v2601_v6  ;;  %v2483_v20 = vadd.f32 %v2478_v15, %v2413_v29  ;;  %v2512_v49 = vrot.slane %v2504_v48, %v4627_v56  ;;  %v2609_v47 = vld [vmem:[#allocation4 + $0xe] sm:$0x3]  ;;  %v4877_v18 = vpop.permute.xlu0 %3154  ;;  %v3617_v54 = vld [vmem:[%s5024_s12] ss:$0 sm:$0xff] }
0x1159   :  { %2308 = vst.msk [vmem:[#allocation4 + $0x2] sm:$0x3] %vm877_vm14, %v2301_v30  ;;  %s3933_s12 = smov 127  }
0x115a   :  { %2488 = vst.msk [vmem:[#allocation4 + $0x6] sm:$0x3] %vm877_vm14, %v2483_v20  ;;  %v2546_v8 = vmul.f32 %v2512_v49, %v2498_v50 }
0x115b   :  { %v2640_v36 = vld [vmem:[#allocation4] sm:$0x3] }
0x115c   :  { %v2550_v23 = vadd.f32 %v2546_v8, %v2494_v52  ;;  %v2614_v37 = vpop.permute.xlu1 %2613 }
0x115d   :  { %v2622_v12 = vrot.slane %v2614_v37, %v4627_v56  ;;  %v3169_v61 = vpop.permute.xlu0 %3168 }
0x115e   :  { %2554 = vst.msk [vmem:[#allocation4 + $0x8] sm:$0x3] %vm877_vm14, %v2550_v23  ;;  %v2642_v53 = vld [vmem:[#allocation4 + $0x4] sm:$0x3]  ;;  %v3225_v24 = vrot.slane %v3169_v61, %v4033_v9 }
0x115f   :  { %v2634_v44 = vmul.f32 %v2622_v12, %v2610_v46  ;;  %v2645_v22 = vld [vmem:[#allocation4 + $0xa] sm:$0x3] }
0x1160   :  { %v2641_v2 = vld [vmem:[#allocation4 + $0x2] sm:$0x3]  ;;  %v2625_v33 = vpop.permute.xlu1 %2624 }
0x1161   :  { %v2671_v10 = vcombine.low %v2640_v36, %v2641_v2  ;;  %v2643_v7 = vld [vmem:[#allocation4 + $0x6] sm:$0x3]  ;;  %v2636_v55 = vadd.f32 %v2634_v44, %v2608_v51  ;;  %v2633_v57 = vrot.slane %v2625_v33, %v4627_v56  ;;  %v3183_v42 = vpop.permute.xlu0 %3182 }
0x1162   :  { %v2672_v21 = vcombine.low %v2642_v53, %v2643_v7  ;;  %v3239_v51 = vrot.slane %v3183_v42, %v4033_v9 }
0x1163   :  { %2638 = vst.msk [vmem:[#allocation4 + $0xc] sm:$0x3] %vm877_vm14, %v2636_v55  ;;  %v2635_v59 = vmul.f32 %v2633_v57, %v2611_v58  ;;  %v2679_v60 = vrot.slane %v2671_v10, %v4033_v9 }
0x1164   :  { %v2686_v17 = vrot.slane %v2672_v21, %v4033_v9  ;;  %v3141_v62 = vpop.permute.xlu1 %3140 }
0x1165   :  { %v2637_v38 = vadd.f32 %v2635_v59, %v2609_v47  ;;  %v2644_v41 = vld [vmem:[#allocation4 + $0x8] sm:$0x3]  ;;  %v4881_v40 = vpop.permute.xlu0 %2973  ;;  %v3197_v46 = vrot.slane %v3141_v62, %v4033_v9 }
0x1166   :  { %v2687_v35 = vcombine.low %v2679_v60, %v2686_v17  ;;  %v2688_v28 = vcombine.low %v2644_v41, %v2645_v22  ;;  %v3620_v22 = vld [vmem:[#allocation10] ss:$0 sm:$0xff] }
0x1167   :  { %2639 = vst.msk [vmem:[#allocation4 + $0xe] sm:$0x3] %vm877_vm14, %v2637_v38 }
0x1168   :  { %3693 = vmatprep.mubr.msk.f32.mxu0 %vm725_vm4, %v2687_v35  ;;  %v2696_v26 = vrot.slane %v2688_v28, %v4033_v9  ;;  %v4879_v0 = vpop.permute.xlu1 %3147 }
0x1169   :  { %v2988_v3 = vpop.permute.xlu0 %2987 }
0x116a   :  { %v2646_v56 = vld [vmem:[#allocation4 + $0xc] sm:$0x3]  ;;  %v3044_v57 = vrot.slane %v2988_v3, %v4033_v9 }
0x116c   :  { %v4883_v16 = vpop.permute.xlu1 %3161 }
0x116e   :  { %v2647_v11 = vld [vmem:[#allocation4 + $0xe] sm:$0x3] }
0x116f   :  { %v2689_v25 = vcombine.low %v2646_v56, %v2647_v11 }
0x1170   :  { %v3176_v63 = vpop.permute.xlu1 %3175 }
0x1171   :  { %v2703_v31 = vrot.slane %v2689_v25, %v4033_v9  ;;  %v3232_v48 = vrot.slane %v3176_v63, %v4033_v9 }
0x1173   :  { %v2704_v27 = vcombine.low %v2696_v26, %v2703_v31 }
0x1175   :  { %3694 = vmatmul.mubr.msk.f32.vlgmr.msra.gmra.mxu0 %vm725_vm4, %v2704_v27  ;;  %v3002_v39 = vpop.permute.xlu0 %3001  ;;  %v4888_v4 = vpop.permute.xlu1 %3189  ;;  %vm3543_vm4 = vcmask 1044484  }
0x1176   :  { %v3058_v44 = vrot.slane %v3002_v39, %v4033_v9 }
0x1179   :  { %v3016_v20 = vpop.permute.xlu0 %3015  ;;  %v4893_v50 = vpop.permute.xlu1 %2980 }
0x117a   :  { %v3072_v7 = vrot.slane %v3016_v20, %v4033_v9 }
0x117d   :  { %v3023_v10 = vpop.permute.xlu0 %3022  ;;  %v2995_v21 = vpop.permute.xlu1 %2994 }
0x117e   :  { %v3079_v58 = vrot.slane %v3023_v10, %v4033_v9  ;;  %v3051_v60 = vrot.slane %v2995_v21, %v4033_v9 }
0x1235   :  { %v3695_v6 = vpop.f32.mrf.mxu0 }
0x1236   :  { %v2781_v43 = vadd.f32 %v3695_v6, %v3617_v54 }
0x1237   :  { %v2775_v30 = vpop.f32.mrf.mxu0 }
0x1238   :  { %v2812_v15 = vrot.slane %v2781_v43, %v4033_v9  ;;  %v2776_v29 = vadd.f32 %v3617_v54, %v2775_v30  ;;  %v2805_v49 = vcombine.high %v2781_v43, %v2781_v43  ;;  %v2785_v31 = vmax.f32 %v2781_v43, 0.0 }
0x123a   :  { %v2788_v8 = vcombine.high %v2776_v29, %v2776_v29  ;;  %v4896_v52 = vrot.slane %v2776_v29, %v4033_v9  ;;  %v3259_v23 = vmul.f32 %v3225_v24, %v2812_v15  ;;  %v4898_v37 = vcombine.high %v2812_v15, %v2812_v15 }
0x123b   :  { %v2784_v12 = vmax.f32 %v2776_v29, 0.0  ;;  %v2819_v36 = vrot.slane %v2805_v49, %v4033_v9  ;;  %v4915_v17 = vmul.f32 %v3058_v44, %v2812_v15  ;;  %v2856_v27 = vrot.slane %v2785_v31, %v4033_v9 }
0x123c   :  { %3279 = vrot.lane.b32.xlu0 %v3259_v23, %s3933_s12  ;;  %v3260_v2 = vmul.f32 %v3232_v48, %v4898_v37  ;;  %v2802_v33 = vrot.slane %v2788_v8, %v4033_v9  ;;  %v3255_v53 = vmul.f32 %v3197_v46, %v4896_v52  ;;  %v2849_v34 = vcombine.high %v2785_v31, %v2785_v31 }
0x123d   :  { %v2839_v55 = vrot.slane %v2784_v12, %v4033_v9  ;;  %v2821_v59 = vcombine.high %v2819_v36, %v2819_v36  ;;  %v3261_v47 = vmul.f32 %v3239_v51, %v2819_v36  ;;  %v4917_v35 = vmul.f32 %v3072_v7, %v2819_v36 }
0x123e   :  { %3281 = vrot.lane.b32.xlu1 %v3260_v2, %s3933_s12  ;;  %v2804_v38 = vcombine.high %v2802_v33, %v2802_v33  ;;  %v4920_v28 = vmul.f32 %v3044_v57, %v2802_v33  ;;  %v2885_v19 = vmul.f32 %v3620_v22, %v2856_v27  ;;  %v2832_v61 = vcombine.high %v2784_v12, %v2784_v12 }
0x123f   :  { %v2847_v41 = vcombine.high %v2839_v55, %v2839_v55  ;;  %v4922_v56 = vmul.f32 %v3079_v58, %v2821_v59  ;;  %v2881_v62 = vmul.f32 %v3620_v22, %v2839_v55  ;;  %v2864_v42 = vcombine.high %v2856_v27, %v2856_v27 }
0x1240   :  { %3271 = vrot.lane.b32.xlu0 %v3255_v53, %s3933_s12  ;;  %v4924_v25 = vmul.f32 %v3051_v60, %v2804_v38  ;;  %v2902_v3 = vsel %vm2889_vm0, %v2885_v19, 0.0  ;;  %v2846_v54 = vrot.slane %v2832_v61, %v4033_v9  ;;  %v2863_v6 = vrot.slane %v2849_v34, %v4033_v9 }
0x1241   :  { %v2882_v11 = vmul.f32 %v3620_v22, %v2847_v41  ;;  %v2890_v63 = vsel %vm2889_vm0, %v2881_v62, 0.0  ;;  %v2886_v39 = vmul.f32 %v3620_v22, %v2864_v42  ;;  %v2803_v48 = vcombine.high %v4896_v52, %v4896_v52  ;;  %v3009_v41 = vpop.permute.xlu1 %3008 }
0x1242   :  { %v2883_v24 = vmul.f32 %v3620_v22, %v2846_v54  ;;  %v2865_v30 = vcombine.high %v2863_v6, %v2863_v6  ;;  %v2848_v20 = vcombine.high %v2846_v54, %v2846_v54  ;;  %v3204_v23 = vrot.slane %v4879_v0, %v4033_v9  ;;  %v4947_v0 = vpop.permute.xlu0 %3413 }
0x1243   :  { %v2893_v26 = vsel %vm2889_vm0, %v2882_v11, 0.0  ;;  %v2905_v43 = vsel %vm2889_vm0, %v2886_v39, 0.0  ;;  %v3211_v12 = vrot.slane %v4877_v18, %v4033_v9  ;;  %v3246_v2 = vrot.slane %v4888_v4, %v4033_v9 }
0x1244   :  { %3283 = vrot.lane.b32.xlu0 %v3261_v47, %s3933_s12  ;;  %v2896_v15 = vsel %vm2889_vm0, %v2883_v24, 0.0  ;;  %v2888_v29 = vmul.f32 %v3620_v22, %v2865_v30  ;;  %v2884_v8 = vmul.f32 %v3620_v22, %v2848_v20  ;;  %v3256_v46 = vmul.f32 %v3204_v23, %v2803_v48 }
0x1245   :  { %v3257_v44 = vmul.f32 %v3211_v12, %v2802_v33  ;;  %v3262_v10 = vmul.f32 %v3246_v2, %v2821_v59  ;;  %v2887_v51 = vmul.f32 %v3620_v22, %v2863_v6  ;;  %v3218_v4 = vrot.slane %v4883_v16, %v4033_v9  ;;  %v4964_v22 = vpop.permute.xlu1 %2921 }
0x1246   :  { %v2911_v49 = vsel %vm2889_vm0, %v2888_v29, 0.0  ;;  %v2899_v36 = vsel %vm2889_vm0, %v2884_v8, 0.0  ;;  %v4949_v53 = vpop.permute.xlu0 %3420  ;;  %v3030_v33 = vrot.slane %v4881_v40, %v4033_v9  ;;  %v3065_v11 = vrot.slane %v3009_v41, %v4033_v9 }
0x1247   :  { %v2908_v18 = vsel %vm2889_vm0, %v2887_v51, 0.0  ;;  %v3258_v21 = vmul.f32 %v3218_v4, %v2804_v38  ;;  %v3446_v24 = vrot.slane %v4800_v32, %v4737_v1  ;;  %v3453_v20 = vrot.slane %v4800_v32, %v4762_v13 }
0x1248   :  { %v3088_v58 = vmul.f32 %v3030_v33, %v4896_v52  ;;  %v3093_v31 = vmul.f32 %v3065_v11, %v4898_v37 }
0x1249   :  { %v3407_v16 = vpop.permute.xlu1 %3406 }
0x124a   :  { %v4952_v7 = vpop.permute.xlu0 %3427 }
0x124e   :  { %v4954_v55 = vpop.permute.xlu0 %3434 }
0x1262   :  { %2903 = vadd.xlane.f32.xlu1 %v2902_v3 }
0x1263   :  { %2891 = vadd.xlane.f32.xlu0 %v2890_v63 }
0x1267   :  { %2906 = vadd.xlane.f32.xlu0 %v2905_v43 }
0x126b   :  { %2897 = vadd.xlane.f32.xlu0 %v2896_v15 }
0x126f   :  { %2912 = vadd.xlane.f32.xlu0 %v2911_v49 }
0x1273   :  { %3273 = vrot.lane.b32.xlu1 %v3256_v46, %s3933_s12  ;;  %2900 = vadd.xlane.f32.xlu0 %v2899_v36 }
0x1277   :  { %3275 = vrot.lane.b32.xlu1 %v3257_v44, %s3933_s12 }
0x127b   :  { %3285 = vrot.lane.b32.xlu1 %v3262_v10, %s3933_s12 }
0x129f   :  { %2909 = vadd.xlane.f32.xlu1 %v2908_v18 }
0x12ae   :  { %v3280_v57 = vpop.permute.xlu0 %3279 }
0x12af   :  { %v3299_v40 = vadd.f32 %v3280_v57, %v4915_v17 }
0x12b0   :  { %3277 = vrot.lane.b32.xlu1 %v3258_v21, %s3933_s12  ;;  %v3282_v38 = vpop.permute.xlu1 %3281 }
0x12b1   :  { %v3345_v52 = vrot.slane %v3299_v40, %v4033_v9  ;;  %v3300_v27 = vadd.f32 %v3282_v38, %v3093_v31 }
0x12b2   :  { %v3272_v59 = vpop.permute.xlu0 %3271 }
0x12b3   :  { %v3295_v60 = vadd.f32 %v3272_v59, %v3088_v58  ;;  %v3352_v34 = vrot.slane %v3300_v27, %v4033_v9 }
0x12b5   :  { %v3317_v47 = vrot.slane %v3295_v60, %v4033_v9 }
0x12b6   :  { %v3284_v19 = vpop.permute.xlu0 %3283 }
0x12b7   :  { %3367 = vrot.lane.b32.xlu0 %v3317_v47, %s3923_s7  ;;  %v3301_v61 = vadd.f32 %v3284_v19, %v4917_v35 }
0x12b9   :  { %v3359_v17 = vrot.slane %v3301_v61, %v4033_v9 }
0x12d4   :  { %2894 = vadd.xlane.f32.xlu1 %v2893_v26  ;;  %v3037_v26 = vrot.slane %v4893_v50, %v4033_v9 }
0x12d6   :  { %v3089_v37 = vmul.f32 %v3037_v26, %v2803_v48 }
0x12e5   :  { %3375 = vrot.lane.b32.xlu1 %v3345_v52, %s3923_s7 }
0x12e9   :  { %3377 = vrot.lane.b32.xlu1 %v3352_v34, %s3923_s7 }
0x12eb   :  { %v2904_v62 = vpop.xlane.xlu1 %2903 }
0x12ec   :  { %v2892_v48 = vpop.xlane.xlu0 %2891 }
0x12ed   :  { %3379 = vrot.lane.b32.xlu1 %v3359_v17, %s3923_s7  ;;  %v2924_v36 = vadd.f32 %v4964_v22, %v2892_v48 }
0x12ef   :  { %v3274_v42 = vpop.permute.xlu1 %3273 }
0x12f0   :  { %v3296_v3 = vadd.f32 %v3274_v42, %v3089_v37  ;;  %v2907_v49 = vpop.xlane.xlu0 %2906 }
0x12f2   :  { %v3324_v63 = vrot.slane %v3296_v3, %v4033_v9  ;;  %v3507_v3 = vsub.s32 %v4275_v14, %v4027_v5 }
0x12f3   :  { %v3276_v39 = vpop.permute.xlu1 %3275 }
0x12f4   :  { %v3297_v54 = vadd.f32 %v3276_v39, %v4920_v28  ;;  %3369 = vrot.lane.b32.xlu1 %v3324_v63, %s3923_s7  ;;  %v2898_v1 = vpop.xlane.xlu0 %2897 }
0x12f5   :  { %v2926_v33 = vadd.f32 %v4964_v22, %v2898_v1 }
0x12f6   :  { %v3331_v35 = vrot.slane %v3297_v54, %v4033_v9 }
0x12f7   :  { %v3286_v6 = vpop.permute.xlu1 %3285 }
0x12f8   :  { %v3302_v50 = vadd.f32 %v3286_v6, %v4922_v56  ;;  %3371 = vrot.lane.b32.xlu1 %v3331_v35, %s3923_s7  ;;  %v3439_v56 = vrot.slane %v4800_v32, %v4751_v45  ;;  %v2913_v8 = vpop.xlane.xlu0 %2912  ;;  %v2929_v45 = vadd.f32 %v4964_v22, %v2907_v49 }
0x12f9   :  { %v2931_v19 = vadd.f32 %v4964_v22, %v2913_v8 }
0x12fa   :  { %v3366_v43 = vrot.slane %v3302_v50, %v4033_v9 }
0x12fc   :  { %3381 = vrot.lane.b32.xlu1 %v3366_v43, %s3923_s7  ;;  %v2901_v23 = vpop.xlane.xlu0 %2900 }
0x12fd   :  { %v2927_v52 = vadd.f32 %v4964_v22, %v2901_v23 }
0x1300   :  { %3448 = vbcast.lane.b32.xlu1 %v3446_v24, 256 }
0x1328   :  { %v2910_v30 = vpop.xlane.xlu1 %2909 }
0x1329   :  { %v3368_v46 = vpop.permute.xlu0 %3367  ;;  %v2930_v60 = vadd.f32 %v4964_v22, %v2910_v30 }
0x132a   :  { %v3391_v44 = vadd.f32 %v3368_v46, %v2924_v36 }
0x132c   :  { %v3278_v15 = vpop.permute.xlu1 %3277  ;;  %v3465_v51 = vmul.f32 %v3407_v16, %v3391_v44 }
0x132d   :  { %v3298_v28 = vadd.f32 %v3278_v15, %v4924_v25  ;;  %v2928_v25 = vadd.f32 %v4964_v22, %v2904_v62 }
0x132f   :  { %v3338_v29 = vrot.slane %v3298_v28, %v4033_v9 }
0x1331   :  { %3373 = vrot.lane.b32.xlu0 %v3338_v29, %s3923_s7 }
0x1335   :  { %3441 = vbcast.lane.b32.xlu0 %v3439_v56, 256 }
0x1339   :  { %3455 = vbcast.lane.b32.xlu0 %v3453_v20, 256 }
0x135d   :  { %v2895_v12 = vpop.xlane.xlu1 %2894 }
0x135e   :  { %v2925_v16 = vadd.f32 %v4964_v22, %v2895_v12 }
0x1361   :  { %v3376_v9 = vpop.permute.xlu1 %3375 }
0x1362   :  { %v3395_v2 = vadd.f32 %v3376_v9, %v2928_v25 }
0x1364   :  { %v3469_v10 = vmul.f32 %v4954_v55, %v3395_v2 }
0x1365   :  { %v3378_v13 = vpop.permute.xlu1 %3377 }
0x1366   :  { %v3396_v32 = vadd.f32 %v3378_v13, %v2929_v45  ;;  %3494 = vperm.xlu1 %3760, %v3469_v10  }
0x1369   :  { %v3380_v18 = vpop.permute.xlu1 %3379 }
0x136a   :  { %3482 = vperm.xlu1 %3760, %v3465_v51   ;;  %v3397_v47 = vadd.f32 %v3380_v18, %v2930_v60 }
0x136d   :  { %v3370_v4 = vpop.permute.xlu1 %3369 }
0x136e   :  { %v3392_v38 = vadd.f32 %v3370_v4, %v2925_v16 }
0x1370   :  { %v3466_v27 = vmul.f32 %v4947_v0, %v3392_v38 }
0x1371   :  { %v3372_v57 = vpop.permute.xlu1 %3371 }
0x1372   :  { %v3393_v21 = vadd.f32 %v3372_v57, %v2926_v33 }
0x1374   :  { %v3467_v58 = vmul.f32 %v4949_v53, %v3393_v21 }
0x1375   :  { %v3382_v59 = vpop.permute.xlu1 %3381 }
0x1376   :  { %3488 = vperm.xlu1 %3760, %v3467_v58   ;;  %v3398_v26 = vadd.f32 %v3382_v59, %v2931_v19 }
0x1379   :  { %v3449_v41 = vpop.permute.xlu1 %3448 }
0x137a   :  { %v3471_v55 = vmul.f32 %v3449_v41, %v3397_v47 }
0x137c   :  { %3500 = vperm.xlu1 %3760, %v3471_v55  }
0x13a3   :  { %v3374_v11 = vpop.permute.xlu0 %3373 }
0x13a4   :  { %v3394_v53 = vadd.f32 %v3374_v11, %v2927_v52 }
0x13a6   :  { %v3468_v34 = vmul.f32 %v4952_v7, %v3394_v53 }
0x13a7   :  { %v3442_v40 = vpop.permute.xlu0 %3441 }
0x13a8   :  { %v3470_v31 = vmul.f32 %v3442_v40, %v3396_v32 }
0x13aa   :  { %3497 = vperm.xlu0 %3759, %v3470_v31  }
0x13ab   :  { %v3456_v61 = vpop.permute.xlu0 %3455 }
0x13ac   :  { %v3472_v17 = vmul.f32 %v3456_v61, %v3398_v26 }
0x13ae   :  { %3485 = vperm.xlu0 %3759, %v3466_v27  }
0x13b2   :  { %3491 = vperm.xlu0 %3759, %v3468_v34  }
0x13b6   :  { %3503 = vperm.xlu0 %3759, %v3472_v17  }
0x13e1   :  { %v3495_v62 = vpop.permute.xlu1 %3494 }
0x13e2   :  { %v3524_v43 = vrot.slane %v3495_v62, %v3507_v3 }
0x13e5   :  { %v3483_v42 = vpop.permute.xlu1 %3482 }
0x13e6   :  { %v3508_v0 = vrot.slane %v3483_v42, %v3507_v3 }
0x13f1   :  { %v3489_v39 = vpop.permute.xlu1 %3488 }
0x13f2   :  { %v3516_v22 = vrot.slane %v3489_v39, %v3507_v3 }
0x13f7   :  { %v3501_v6 = vpop.permute.xlu1 %3500 }
0x13f8   :  { %v3532_v5 = vrot.slane %v3501_v6, %v3507_v3 }
0x1425   :  { %v3498_v37 = vpop.permute.xlu0 %3497 }
0x1426   :  { %v3528_v30 = vrot.slane %v3498_v37, %v3507_v3 }
0x1429   :  { %v3486_v63 = vpop.permute.xlu0 %3485 }
0x142a   :  { %v3512_v54 = vrot.slane %v3486_v63, %v3507_v3 }
0x142c   :  { %v3538_v35 = vsel %vm3537_vm1, %v3512_v54, %v3508_v0 }
0x142d   :  { %v3492_v7 = vpop.permute.xlu0 %3491  ;;  %v3540_v24 = vsel %vm3539_vm2, %v3516_v22, %v3538_v35 }
0x142e   :  { %v3520_v50 = vrot.slane %v3492_v7, %v3507_v3 }
0x1430   :  { %v3542_v15 = vsel %vm3541_vm3, %v3520_v50, %v3540_v24 }
0x1431   :  { %v3544_v14 = vsel %vm3543_vm4, %v3524_v43, %v3542_v15  ;;  %v3504_v28 = vpop.permute.xlu0 %3503 }
0x1432   :  { %v3546_v29 = vsel %vm3545_vm5, %v3528_v30, %v3544_v14  ;;  %v3536_v56 = vrot.slane %v3504_v28, %v3507_v3 }
0x1433   :  { %v3548_v20 = vsel %vm3547_vm6, %v3532_v5, %v3546_v29 }
0x1434   :  { %v3550_v48 = vsel %vm3549_vm7, %v3536_v56, %v3548_v20 }
0x1435   :  { %3553 = vst.msk [vmem:[%s5027_s15] sm:$0xff] %vm3552_vm8, %v3550_v48 }
0x1436   :  { %3558 = vsyncpa [#allocation7], 1 }
0x1437   :  { %3559 = vsyncpa [#allocation9], 1 }

</bundles_post_ra>
